<compile_context>
chip_gen: v5e
topology: v5e:2x2
jax: 0.10.0
libtpu: 0.0.40
codegen_flags: <defaults>
</compile_context>

<pallas_src>
import numpy as np
import jax
import jax.numpy as jnp
from jax import lax
from jax.experimental import pallas as pl
from jax.experimental.pallas import tpu as pltpu

# ---- model dimensions (small, consistent with the module) ----
B = 2      # sz_b
L = 1      # len_q = len_k = len_v (module's squeeze(2) requires 1)
D = 32     # d_model
HF = 12    # head_first (hard-coded 12 in the module)
H = 8      # n_head
DK = 8     # d_k
DV = 8     # d_v
N = B * HF          # 24 rows; inside the kernel rows are ordered n = hf*B + b
HDK = H * DK        # 64  (flattened (head, d_k))
PW = HDK * D        # 2048 (expanded score lane width, index = c*D + m)
EPS = 1e-5          # BatchNorm1d / LayerNorm eps


# --------------------------- the single fused kernel ---------------------------
def fused_mha_kernel(qblk_ref, kblk_ref, kres_ref,
                     wq_ref, bq_ref, wk_ref, bk_ref,
                     f2_ref, wfc2_ref, cfc2_ref, g_ref, beta_ref,
                     o_ref):
    # ---- folded double projection (+ index-embedding), ONE matmul per side ----
    # qf/kf: (N, H*DK); row n = hf*B + b, lane c = head*DK + d
    qf = jnp.dot(qblk_ref[...], wq_ref[...], preferred_element_type=jnp.float32) + bq_ref[...]
    kf = jnp.dot(kblk_ref[...], wk_ref[...], preferred_element_type=jnp.float32) + bk_ref[...]

    # ---- attention2 scores + tline + BatchNorm (folded into f2) ----
    # a[n, c*D + m] = sum_i kf[n, i*DK + d(c)] * WtBN[i*H + head(c), m]
    a = jnp.dot(kf, f2_ref[...], preferred_element_type=jnp.float32)            # (N, PW)

    # qexp[n, c*D + m] = qf[n, c]   (0/1 selection matrix built from iotas, no HBM)
    ci = lax.broadcasted_iota(jnp.int32, (HDK, PW), 0)
    pi = lax.broadcasted_iota(jnp.int32, (HDK, PW), 1)
    x_sel = jnp.where((pi >= ci * D) & (pi < (ci + 1) * D), 1.0, 0.0)
    qexp = jnp.dot(qf, x_sel, preferred_element_type=jnp.float32)               # (N, PW)

    p = qexp * a                                                                # (N, PW)
    # reduce over the 64 score positions: 4 vreg-aligned lane folds (2048 -> 128)
    for w in (PW // 2, PW // 4, PW // 8, PW // 16):
        p = p[:, :w] + p[:, w:]
    # finish the reduction with a tiny selection matmul r4[c4*D + m, m'] = (m == m')
    ri = lax.broadcasted_iota(jnp.int32, (4 * D, D), 0)
    rj = lax.broadcasted_iota(jnp.int32, (4 * D, D), 1)
    r4 = jnp.where((ri == rj) | (ri == rj + D) | (ri == rj + 2 * D) | (ri == rj + 3 * D),
                   1.0, 0.0)
    td = jnp.dot(p, r4, preferred_element_type=jnp.float32)                     # (N, D)

    # ---- fc2 (flatten permutation and -a_r folded into the weight), summed over hf ----
    acc = jnp.zeros((B, D), jnp.float32)
    for hf in range(HF):
        acc = acc + jnp.dot(td[hf * B:(hf + 1) * B, :], wfc2_ref[hf],
                            preferred_element_type=jnp.float32)

    # ---- residual2 (= original k) + folded biases, LayerNorm, b_r-folded affine ----
    xr = acc + cfc2_ref[...] + kres_ref[...]
    mu = jnp.mean(xr, axis=-1, keepdims=True)
    var = jnp.mean((xr - mu) ** 2, axis=-1, keepdims=True)
    xn = (xr - mu) * lax.rsqrt(var + EPS)
    o_ref[...] = xn * g_ref[...] + beta_ref[...]


# ---------------------------------- wrapper ----------------------------------
def multi_head_attention_forward(q, k, v, p):
    del v  # unused by the module's returned value
    q2d = q.reshape(B, D)
    k2d = k.reshape(B, D)
    # Block-structured inputs so the per-hf first projection becomes one matmul:
    #   qblk[hf*B + b, hf2*D + i] = (hf == hf2) * q[b, i]
    eye = jnp.eye(HF, dtype=jnp.float32)
    qblk = (eye[:, None, :, None] * q2d[None, :, None, :]).reshape(N, HF * D)
    kblk = (eye[:, None, :, None] * k2d[None, :, None, :]).reshape(N, HF * D)

    def full(shape):
        return pl.BlockSpec(shape, lambda i, _s=shape: (0,) * len(_s))

    out = pl.pallas_call(
        fused_mha_kernel,
        out_shape=jax.ShapeDtypeStruct((B, D), jnp.float32),
        grid=(1,),
        in_specs=[
            full((N, HF * D)),        # qblk
            full((N, HF * D)),        # kblk
            full((B, D)),             # residual2 = original k
            full((HF * D, HDK)),      # folded w_qs -> w_qs2 weight (stacked over hf)
            full((N, HDK)),           # folded q bias (+ index embedding), per row
            full((HF * D, HDK)),      # folded w_ks -> w_ks2 weight
            full((N, HDK)),           # folded k bias (+ index embedding)
            full((HDK, PW)),          # F2: tline weight * BN scale, expanded
            full((HF, D, D)),         # fc2 weight, permuted, * (-a_r)
            full((1, D)),             # folded fc2/tline/BN bias, * (-a_r)
            full((1, D)),             # b_r * LayerNorm gamma
            full((1, D)),             # b_r * LayerNorm beta
        ],
        out_specs=full((B, D)),
        compiler_params=pltpu.CompilerParams(dimension_semantics=("arbitrary",)),
    )(qblk, kblk, k2d,
      p['wq_stack'], p['bq_full'], p['wk_stack'], p['bk_full'],
      p['f2'], p['wfc2p'], p['cfc2'], p['ln_g'], p['ln_b'])
    return out.reshape(B, L, D)


# ---------------------------------- parameters ----------------------------------
def sinusoid_table(n_position, d_hid):
    pos = np.arange(n_position, dtype=np.float64)[:, None]
    j = np.arange(d_hid)[None, :]
    angle = pos / np.power(10000.0, 2.0 * (j // 2) / d_hid)
    tbl = np.zeros((n_position, d_hid), dtype=np.float64)
    tbl[:, 0::2] = np.sin(angle[:, 0::2])
    tbl[:, 1::2] = np.cos(angle[:, 1::2])
    return jnp.asarray(tbl, jnp.float32)


def make_params(key):
    ks = jax.random.split(key, 17)
    std_qk = float(np.sqrt(2.0 / (D + DK)))
    raw = dict(
        W_qs=std_qk * jax.random.normal(ks[0], (HF * D, D), jnp.float32),   # torch (out, in)
        b_qs=0.02 * jax.random.normal(ks[1], (HF * D,), jnp.float32),
        W_ks=std_qk * jax.random.normal(ks[2], (HF * D, D), jnp.float32),
        b_ks=0.02 * jax.random.normal(ks[3], (HF * D,), jnp.float32),
        W_qs2=0.1 * jax.random.normal(ks[4], (H * DK, D), jnp.float32),
        b_qs2=0.02 * jax.random.normal(ks[5], (H * DK,), jnp.float32),
        W_ks2=0.1 * jax.random.normal(ks[6], (H * DK, D), jnp.float32),
        b_ks2=0.02 * jax.random.normal(ks[7], (H * DK,), jnp.float32),
        W_tline=0.1 * jax.random.normal(ks[8], (D, H * H), jnp.float32),    # attention2.tline
        b_tline=0.02 * jax.random.normal(ks[9], (D,), jnp.float32),
        bn_gamma=1.0 + 0.1 * jax.random.normal(ks[10], (D,), jnp.float32),  # attention2.bn1
        bn_beta=0.05 * jax.random.normal(ks[11], (D,), jnp.float32),
        W_fc2=0.05 * jax.random.normal(ks[12], (D, HF * D), jnp.float32),
        b_fc2=0.02 * jax.random.normal(ks[13], (D,), jnp.float32),
        ln_w=1.0 + 0.1 * jax.random.normal(ks[14], (D,), jnp.float32),      # self.layer_norm
        ln_b=0.05 * jax.random.normal(ks[15], (D,), jnp.float32),
        emb=jax.random.normal(ks[16], (201, DK), jnp.float32),              # src_word_emb
        pos_tbl=sinusoid_table(201, DK),
        a_r=jnp.float32(0.3),   # module default 0.0; nonzero so the path contributes
        b_r=jnp.float32(1.1),   # module default 1.0
    )

    # ---- host-side folds for the fused kernel ----
    bn_scale = raw['bn_gamma'] / jnp.sqrt(1.0 + EPS)          # BN eval fold (rm=0, rv=1)
    ind_flat = (raw['emb'][1:H + 1] + raw['pos_tbl'][:H]).reshape(1, HDK)

    # w_qs (per-hf chunk) composed with w_qs2:  Wfold[hf, i, c] = sum_o W_qs[hf,o,i]*W_qs2[c,o]
    wq_fold = jnp.einsum('hoi,co->hic', raw['W_qs'].reshape(HF, D, D), raw['W_qs2'])
    wk_fold = jnp.einsum('hoi,co->hic', raw['W_ks'].reshape(HF, D, D), raw['W_ks2'])
    bq_fold = raw['b_qs'].reshape(HF, D) @ raw['W_qs2'].T + raw['b_qs2'][None, :] + ind_flat
    bk_fold = raw['b_ks'].reshape(HF, D) @ raw['W_ks2'].T + raw['b_ks2'][None, :] + ind_flat

    # F2[a, c*D + m] = (a%DK == c%DK) * WtBN[(a//DK)*H + (c//DK), m]
    wtbn = raw['W_tline'].T * bn_scale[None, :]               # (HDK, D)
    ai = np.arange(HDK)
    cidx = np.arange(HDK)
    delta = jnp.asarray((ai[:, None] % DK) == (cidx[None, :] % DK), jnp.float32)
    gidx = (ai[:, None] // DK) * H + (cidx[None, :] // DK)
    f2 = (delta[:, :, None] * wtbn[gidx]).reshape(HDK, PW)

    # fc2 pre-permuted for the (hf,d)->(d,hf) flatten and scaled by -a_r
    wfc2p = (-raw['a_r']) * jnp.transpose(raw['W_fc2'].reshape(D, D, HF), (2, 1, 0))  # (HF,D,D)
    btbn = raw['b_tline'] * bn_scale + raw['bn_beta']
    cfc2 = jnp.einsum('d,hdm->m', btbn, wfc2p) + (-raw['a_r']) * raw['b_fc2']

    pre = dict(
        wq_stack=wq_fold.reshape(HF * D, HDK),
        wk_stack=wk_fold.reshape(HF * D, HDK),
        bq_full=jnp.repeat(bq_fold, B, axis=0),               # rows n = hf*B + b
        bk_full=jnp.repeat(bk_fold, B, axis=0),
        f2=f2,
        wfc2p=wfc2p,
        cfc2=cfc2.reshape(1, D),
        ln_g=(raw['b_r'] * raw['ln_w']).reshape(1, D),
        ln_b=(raw['b_r'] * raw['ln_b']).reshape(1, D),
    )
    return raw, pre


# ---------------------------------- pure-JAX reference ----------------------------------
def reference(q, k, raw):
    """Direct transcription of MultiHeadAttention.forward (eval mode, contributing path)."""
    q1 = q.reshape(B, D) @ raw['W_qs'].T + raw['b_qs']
    k1 = k.reshape(B, D) @ raw['W_ks'].T + raw['b_ks']
    q1 = q1.reshape(B, L, HF, D).transpose(0, 2, 1, 3).reshape(B * HF, L, D)
    k1 = k1.reshape(B, L, HF, D).transpose(0, 2, 1, 3).reshape(B * HF, L, D)
    q2 = (q1.reshape(B * HF, D) @ raw['W_qs2'].T + raw['b_qs2']).reshape(B * HF, L, H, DK)
    k2 = (k1.reshape(B * HF, D) @ raw['W_ks2'].T + raw['b_ks2']).reshape(B * HF, L, H, DK)
    ind = raw['emb'][1:H + 1] + raw['pos_tbl'][:H]
    qf = q2.transpose(0, 2, 1, 3)[:, :, 0, :] + ind[None]        # (N, H, DK)
    kf = k2.transpose(0, 2, 1, 3)[:, :, 0, :] + ind[None]
    S = jnp.einsum('nhd,ngd->nhg', kf, qf)                       # attention2(k, q, v) scores
    t = S.reshape(B * HF, H * H) @ raw['W_tline'].T + raw['b_tline']
    t = t / jnp.sqrt(1.0 + EPS) * raw['bn_gamma'] + raw['bn_beta']   # BatchNorm1d eval
    o2 = t.reshape(B, HF, D).transpose(0, 2, 1).reshape(B, HF * D)
    o2 = (o2 @ raw['W_fc2'].T + raw['b_fc2'])[:, None, :]
    x = -raw['a_r'] * o2 + k                                     # residual2 = k input
    mu = x.mean(-1, keepdims=True)
    var = ((x - mu) ** 2).mean(-1, keepdims=True)
    xn = (x - mu) / jnp.sqrt(var + EPS)
    return raw['b_r'] * (xn * raw['ln_w'] + raw['ln_b'])


if __name__ == "__main__":
    key = jax.random.PRNGKey(0)
    kq, kk, kv, kp = jax.random.split(key, 4)
    q = jax.random.normal(kq, (B, L, D), jnp.float32)
    k = jax.random.normal(kk, (B, L, D), jnp.float32)
    v = jax.random.normal(kv, (B, L, D), jnp.float32)
    raw, pre = make_params(kp)

    fwd = jax.jit(multi_head_attention_forward)
    out = fwd(q, k, v, pre)
    out = jax.block_until_ready(out)

    ref = reference(q, k, raw)
    np.testing.assert_allclose(np.asarray(out), np.asarray(ref), rtol=3e-4, atol=3e-4)
    print("KERNEL_OK")
</pallas_src>

<mosaic_0001>
module attributes {stable_mosaic.version = 11 : i64} {
  func.func @fused_mha_kernel(%arg0: i32, %arg1: memref<24x384xf32, #tpu.memory_space<vmem>>, %arg2: memref<24x384xf32, #tpu.memory_space<vmem>>, %arg3: memref<2x32xf32, #tpu.memory_space<vmem>>, %arg4: memref<384x64xf32, #tpu.memory_space<vmem>>, %arg5: memref<24x64xf32, #tpu.memory_space<vmem>>, %arg6: memref<384x64xf32, #tpu.memory_space<vmem>>, %arg7: memref<24x64xf32, #tpu.memory_space<vmem>>, %arg8: memref<64x2048xf32, #tpu.memory_space<vmem>>, %arg9: memref<12x32x32xf32, #tpu.memory_space<vmem>>, %arg10: memref<1x32xf32, #tpu.memory_space<vmem>>, %arg11: memref<1x32xf32, #tpu.memory_space<vmem>>, %arg12: memref<1x32xf32, #tpu.memory_space<vmem>>, %arg13: memref<2x32xf32, #tpu.memory_space<vmem>>) attributes {dimension_semantics = [#tpu.dimension_semantics<arbitrary>], iteration_bounds = array<i64: 1>, scalar_prefetch = 0 : i64, scratch_operands = 0 : i64, tpu.core_type = #tpu.core_type<tc>, window_params = [{pipeline_mode = #tpu.pipeline_mode<synchronous>, transform_indices = @transform_0, window_bounds = array<i64: 24, 384>}, {pipeline_mode = #tpu.pipeline_mode<synchronous>, transform_indices = @transform_1, window_bounds = array<i64: 24, 384>}, {pipeline_mode = #tpu.pipeline_mode<synchronous>, transform_indices = @transform_2, window_bounds = array<i64: 2, 32>}, {pipeline_mode = #tpu.pipeline_mode<synchronous>, transform_indices = @transform_3, window_bounds = array<i64: 384, 64>}, {pipeline_mode = #tpu.pipeline_mode<synchronous>, transform_indices = @transform_4, window_bounds = array<i64: 24, 64>}, {pipeline_mode = #tpu.pipeline_mode<synchronous>, transform_indices = @transform_5, window_bounds = array<i64: 384, 64>}, {pipeline_mode = #tpu.pipeline_mode<synchronous>, transform_indices = @transform_6, window_bounds = array<i64: 24, 64>}, {pipeline_mode = #tpu.pipeline_mode<synchronous>, transform_indices = @transform_7, window_bounds = array<i64: 64, 2048>}, {pipeline_mode = #tpu.pipeline_mode<synchronous>, transform_indices = @transform_8, window_bounds = array<i64: 12, 32, 32>}, {pipeline_mode = #tpu.pipeline_mode<synchronous>, transform_indices = @transform_9, window_bounds = array<i64: 1, 32>}, {pipeline_mode = #tpu.pipeline_mode<synchronous>, transform_indices = @transform_10, window_bounds = array<i64: 1, 32>}, {pipeline_mode = #tpu.pipeline_mode<synchronous>, transform_indices = @transform_11, window_bounds = array<i64: 1, 32>}, {pipeline_mode = #tpu.pipeline_mode<synchronous>, transform_indices = @transform_12, window_bounds = array<i64: 2, 32>}]} {
    %c0 = arith.constant 0 : index
    %c0_0 = arith.constant 0 : index
    %0 = vector.load %arg1[%c0, %c0_0] : memref<24x384xf32, #tpu.memory_space<vmem>>, vector<24x384xf32>
    %c0_1 = arith.constant 0 : index
    %c0_2 = arith.constant 0 : index
    %1 = vector.load %arg4[%c0_1, %c0_2] : memref<384x64xf32, #tpu.memory_space<vmem>>, vector<384x64xf32>
    %cst = arith.constant dense<0.000000e+00> : vector<24x64xf32>
    %2 = tpu.matmul %0, %1, %cst {dimension_numbers = #tpu.dot_dimension_numbers<[1], [0], [0], [1], [0, 0, 1, 1], [], []>} : vector<24x384xf32>, vector<384x64xf32>, vector<24x64xf32> -> vector<24x64xf32>
    %c0_3 = arith.constant 0 : index
    %c0_4 = arith.constant 0 : index
    %3 = vector.load %arg5[%c0_3, %c0_4] : memref<24x64xf32, #tpu.memory_space<vmem>>, vector<24x64xf32>
    %4 = arith.addf %2, %3 : vector<24x64xf32>
    %c0_5 = arith.constant 0 : index
    %c0_6 = arith.constant 0 : index
    %5 = vector.load %arg2[%c0_5, %c0_6] : memref<24x384xf32, #tpu.memory_space<vmem>>, vector<24x384xf32>
    %c0_7 = arith.constant 0 : index
    %c0_8 = arith.constant 0 : index
    %6 = vector.load %arg6[%c0_7, %c0_8] : memref<384x64xf32, #tpu.memory_space<vmem>>, vector<384x64xf32>
    %cst_9 = arith.constant dense<0.000000e+00> : vector<24x64xf32>
    %7 = tpu.matmul %5, %6, %cst_9 {dimension_numbers = #tpu.dot_dimension_numbers<[1], [0], [0], [1], [0, 0, 1, 1], [], []>} : vector<24x384xf32>, vector<384x64xf32>, vector<24x64xf32> -> vector<24x64xf32>
    %c0_10 = arith.constant 0 : index
    %c0_11 = arith.constant 0 : index
    %8 = vector.load %arg7[%c0_10, %c0_11] : memref<24x64xf32, #tpu.memory_space<vmem>>, vector<24x64xf32>
    %9 = arith.addf %7, %8 : vector<24x64xf32>
    %c0_12 = arith.constant 0 : index
    %c0_13 = arith.constant 0 : index
    %10 = vector.load %arg8[%c0_12, %c0_13] : memref<64x2048xf32, #tpu.memory_space<vmem>>, vector<64x2048xf32>
    %cst_14 = arith.constant dense<0.000000e+00> : vector<24x2048xf32>
    %11 = tpu.matmul %9, %10, %cst_14 {dimension_numbers = #tpu.dot_dimension_numbers<[1], [0], [0], [1], [0, 0, 1, 1], [], []>} : vector<24x64xf32>, vector<64x2048xf32>, vector<24x2048xf32> -> vector<24x2048xf32>
    %12 = tpu.iota {dimensions = array<i32: 0>} : vector<64x2048xi32>
    %13 = tpu.iota {dimensions = array<i32: 1>} : vector<64x2048xi32>
    %c32_i32 = arith.constant 32 : i32
    %14 = vector.broadcast %c32_i32 : i32 to vector<64x2048xi32>
    %15 = arith.muli %12, %14 : vector<64x2048xi32>
    %16 = arith.cmpi sge, %13, %15 : vector<64x2048xi32>
    %c1_i32 = arith.constant 1 : i32
    %17 = vector.broadcast %c1_i32 : i32 to vector<64x2048xi32>
    %18 = arith.addi %12, %17 : vector<64x2048xi32>
    %c32_i32_15 = arith.constant 32 : i32
    %19 = vector.broadcast %c32_i32_15 : i32 to vector<64x2048xi32>
    %20 = arith.muli %18, %19 : vector<64x2048xi32>
    %21 = arith.cmpi slt, %13, %20 : vector<64x2048xi32>
    %22 = arith.andi %16, %21 : vector<64x2048xi1>
    %cst_16 = arith.constant 1.000000e+00 : f32
    %cst_17 = arith.constant 0.000000e+00 : f32
    %23 = vector.broadcast %cst_16 : f32 to vector<64x2048xf32>
    %24 = vector.broadcast %cst_17 : f32 to vector<64x2048xf32>
    %25 = arith.select %22, %23, %24 : vector<64x2048xi1>, vector<64x2048xf32>
    %cst_18 = arith.constant dense<0.000000e+00> : vector<24x2048xf32>
    %26 = tpu.matmul %4, %25, %cst_18 {dimension_numbers = #tpu.dot_dimension_numbers<[1], [0], [0], [1], [0, 0, 1, 1], [], []>} : vector<24x64xf32>, vector<64x2048xf32>, vector<24x2048xf32> -> vector<24x2048xf32>
    %27 = arith.mulf %26, %11 : vector<24x2048xf32>
    %28 = vector.extract_strided_slice %27 {offsets = [0, 0], sizes = [24, 1024], strides = [1, 1]} : vector<24x2048xf32> to vector<24x1024xf32>
    %29 = vector.extract_strided_slice %27 {offsets = [0, 1024], sizes = [24, 1024], strides = [1, 1]} : vector<24x2048xf32> to vector<24x1024xf32>
    %30 = arith.addf %28, %29 : vector<24x1024xf32>
    %31 = vector.extract_strided_slice %30 {offsets = [0, 0], sizes = [24, 512], strides = [1, 1]} : vector<24x1024xf32> to vector<24x512xf32>
    %32 = vector.extract_strided_slice %30 {offsets = [0, 512], sizes = [24, 512], strides = [1, 1]} : vector<24x1024xf32> to vector<24x512xf32>
    %33 = arith.addf %31, %32 : vector<24x512xf32>
    %34 = vector.extract_strided_slice %33 {offsets = [0, 0], sizes = [24, 256], strides = [1, 1]} : vector<24x512xf32> to vector<24x256xf32>
    %35 = vector.extract_strided_slice %33 {offsets = [0, 256], sizes = [24, 256], strides = [1, 1]} : vector<24x512xf32> to vector<24x256xf32>
    %36 = arith.addf %34, %35 : vector<24x256xf32>
    %37 = vector.extract_strided_slice %36 {offsets = [0, 0], sizes = [24, 128], strides = [1, 1]} : vector<24x256xf32> to vector<24x128xf32>
    %38 = vector.extract_strided_slice %36 {offsets = [0, 128], sizes = [24, 128], strides = [1, 1]} : vector<24x256xf32> to vector<24x128xf32>
    %39 = arith.addf %37, %38 : vector<24x128xf32>
    %40 = tpu.iota {dimensions = array<i32: 0>} : vector<128x32xi32>
    %41 = tpu.iota {dimensions = array<i32: 1>} : vector<128x32xi32>
    %42 = arith.cmpi eq, %40, %41 : vector<128x32xi32>
    %c32_i32_19 = arith.constant 32 : i32
    %43 = vector.broadcast %c32_i32_19 : i32 to vector<128x32xi32>
    %44 = arith.addi %41, %43 : vector<128x32xi32>
    %45 = arith.cmpi eq, %40, %44 : vector<128x32xi32>
    %46 = arith.ori %42, %45 : vector<128x32xi1>
    %c64_i32 = arith.constant 64 : i32
    %47 = vector.broadcast %c64_i32 : i32 to vector<128x32xi32>
    %48 = arith.addi %41, %47 : vector<128x32xi32>
    %49 = arith.cmpi eq, %40, %48 : vector<128x32xi32>
    %50 = arith.ori %46, %49 : vector<128x32xi1>
    %c96_i32 = arith.constant 96 : i32
    %51 = vector.broadcast %c96_i32 : i32 to vector<128x32xi32>
    %52 = arith.addi %41, %51 : vector<128x32xi32>
    %53 = arith.cmpi eq, %40, %52 : vector<128x32xi32>
    %54 = arith.ori %50, %53 : vector<128x32xi1>
    %cst_20 = arith.constant 1.000000e+00 : f32
    %cst_21 = arith.constant 0.000000e+00 : f32
    %55 = vector.broadcast %cst_20 : f32 to vector<128x32xf32>
    %56 = vector.broadcast %cst_21 : f32 to vector<128x32xf32>
    %57 = arith.select %54, %55, %56 : vector<128x32xi1>, vector<128x32xf32>
    %cst_22 = arith.constant dense<0.000000e+00> : vector<24x32xf32>
    %58 = tpu.matmul %39, %57, %cst_22 {dimension_numbers = #tpu.dot_dimension_numbers<[1], [0], [0], [1], [0, 0, 1, 1], [], []>} : vector<24x128xf32>, vector<128x32xf32>, vector<24x32xf32> -> vector<24x32xf32>
    %cst_23 = arith.constant 0.000000e+00 : f32
    %59 = vector.broadcast %cst_23 : f32 to vector<2x32xf32>
    %60 = vector.extract_strided_slice %58 {offsets = [0, 0], sizes = [2, 32], strides = [1, 1]} : vector<24x32xf32> to vector<2x32xf32>
    %c0_24 = arith.constant 0 : index
    %c0_25 = arith.constant 0 : index
    %c0_26 = arith.constant 0 : index
    %61 = vector.load %arg9[%c0_24, %c0_25, %c0_26] : memref<12x32x32xf32, #tpu.memory_space<vmem>>, vector<1x32x32xf32>
    %62 = vector.shape_cast %61 : vector<1x32x32xf32> to vector<32x32xf32>
    %cst_27 = arith.constant dense<0.000000e+00> : vector<2x32xf32>
    %63 = tpu.matmul %60, %62, %cst_27 {dimension_numbers = #tpu.dot_dimension_numbers<[1], [0], [0], [1], [0, 0, 1, 1], [], []>} : vector<2x32xf32>, vector<32x32xf32>, vector<2x32xf32> -> vector<2x32xf32>
    %64 = arith.addf %59, %63 : vector<2x32xf32>
    %65 = vector.extract_strided_slice %58 {offsets = [2, 0], sizes = [2, 32], strides = [1, 1]} : vector<24x32xf32> to vector<2x32xf32>
    %c1 = arith.constant 1 : index
    %c0_28 = arith.constant 0 : index
    %c0_29 = arith.constant 0 : index
    %66 = vector.load %arg9[%c1, %c0_28, %c0_29] : memref<12x32x32xf32, #tpu.memory_space<vmem>>, vector<1x32x32xf32>
    %67 = vector.shape_cast %66 : vector<1x32x32xf32> to vector<32x32xf32>
    %cst_30 = arith.constant dense<0.000000e+00> : vector<2x32xf32>
    %68 = tpu.matmul %65, %67, %cst_30 {dimension_numbers = #tpu.dot_dimension_numbers<[1], [0], [0], [1], [0, 0, 1, 1], [], []>} : vector<2x32xf32>, vector<32x32xf32>, vector<2x32xf32> -> vector<2x32xf32>
    %69 = arith.addf %64, %68 : vector<2x32xf32>
    %70 = vector.extract_strided_slice %58 {offsets = [4, 0], sizes = [2, 32], strides = [1, 1]} : vector<24x32xf32> to vector<2x32xf32>
    %c2 = arith.constant 2 : index
    %c0_31 = arith.constant 0 : index
    %c0_32 = arith.constant 0 : index
    %71 = vector.load %arg9[%c2, %c0_31, %c0_32] : memref<12x32x32xf32, #tpu.memory_space<vmem>>, vector<1x32x32xf32>
    %72 = vector.shape_cast %71 : vector<1x32x32xf32> to vector<32x32xf32>
    %cst_33 = arith.constant dense<0.000000e+00> : vector<2x32xf32>
    %73 = tpu.matmul %70, %72, %cst_33 {dimension_numbers = #tpu.dot_dimension_numbers<[1], [0], [0], [1], [0, 0, 1, 1], [], []>} : vector<2x32xf32>, vector<32x32xf32>, vector<2x32xf32> -> vector<2x32xf32>
    %74 = arith.addf %69, %73 : vector<2x32xf32>
    %75 = vector.extract_strided_slice %58 {offsets = [6, 0], sizes = [2, 32], strides = [1, 1]} : vector<24x32xf32> to vector<2x32xf32>
    %c3 = arith.constant 3 : index
    %c0_34 = arith.constant 0 : index
    %c0_35 = arith.constant 0 : index
    %76 = vector.load %arg9[%c3, %c0_34, %c0_35] : memref<12x32x32xf32, #tpu.memory_space<vmem>>, vector<1x32x32xf32>
    %77 = vector.shape_cast %76 : vector<1x32x32xf32> to vector<32x32xf32>
    %cst_36 = arith.constant dense<0.000000e+00> : vector<2x32xf32>
    %78 = tpu.matmul %75, %77, %cst_36 {dimension_numbers = #tpu.dot_dimension_numbers<[1], [0], [0], [1], [0, 0, 1, 1], [], []>} : vector<2x32xf32>, vector<32x32xf32>, vector<2x32xf32> -> vector<2x32xf32>
    %79 = arith.addf %74, %78 : vector<2x32xf32>
    %80 = vector.extract_strided_slice %58 {offsets = [8, 0], sizes = [2, 32], strides = [1, 1]} : vector<24x32xf32> to vector<2x32xf32>
    %c4 = arith.constant 4 : index
    %c0_37 = arith.constant 0 : index
    %c0_38 = arith.constant 0 : index
    %81 = vector.load %arg9[%c4, %c0_37, %c0_38] : memref<12x32x32xf32, #tpu.memory_space<vmem>>, vector<1x32x32xf32>
    %82 = vector.shape_cast %81 : vector<1x32x32xf32> to vector<32x32xf32>
    %cst_39 = arith.constant dense<0.000000e+00> : vector<2x32xf32>
    %83 = tpu.matmul %80, %82, %cst_39 {dimension_numbers = #tpu.dot_dimension_numbers<[1], [0], [0], [1], [0, 0, 1, 1], [], []>} : vector<2x32xf32>, vector<32x32xf32>, vector<2x32xf32> -> vector<2x32xf32>
    %84 = arith.addf %79, %83 : vector<2x32xf32>
    %85 = vector.extract_strided_slice %58 {offsets = [10, 0], sizes = [2, 32], strides = [1, 1]} : vector<24x32xf32> to vector<2x32xf32>
    %c5 = arith.constant 5 : index
    %c0_40 = arith.constant 0 : index
    %c0_41 = arith.constant 0 : index
    %86 = vector.load %arg9[%c5, %c0_40, %c0_41] : memref<12x32x32xf32, #tpu.memory_space<vmem>>, vector<1x32x32xf32>
    %87 = vector.shape_cast %86 : vector<1x32x32xf32> to vector<32x32xf32>
    %cst_42 = arith.constant dense<0.000000e+00> : vector<2x32xf32>
    %88 = tpu.matmul %85, %87, %cst_42 {dimension_numbers = #tpu.dot_dimension_numbers<[1], [0], [0], [1], [0, 0, 1, 1], [], []>} : vector<2x32xf32>, vector<32x32xf32>, vector<2x32xf32> -> vector<2x32xf32>
    %89 = arith.addf %84, %88 : vector<2x32xf32>
    %90 = vector.extract_strided_slice %58 {offsets = [12, 0], sizes = [2, 32], strides = [1, 1]} : vector<24x32xf32> to vector<2x32xf32>
    %c6 = arith.constant 6 : index
    %c0_43 = arith.constant 0 : index
    %c0_44 = arith.constant 0 : index
    %91 = vector.load %arg9[%c6, %c0_43, %c0_44] : memref<12x32x32xf32, #tpu.memory_space<vmem>>, vector<1x32x32xf32>
    %92 = vector.shape_cast %91 : vector<1x32x32xf32> to vector<32x32xf32>
    %cst_45 = arith.constant dense<0.000000e+00> : vector<2x32xf32>
    %93 = tpu.matmul %90, %92, %cst_45 {dimension_numbers = #tpu.dot_dimension_numbers<[1], [0], [0], [1], [0, 0, 1, 1], [], []>} : vector<2x32xf32>, vector<32x32xf32>, vector<2x32xf32> -> vector<2x32xf32>
    %94 = arith.addf %89, %93 : vector<2x32xf32>
    %95 = vector.extract_strided_slice %58 {offsets = [14, 0], sizes = [2, 32], strides = [1, 1]} : vector<24x32xf32> to vector<2x32xf32>
    %c7 = arith.constant 7 : index
    %c0_46 = arith.constant 0 : index
    %c0_47 = arith.constant 0 : index
    %96 = vector.load %arg9[%c7, %c0_46, %c0_47] : memref<12x32x32xf32, #tpu.memory_space<vmem>>, vector<1x32x32xf32>
    %97 = vector.shape_cast %96 : vector<1x32x32xf32> to vector<32x32xf32>
    %cst_48 = arith.constant dense<0.000000e+00> : vector<2x32xf32>
    %98 = tpu.matmul %95, %97, %cst_48 {dimension_numbers = #tpu.dot_dimension_numbers<[1], [0], [0], [1], [0, 0, 1, 1], [], []>} : vector<2x32xf32>, vector<32x32xf32>, vector<2x32xf32> -> vector<2x32xf32>
    %99 = arith.addf %94, %98 : vector<2x32xf32>
    %100 = vector.extract_strided_slice %58 {offsets = [16, 0], sizes = [2, 32], strides = [1, 1]} : vector<24x32xf32> to vector<2x32xf32>
    %c8 = arith.constant 8 : index
    %c0_49 = arith.constant 0 : index
    %c0_50 = arith.constant 0 : index
    %101 = vector.load %arg9[%c8, %c0_49, %c0_50] : memref<12x32x32xf32, #tpu.memory_space<vmem>>, vector<1x32x32xf32>
    %102 = vector.shape_cast %101 : vector<1x32x32xf32> to vector<32x32xf32>
    %cst_51 = arith.constant dense<0.000000e+00> : vector<2x32xf32>
    %103 = tpu.matmul %100, %102, %cst_51 {dimension_numbers = #tpu.dot_dimension_numbers<[1], [0], [0], [1], [0, 0, 1, 1], [], []>} : vector<2x32xf32>, vector<32x32xf32>, vector<2x32xf32> -> vector<2x32xf32>
    %104 = arith.addf %99, %103 : vector<2x32xf32>
    %105 = vector.extract_strided_slice %58 {offsets = [18, 0], sizes = [2, 32], strides = [1, 1]} : vector<24x32xf32> to vector<2x32xf32>
    %c9 = arith.constant 9 : index
    %c0_52 = arith.constant 0 : index
    %c0_53 = arith.constant 0 : index
    %106 = vector.load %arg9[%c9, %c0_52, %c0_53] : memref<12x32x32xf32, #tpu.memory_space<vmem>>, vector<1x32x32xf32>
    %107 = vector.shape_cast %106 : vector<1x32x32xf32> to vector<32x32xf32>
    %cst_54 = arith.constant dense<0.000000e+00> : vector<2x32xf32>
    %108 = tpu.matmul %105, %107, %cst_54 {dimension_numbers = #tpu.dot_dimension_numbers<[1], [0], [0], [1], [0, 0, 1, 1], [], []>} : vector<2x32xf32>, vector<32x32xf32>, vector<2x32xf32> -> vector<2x32xf32>
    %109 = arith.addf %104, %108 : vector<2x32xf32>
    %110 = vector.extract_strided_slice %58 {offsets = [20, 0], sizes = [2, 32], strides = [1, 1]} : vector<24x32xf32> to vector<2x32xf32>
    %c10 = arith.constant 10 : index
    %c0_55 = arith.constant 0 : index
    %c0_56 = arith.constant 0 : index
    %111 = vector.load %arg9[%c10, %c0_55, %c0_56] : memref<12x32x32xf32, #tpu.memory_space<vmem>>, vector<1x32x32xf32>
    %112 = vector.shape_cast %111 : vector<1x32x32xf32> to vector<32x32xf32>
    %cst_57 = arith.constant dense<0.000000e+00> : vector<2x32xf32>
    %113 = tpu.matmul %110, %112, %cst_57 {dimension_numbers = #tpu.dot_dimension_numbers<[1], [0], [0], [1], [0, 0, 1, 1], [], []>} : vector<2x32xf32>, vector<32x32xf32>, vector<2x32xf32> -> vector<2x32xf32>
    %114 = arith.addf %109, %113 : vector<2x32xf32>
    %115 = vector.extract_strided_slice %58 {offsets = [22, 0], sizes = [2, 32], strides = [1, 1]} : vector<24x32xf32> to vector<2x32xf32>
    %c11 = arith.constant 11 : index
    %c0_58 = arith.constant 0 : index
    %c0_59 = arith.constant 0 : index
    %116 = vector.load %arg9[%c11, %c0_58, %c0_59] : memref<12x32x32xf32, #tpu.memory_space<vmem>>, vector<1x32x32xf32>
    %117 = vector.shape_cast %116 : vector<1x32x32xf32> to vector<32x32xf32>
    %cst_60 = arith.constant dense<0.000000e+00> : vector<2x32xf32>
    %118 = tpu.matmul %115, %117, %cst_60 {dimension_numbers = #tpu.dot_dimension_numbers<[1], [0], [0], [1], [0, 0, 1, 1], [], []>} : vector<2x32xf32>, vector<32x32xf32>, vector<2x32xf32> -> vector<2x32xf32>
    %119 = arith.addf %114, %118 : vector<2x32xf32>
    %c0_61 = arith.constant 0 : index
    %c0_62 = arith.constant 0 : index
    %120 = vector.load %arg10[%c0_61, %c0_62] : memref<1x32xf32, #tpu.memory_space<vmem>>, vector<1x32xf32>
    %121 = vector.broadcast %120 : vector<1x32xf32> to vector<2x32xf32>
    %122 = arith.addf %119, %121 : vector<2x32xf32>
    %c0_63 = arith.constant 0 : index
    %c0_64 = arith.constant 0 : index
    %123 = vector.load %arg3[%c0_63, %c0_64] : memref<2x32xf32, #tpu.memory_space<vmem>>, vector<2x32xf32>
    %124 = arith.addf %122, %123 : vector<2x32xf32>
    %cst_65 = arith.constant dense<0.000000e+00> : vector<2xf32>
    %125 = vector.multi_reduction <add>, %124, %cst_65 [1] : vector<2x32xf32> to vector<2xf32>
    %126 = vector.shape_cast %125 : vector<2xf32> to vector<2x1xf32>
    %cst_66 = arith.constant 3.200000e+01 : f32
    %127 = vector.broadcast %cst_66 : f32 to vector<2x1xf32>
    %128 = arith.divf %126, %127 : vector<2x1xf32>
    %129 = vector.broadcast %128 : vector<2x1xf32> to vector<2x32xf32>
    %130 = arith.subf %124, %129 : vector<2x32xf32>
    %131 = arith.mulf %130, %130 : vector<2x32xf32>
    %cst_67 = arith.constant dense<0.000000e+00> : vector<2xf32>
    %132 = vector.multi_reduction <add>, %131, %cst_67 [1] : vector<2x32xf32> to vector<2xf32>
    %133 = vector.shape_cast %132 : vector<2xf32> to vector<2x1xf32>
    %cst_68 = arith.constant 3.200000e+01 : f32
    %134 = vector.broadcast %cst_68 : f32 to vector<2x1xf32>
    %135 = arith.divf %133, %134 : vector<2x1xf32>
    %136 = vector.broadcast %128 : vector<2x1xf32> to vector<2x32xf32>
    %137 = arith.subf %124, %136 : vector<2x32xf32>
    %cst_69 = arith.constant 9.99999974E-6 : f32
    %138 = vector.broadcast %cst_69 : f32 to vector<2x1xf32>
    %139 = arith.addf %135, %138 : vector<2x1xf32>
    %140 = math.rsqrt %139 : vector<2x1xf32>
    %141 = vector.broadcast %140 : vector<2x1xf32> to vector<2x32xf32>
    %142 = arith.mulf %137, %141 : vector<2x32xf32>
    %c0_70 = arith.constant 0 : index
    %c0_71 = arith.constant 0 : index
    %143 = vector.load %arg11[%c0_70, %c0_71] : memref<1x32xf32, #tpu.memory_space<vmem>>, vector<1x32xf32>
    %144 = vector.broadcast %143 : vector<1x32xf32> to vector<2x32xf32>
    %145 = arith.mulf %142, %144 : vector<2x32xf32>
    %c0_72 = arith.constant 0 : index
    %c0_73 = arith.constant 0 : index
    %146 = vector.load %arg12[%c0_72, %c0_73] : memref<1x32xf32, #tpu.memory_space<vmem>>, vector<1x32xf32>
    %147 = vector.broadcast %146 : vector<1x32xf32> to vector<2x32xf32>
    %148 = arith.addf %145, %147 : vector<2x32xf32>
    %c0_74 = arith.constant 0 : index
    %c0_75 = arith.constant 0 : index
    %149 = vector.load %arg13[%c0_74, %c0_75] : memref<2x32xf32, #tpu.memory_space<vmem>>, vector<2x32xf32>
    tpu.vector_store %arg13[%c0_74, %c0_75], %148 {strides = array<i32>} : memref<2x32xf32, #tpu.memory_space<vmem>>, vector<2x32xf32>,
    return
  }
  func.func @transform_0(%arg0: i32) -> (i32, i32) {
    %c0_i32 = arith.constant 0 : i32
    %c0_i32_0 = arith.constant 0 : i32
    %c0_i32_1 = arith.constant 0 : i32
    return %c0_i32, %c0_i32_0 : i32, i32
  }
  func.func @transform_1(%arg0: i32) -> (i32, i32) {
    %c0_i32 = arith.constant 0 : i32
    %c0_i32_0 = arith.constant 0 : i32
    %c0_i32_1 = arith.constant 0 : i32
    return %c0_i32, %c0_i32_0 : i32, i32
  }
  func.func @transform_2(%arg0: i32) -> (i32, i32) {
    %c0_i32 = arith.constant 0 : i32
    %c0_i32_0 = arith.constant 0 : i32
    %c0_i32_1 = arith.constant 0 : i32
    return %c0_i32, %c0_i32_0 : i32, i32
  }
  func.func @transform_3(%arg0: i32) -> (i32, i32) {
    %c0_i32 = arith.constant 0 : i32
    %c0_i32_0 = arith.constant 0 : i32
    %c0_i32_1 = arith.constant 0 : i32
    return %c0_i32, %c0_i32_0 : i32, i32
  }
  func.func @transform_4(%arg0: i32) -> (i32, i32) {
    %c0_i32 = arith.constant 0 : i32
    %c0_i32_0 = arith.constant 0 : i32
    %c0_i32_1 = arith.constant 0 : i32
    return %c0_i32, %c0_i32_0 : i32, i32
  }
  func.func @transform_5(%arg0: i32) -> (i32, i32) {
    %c0_i32 = arith.constant 0 : i32
    %c0_i32_0 = arith.constant 0 : i32
    %c0_i32_1 = arith.constant 0 : i32
    return %c0_i32, %c0_i32_0 : i32, i32
  }
  func.func @transform_6(%arg0: i32) -> (i32, i32) {
    %c0_i32 = arith.constant 0 : i32
    %c0_i32_0 = arith.constant 0 : i32
    %c0_i32_1 = arith.constant 0 : i32
    return %c0_i32, %c0_i32_0 : i32, i32
  }
  func.func @transform_7(%arg0: i32) -> (i32, i32) {
    %c0_i32 = arith.constant 0 : i32
    %c0_i32_0 = arith.constant 0 : i32
    %c0_i32_1 = arith.constant 0 : i32
    return %c0_i32, %c0_i32_0 : i32, i32
  }
  func.func @transform_8(%arg0: i32) -> (i32, i32, i32) {
    %c0_i32 = arith.constant 0 : i32
    %c0_i32_0 = arith.constant 0 : i32
    %c0_i32_1 = arith.constant 0 : i32
    %c0_i32_2 = arith.constant 0 : i32
    return %c0_i32, %c0_i32_0, %c0_i32_1 : i32, i32, i32
  }
  func.func @transform_9(%arg0: i32) -> (i32, i32) {
    %c0_i32 = arith.constant 0 : i32
    %c0_i32_0 = arith.constant 0 : i32
    %c0_i32_1 = arith.constant 0 : i32
    return %c0_i32, %c0_i32_0 : i32, i32
  }
  func.func @transform_10(%arg0: i32) -> (i32, i32) {
    %c0_i32 = arith.constant 0 : i32
    %c0_i32_0 = arith.constant 0 : i32
    %c0_i32_1 = arith.constant 0 : i32
    return %c0_i32, %c0_i32_0 : i32, i32
  }
  func.func @transform_11(%arg0: i32) -> (i32, i32) {
    %c0_i32 = arith.constant 0 : i32
    %c0_i32_0 = arith.constant 0 : i32
    %c0_i32_1 = arith.constant 0 : i32
    return %c0_i32, %c0_i32_0 : i32, i32
  }
  func.func @transform_12(%arg0: i32) -> (i32, i32) {
    %c0_i32 = arith.constant 0 : i32
    %c0_i32_0 = arith.constant 0 : i32
    %c0_i32_1 = arith.constant 0 : i32
    return %c0_i32, %c0_i32_0 : i32, i32
  }
}

</mosaic_0001>

<bundles_post_ra>
// kernel: multi_head_attention_forward.1
= control target key start
LH: loop header
LB: loop body
LE: loop exit
PB: predicated region body
PF: predicated region fallthrough
CT: control target
= control target key end

     0   :  { %s5471_s0 = inlined_call_operand.vmem [shape: f32[24,384], index: 0, kind: input, shape index: {}]   ;;  %s5472_s1 = inlined_call_operand.vmem [shape: f32[24,384], index: 1, kind: input, shape index: {}]   ;;  %s5473_s2 = inlined_call_operand.vmem [shape: f32[2,32], index: 2, kind: input, shape index: {}]   ;;  %s5474_s3 = inlined_call_operand.vmem [shape: f32[384,64], index: 3, kind: input, shape index: {}]   ;;  %s5475_s4 = inlined_call_operand.vmem [shape: f32[24,64], index: 4, kind: input, shape index: {}]   ;;  %s5476_s5 = inlined_call_operand.vmem [shape: f32[384,64], index: 5, kind: input, shape index: {}]   ;;  %s5477_s6 = inlined_call_operand.vmem [shape: f32[24,64], index: 6, kind: input, shape index: {}]   ;;  %s5478_s7 = inlined_call_operand.vmem [shape: f32[64,2048], index: 7, kind: input, shape index: {}]   ;;  %s5479_s8 = inlined_call_operand.vmem [shape: f32[12,32,32], index: 8, kind: input, shape index: {}]   ;;  %s5480_s9 = inlined_call_operand.vmem [shape: f32[1,32], index: 9, kind: input, shape index: {}]   ;;  %s5481_s10 = inlined_call_operand.vmem [shape: f32[1,32], index: 10, kind: input, shape index: {}]   ;;  %s5482_s11 = inlined_call_operand.vmem [shape: f32[1,32], index: 11, kind: input, shape index: {}]   ;;  %s5483_s12 = inlined_call_operand.hbm [shape: f32[2,32], index: 12, kind: output, shape index: {}]  }
   0x1   :  { %v66_v0 = vld [vmem:[%s5474_s3 + $0x78] sm:$0xff]  ;;  %v65_v1 = vld [vmem:[%s5474_s3 + $0x70] sm:$0xff]  ;;  %v64_v5 = vld [vmem:[%s5474_s3 + $0x68] sm:$0xff] }
   0x2   :  { %v82_v2 = vld [vmem:[%s5474_s3 + $0xf8] sm:$0xff]  ;;  %102 = vmatpush.msra.mxu0 %v66_v0  ;;  %v81_v3 = vld [vmem:[%s5474_s3 + $0xf0] sm:$0xff]  ;;  %v80_v6 = vld [vmem:[%s5474_s3 + $0xe8] sm:$0xff] }
   0x3   :  { %128 = vmatpush.msra.mxu1 %v82_v2  ;;  %v98_v4 = vld [vmem:[%s5474_s3 + $0x178] sm:$0xff]  ;;  %v97_v7 = vld [vmem:[%s5474_s3 + $0x170] sm:$0xff]  ;;  %v96_v8 = vld [vmem:[%s5474_s3 + $0x168] sm:$0xff] }
   0x4   :  { %154 = vmatpush.msra.mxu2 %v98_v4  ;;  %103 = vmatpush.msra.mxu0 %v65_v1  ;;  %v63_v9 = vld [vmem:[%s5474_s3 + $0x60] sm:$0xff]  ;;  %v62_v12 = vld [vmem:[%s5474_s3 + $0x58] sm:$0xff]  ;;  %v61_v15 = vld [vmem:[%s5474_s3 + $0x50] sm:$0xff] }
   0x5   :  { %129 = vmatpush.msra.mxu1 %v81_v3  ;;  %v79_v10 = vld [vmem:[%s5474_s3 + $0xe0] sm:$0xff]  ;;  %v78_v13 = vld [vmem:[%s5474_s3 + $0xd8] sm:$0xff]  ;;  %v77_v16 = vld [vmem:[%s5474_s3 + $0xd0] sm:$0xff] }
   0x6   :  { %155 = vmatpush.msra.mxu2 %v97_v7  ;;  %104 = vmatpush.msra.mxu0 %v64_v5  ;;  %v95_v11 = vld [vmem:[%s5474_s3 + $0x160] sm:$0xff]  ;;  %v94_v14 = vld [vmem:[%s5474_s3 + $0x158] sm:$0xff]  ;;  %v93_v17 = vld [vmem:[%s5474_s3 + $0x150] sm:$0xff] }
   0x7   :  { %130 = vmatpush.msra.mxu1 %v80_v6  ;;  %v60_v18 = vld [vmem:[%s5474_s3 + $0x48] sm:$0xff]  ;;  %v204_v21 = vld [vmem:[%s5476_s5 + $0x78] sm:$0xff]  ;;  %v59_v22 = vld [vmem:[%s5474_s3 + $0x40] sm:$0xff] }
   0x8   :  { %156 = vmatpush.msra.mxu2 %v96_v8  ;;  %105 = vmatpush.msra.mxu0 %v63_v9  ;;  %v76_v19 = vld [vmem:[%s5474_s3 + $0xc8] sm:$0xff]  ;;  %v75_v23 = vld [vmem:[%s5474_s3 + $0xc0] sm:$0xff]  ;;  %v203_v24 = vld [vmem:[%s5476_s5 + $0x70] sm:$0xff] }
   0x9   :  { %131 = vmatpush.msra.mxu1 %v79_v10  ;;  %v92_v20 = vld [vmem:[%s5474_s3 + $0x148] sm:$0xff]  ;;  %240 = vmatpush.msra.mxu3 %v204_v21  ;;  %v91_v25 = vld [vmem:[%s5474_s3 + $0x140] sm:$0xff]  ;;  %v58_v27 = vld [vmem:[%s5474_s3 + $0x38] sm:$0xff] }
   0xa   :  { %157 = vmatpush.msra.mxu2 %v95_v11  ;;  %106 = vmatpush.msra.mxu0 %v62_v12  ;;  %v202_v26 = vld [vmem:[%s5476_s5 + $0x68] sm:$0xff]  ;;  %v74_v28 = vld [vmem:[%s5474_s3 + $0xb8] sm:$0xff]  ;;  %v201_v30 = vld [vmem:[%s5476_s5 + $0x60] sm:$0xff] }
   0xb   :  { %132 = vmatpush.msra.mxu1 %v78_v13  ;;  %241 = vmatpush.msra.mxu3 %v203_v24  ;;  %v90_v29 = vld [vmem:[%s5474_s3 + $0x138] sm:$0xff]  ;;  %v57_v31 = vld [vmem:[%s5474_s3 + $0x30] sm:$0xff]  ;;  %v56_v35 = vld [vmem:[%s5474_s3 + $0x28] sm:$0xff] }
   0xc   :  { %158 = vmatpush.msra.mxu2 %v94_v14  ;;  %107 = vmatpush.msra.mxu0 %v61_v15  ;;  %v73_v32 = vld [vmem:[%s5474_s3 + $0xb0] sm:$0xff]  ;;  %v200_v34 = vld [vmem:[%s5476_s5 + $0x58] sm:$0xff]  ;;  %v72_v36 = vld [vmem:[%s5474_s3 + $0xa8] sm:$0xff] }
   0xd   :  { %133 = vmatpush.msra.mxu1 %v77_v16  ;;  %242 = vmatpush.msra.mxu3 %v202_v26  ;;  %v89_v33 = vld [vmem:[%s5474_s3 + $0x130] sm:$0xff]  ;;  %v88_v37 = vld [vmem:[%s5474_s3 + $0x128] sm:$0xff]  ;;  %v55_v39 = vld [vmem:[%s5474_s3 + $0x20] sm:$0xff] }
   0xe   :  { %159 = vmatpush.msra.mxu2 %v93_v17  ;;  %108 = vmatpush.msra.mxu0 %v60_v18  ;;  %v199_v38 = vld [vmem:[%s5476_s5 + $0x50] sm:$0xff]  ;;  %v71_v40 = vld [vmem:[%s5474_s3 + $0xa0] sm:$0xff]  ;;  %v198_v42 = vld [vmem:[%s5476_s5 + $0x48] sm:$0xff] }
   0xf   :  { %134 = vmatpush.msra.mxu1 %v76_v19  ;;  %243 = vmatpush.msra.mxu3 %v201_v30  ;;  %v87_v41 = vld [vmem:[%s5474_s3 + $0x120] sm:$0xff]  ;;  %v54_v43 = vld [vmem:[%s5474_s3 + $0x18] sm:$0xff]  ;;  %v53_v47 = vld [vmem:[%s5474_s3 + $0x10] sm:$0xff] }
  0x10   :  { %160 = vmatpush.msra.mxu2 %v92_v20  ;;  %109 = vmatpush.msra.mxu0 %v59_v22  ;;  %v70_v44 = vld [vmem:[%s5474_s3 + $0x98] sm:$0xff]  ;;  %v197_v46 = vld [vmem:[%s5476_s5 + $0x40] sm:$0xff]  ;;  %v69_v48 = vld [vmem:[%s5474_s3 + $0x90] sm:$0xff] }
  0x11   :  { %135 = vmatpush.msra.mxu1 %v75_v23  ;;  %244 = vmatpush.msra.mxu3 %v200_v34  ;;  %v86_v45 = vld [vmem:[%s5474_s3 + $0x118] sm:$0xff]  ;;  %v85_v49 = vld [vmem:[%s5474_s3 + $0x110] sm:$0xff]  ;;  %v52_v51 = vld [vmem:[%s5474_s3 + $0x8] sm:$0xff] }
  0x12   :  { %161 = vmatpush.msra.mxu2 %v91_v25  ;;  %110 = vmatpush.msra.mxu0 %v58_v27  ;;  %v196_v50 = vld [vmem:[%s5476_s5 + $0x38] sm:$0xff]  ;;  %v68_v52 = vld [vmem:[%s5474_s3 + $0x88] sm:$0xff]  ;;  %v195_v54 = vld [vmem:[%s5476_s5 + $0x30] sm:$0xff] }
  0x13   :  { %136 = vmatpush.msra.mxu1 %v74_v28  ;;  %245 = vmatpush.msra.mxu3 %v199_v38  ;;  %v84_v53 = vld [vmem:[%s5474_s3 + $0x108] sm:$0xff]  ;;  %v51_v55 = vld [vmem:[%s5474_s3] sm:$0xff]  ;;  %v220_v57 = vld [vmem:[%s5476_s5 + $0xf8] sm:$0xff] }
  0x14   :  { %162 = vmatpush.msra.mxu2 %v90_v29  ;;  %111 = vmatpush.msra.mxu0 %v57_v31  ;;  %v67_v56 = vld [vmem:[%s5474_s3 + $0x80] sm:$0xff]  ;;  %v236_v58 = vld [vmem:[%s5476_s5 + $0x178] sm:$0xff]  ;;  %v219_v61 = vld [vmem:[%s5476_s5 + $0xf0] sm:$0xff] }
  0x15   :  { %137 = vmatpush.msra.mxu1 %v73_v32  ;;  %246 = vmatpush.msra.mxu3 %v198_v42  ;;  %v83_v59 = vld [vmem:[%s5474_s3 + $0x100] sm:$0xff]  ;;  %v235_v62 = vld [vmem:[%s5476_s5 + $0x170] sm:$0xff]  ;;  %v43_v0 = vld [vmem:[%s5471_s0 + $0x8] sm:$0xff] }
  0x16   :  { %163 = vmatpush.msra.mxu2 %v89_v33  ;;  %112 = vmatpush.msra.mxu0 %v56_v35  ;;  %v42_v60 = vld [vmem:[%s5471_s0] sm:$0xff]  ;;  %v44_v63 = vld [vmem:[%s5471_s0 + $0x10] sm:$0xff]  ;;  %v218_v1 = vld [vmem:[%s5476_s5 + $0xe8] sm:$0xff] }
  0x17   :  { %138 = vmatpush.msra.mxu1 %v72_v36  ;;  %247 = vmatpush.msra.mxu3 %v197_v46  ;;  %v234_v2 = vld [vmem:[%s5476_s5 + $0x168] sm:$0xff]  ;;  %v217_v4 = vld [vmem:[%s5476_s5 + $0xe0] sm:$0xff]  ;;  %v216_v6 = vld [vmem:[%s5476_s5 + $0xd8] sm:$0xff] }
  0x18   :  { %164 = vmatpush.msra.mxu2 %v88_v37  ;;  %113 = vmatpush.msra.mxu0 %v55_v39  ;;  %v194_v3 = vld [vmem:[%s5476_s5 + $0x28] sm:$0xff]  ;;  %v233_v5 = vld [vmem:[%s5476_s5 + $0x160] sm:$0xff]  ;;  %v232_v7 = vld [vmem:[%s5476_s5 + $0x158] sm:$0xff] }
  0x19   :  { %139 = vmatpush.msra.mxu1 %v71_v40  ;;  %248 = vmatpush.msra.mxu3 %v196_v50  ;;  %v193_v8 = vld [vmem:[%s5476_s5 + $0x20] sm:$0xff] }
  0x1a   :  { %165 = vmatpush.msra.mxu2 %v87_v41  ;;  %114 = vmatpush.msra.mxu0 %v54_v43 }
  0x1b   :  { %140 = vmatpush.msra.mxu1 %v70_v44  ;;  %249 = vmatpush.msra.mxu3 %v195_v54 }
  0x1c   :  { %166 = vmatpush.msra.mxu2 %v86_v45  ;;  %115 = vmatpush.msra.mxu0 %v53_v47 }
  0x1d   :  { %141 = vmatpush.msra.mxu1 %v69_v48  ;;  %250 = vmatpush.msra.mxu3 %v194_v3 }
  0x1e   :  { %167 = vmatpush.msra.mxu2 %v85_v49  ;;  %116 = vmatpush.msra.mxu0 %v52_v51 }
  0x1f   :  { %142 = vmatpush.msra.mxu1 %v68_v52 }
  0x20   :  { %168 = vmatpush.msra.mxu2 %v84_v53  ;;  %117 = vmatpush.msra.mxu0 %v51_v55 }
  0x21   :  { %143 = vmatpush.msra.mxu1 %v67_v56  ;;  %118 = vmatmul.f32.vlgmr.msra.gmra.mxu0 %v42_v60 }
  0x22   :  { %266 = vmatpush.msrb.mxu0 %v220_v57  ;;  %169 = vmatpush.msra.mxu2 %v83_v59 }
  0x23   :  { %292 = vmatpush.msrb.mxu1 %v236_v58  ;;  %170 = vmatmul.f32.vlgmr.msra.gmra.mxu2 %v44_v63 }
  0x24   :  { %267 = vmatpush.msrb.mxu0 %v219_v61  ;;  %144 = vmatmul.f32.vlgmr.msra.gmra.mxu1 %v43_v0 }
  0x25   :  { %293 = vmatpush.msrb.mxu1 %v235_v62 }
  0x26   :  { %268 = vmatpush.msrb.mxu0 %v218_v1 }
  0x27   :  { %294 = vmatpush.msrb.mxu1 %v234_v2 }
  0x28   :  { %17 = vsyncpa [#allocation3], 0  ;;  %269 = vmatpush.msrb.mxu0 %v217_v4  ;;  %v45_v9 = vld [vmem:[%s5471_s0 + $0x18] sm:$0xff]  ;;  %v215_v11 = vld [vmem:[%s5476_s5 + $0xd0] sm:$0xff]  ;;  %251 = vmatpush.msra.mxu3 %v193_v8  ;;  %vm5484_vm0 = vcmask 523264   ;;  %s2861_s3 = smov [#allocation2]  }
  0x29   :  { %295 = vmatpush.msrb.mxu1 %v233_v5  ;;  %v192_v10 = vld [vmem:[%s5476_s5 + $0x18] sm:$0xff]  ;;  %v231_v12 = vld [vmem:[%s5476_s5 + $0x150] sm:$0xff]  ;;  %v47_v13 = vld [vmem:[%s5471_s0 + $0x28] sm:$0xff]  ;;  %121 = vmatmul.f32.gmra.mxu0 %v45_v9  ;;  %s2516_s23 = sshll.u32 %s2861_s3, 4  ;;  %s2518_s26 = sshll.u32 %s5483_s12, 4  ;;  %s2517_s23 = int_to_ptr.vmem [resolvable:$true] %s2516_s23  ;;  %s2519_s26 = int_to_ptr.hbm [resolvable:$true] %s2518_s26 }
  0x2a   :  { %270 = vmatpush.msrb.mxu0 %v216_v6  ;;  %v46_v14 = vld [vmem:[%s5471_s0 + $0x20] sm:$0xff]  ;;  %v214_v15 = vld [vmem:[%s5476_s5 + $0xc8] sm:$0xff]  ;;  %252 = vmatpush.msra.mxu3 %v192_v10  ;;  %v191_v17 = vld [vmem:[%s5476_s5 + $0x10] sm:$0xff] }
  0x2b   :  { %296 = vmatpush.msrb.mxu1 %v232_v7  ;;  %v230_v16 = vld [vmem:[%s5476_s5 + $0x148] sm:$0xff]  ;;  %173 = vmatmul.f32.gmra.mxu2 %v47_v13  ;;  %v213_v18 = vld [vmem:[%s5476_s5 + $0xc0] sm:$0xff]  ;;  %v212_v21 = vld [vmem:[%s5476_s5 + $0xb8] sm:$0xff] }
  0x2c   :  { %271 = vmatpush.msrb.mxu0 %v215_v11  ;;  %v229_v19 = vld [vmem:[%s5476_s5 + $0x140] sm:$0xff]  ;;  %147 = vmatmul.f32.gmra.mxu1 %v46_v14  ;;  %v190_v20 = vld [vmem:[%s5476_s5 + $0x8] sm:$0xff]  ;;  %v228_v22 = vld [vmem:[%s5476_s5 + $0x138] sm:$0xff] }
  0x2d   :  { %297 = vmatpush.msrb.mxu1 %v231_v12  ;;  %253 = vmatpush.msra.mxu3 %v191_v17  ;;  %v189_v23 = vld [vmem:[%s5476_s5] sm:$0xff]  ;;  %v48_v24 = vld [vmem:[%s5471_s0 + $0x30] sm:$0xff]  ;;  %v210_v29 = vld [vmem:[%s5476_s5 + $0xa8] sm:$0xff] }
  0x2e   :  { %272 = vmatpush.msrb.mxu0 %v214_v15  ;;  %v211_v25 = vld [vmem:[%s5476_s5 + $0xb0] sm:$0xff]  ;;  %v50_v27 = vld [vmem:[%s5471_s0 + $0x40] sm:$0xff]  ;;  %v226_v30 = vld [vmem:[%s5476_s5 + $0x128] sm:$0xff] }
  0x2f   :  { %298 = vmatpush.msrb.mxu1 %v230_v16  ;;  %254 = vmatpush.msra.mxu3 %v190_v20  ;;  %v227_v26 = vld [vmem:[%s5476_s5 + $0x130] sm:$0xff]  ;;  %v180_v28 = vld [vmem:[%s5472_s1] sm:$0xff]  ;;  %v49_v31 = vld [vmem:[%s5471_s0 + $0x38] sm:$0xff] }
  0x30   :  { %273 = vmatpush.msrb.mxu0 %v213_v18  ;;  %v209_v32 = vld [vmem:[%s5476_s5 + $0xa0] sm:$0xff]  ;;  %v208_v34 = vld [vmem:[%s5476_s5 + $0x98] sm:$0xff]  ;;  %v207_v36 = vld [vmem:[%s5476_s5 + $0x90] sm:$0xff] }
  0x31   :  { %299 = vmatpush.msrb.mxu1 %v229_v19  ;;  %255 = vmatpush.msra.mxu3 %v189_v23  ;;  %v225_v33 = vld [vmem:[%s5476_s5 + $0x120] sm:$0xff]  ;;  %v224_v35 = vld [vmem:[%s5476_s5 + $0x118] sm:$0xff]  ;;  %v223_v37 = vld [vmem:[%s5476_s5 + $0x110] sm:$0xff] }
  0x32   :  { %274 = vmatpush.msrb.mxu0 %v212_v21  ;;  %256 = vmatmul.f32.vlgmr.msra.gmra.mxu3 %v180_v28  ;;  %v183_v38 = vld [vmem:[%s5472_s1 + $0x18] sm:$0xff]  ;;  %v206_v39 = vld [vmem:[%s5476_s5 + $0x88] sm:$0xff]  ;;  %v205_v41 = vld [vmem:[%s5476_s5 + $0x80] sm:$0xff] }
  0x33   :  { %300 = vmatpush.msrb.mxu1 %v228_v22  ;;  %124 = vmatmul.f32.gmra.mxu0 %v48_v24  ;;  %v222_v40 = vld [vmem:[%s5476_s5 + $0x108] sm:$0xff]  ;;  %v221_v42 = vld [vmem:[%s5476_s5 + $0x100] sm:$0xff]  ;;  %v182_v44 = vld [vmem:[%s5472_s1 + $0x10] sm:$0xff] }
  0x34   :  { %275 = vmatpush.msrb.mxu0 %v211_v25  ;;  %176 = vmatmul.f32.gmra.mxu2 %v50_v27  ;;  %v181_v43 = vld [vmem:[%s5472_s1 + $0x8] sm:$0xff]  ;;  %v186_v45 = vld [vmem:[%s5472_s1 + $0x30] sm:$0xff]  ;;  %v184_v46 = vld [vmem:[%s5472_s1 + $0x20] sm:$0xff] }
  0x35   :  { %301 = vmatpush.msrb.mxu1 %v227_v26  ;;  %v185_v47 = vld [vmem:[%s5472_s1 + $0x28] sm:$0xff]  ;;  %v187_v48 = vld [vmem:[%s5472_s1 + $0x38] sm:$0xff]  ;;  %v188_v49 = vld [vmem:[%s5472_s1 + $0x40] sm:$0xff] }
  0x36   :  { %276 = vmatpush.msrb.mxu0 %v210_v29  ;;  %150 = vmatmul.f32.gmra.mxu1 %v49_v31  ;;  %v430_v50 = vld [vmem:[%s5478_s7 + $0x380] sm:$0xff]  ;;  %v431_v51 = vld [vmem:[%s5478_s7 + $0x388] sm:$0xff]  ;;  %v432_v20 = vld [vmem:[%s5478_s7 + $0x390] sm:$0xff] }
  0x37   :  { %302 = vmatpush.msrb.mxu1 %v226_v30  ;;  %464 = vmatpush.msrb.mxu2 %v430_v50  ;;  %v414_v52 = vld [vmem:[%s5478_s7 + $0x300] sm:$0xff]  ;;  %v415_v53 = vld [vmem:[%s5478_s7 + $0x308] sm:$0xff]  ;;  %v433_v21 = vld [vmem:[%s5478_s7 + $0x398] sm:$0xff] }
  0x38   :  { %277 = vmatpush.msrb.mxu0 %v209_v32  ;;  %490 = vmatpush.msrb.mxu3 %v431_v51  ;;  %v398_v54 = vld [vmem:[%s5478_s7 + $0x280] sm:$0xff]  ;;  %v399_v55 = vld [vmem:[%s5478_s7 + $0x288] sm:$0xff]  ;;  %v416_v22 = vld [vmem:[%s5478_s7 + $0x310] sm:$0xff] }
  0x39   :  { %303 = vmatpush.msrb.mxu1 %v225_v33  ;;  %465 = vmatpush.msrb.mxu2 %v414_v52  ;;  %v382_v56 = vld [vmem:[%s5478_s7 + $0x200] sm:$0xff]  ;;  %v383_v57 = vld [vmem:[%s5478_s7 + $0x208] sm:$0xff]  ;;  %v417_v23 = vld [vmem:[%s5478_s7 + $0x318] sm:$0xff] }
  0x3a   :  { %278 = vmatpush.msrb.mxu0 %v208_v34  ;;  %259 = vmatmul.f32.gmra.mxu3 %v183_v38  ;;  %v434_v58 = vld [vmem:[%s5478_s7 + $0x3a0] sm:$0xff]  ;;  %v435_v59 = vld [vmem:[%s5478_s7 + $0x3a8] sm:$0xff]  ;;  %v400_v24 = vld [vmem:[%s5478_s7 + $0x290] sm:$0xff] }
  0x3b   :  { %304 = vmatpush.msrb.mxu1 %v224_v35  ;;  %491 = vmatpush.msrb.mxu3 %v415_v53  ;;  %v418_v60 = vld [vmem:[%s5478_s7 + $0x320] sm:$0xff]  ;;  %v419_v61 = vld [vmem:[%s5478_s7 + $0x328] sm:$0xff]  ;;  %v401_v25 = vld [vmem:[%s5478_s7 + $0x298] sm:$0xff] }
  0x3c   :  { %279 = vmatpush.msrb.mxu0 %v207_v36  ;;  %466 = vmatpush.msrb.mxu2 %v398_v54  ;;  %v366_v62 = vld [vmem:[%s5478_s7 + $0x180] sm:$0xff]  ;;  %v367_v63 = vld [vmem:[%s5478_s7 + $0x188] sm:$0xff]  ;;  %v384_v28 = vld [vmem:[%s5478_s7 + $0x210] sm:$0xff] }
  0x3d   :  { %305 = vmatpush.msrb.mxu1 %v223_v37  ;;  %492 = vmatpush.msrb.mxu3 %v399_v55  ;;  %v402_v0 = vld [vmem:[%s5478_s7 + $0x2a0] sm:$0xff]  ;;  %v403_v1 = vld [vmem:[%s5478_s7 + $0x2a8] sm:$0xff]  ;;  %v385_v29 = vld [vmem:[%s5478_s7 + $0x218] sm:$0xff] }
  0x3e   :  { %280 = vmatpush.msrb.mxu0 %v206_v39  ;;  %467 = vmatpush.msrb.mxu2 %v382_v56  ;;  %v350_v2 = vld [vmem:[%s5478_s7 + $0x100] sm:$0xff]  ;;  %v351_v3 = vld [vmem:[%s5478_s7 + $0x108] sm:$0xff]  ;;  %v368_v34 = vld [vmem:[%s5478_s7 + $0x190] sm:$0xff] }
  0x3f   :  { %306 = vmatpush.msrb.mxu1 %v222_v40  ;;  %493 = vmatpush.msrb.mxu3 %v383_v57  ;;  %v386_v4 = vld [vmem:[%s5478_s7 + $0x220] sm:$0xff]  ;;  %v387_v5 = vld [vmem:[%s5478_s7 + $0x228] sm:$0xff]  ;;  %v369_v35 = vld [vmem:[%s5478_s7 + $0x198] sm:$0xff] }
  0x40   :  { %281 = vmatpush.msrb.mxu0 %v205_v41  ;;  %468 = vmatpush.msrb.mxu2 %v366_v62  ;;  %v370_v6 = vld [vmem:[%s5478_s7 + $0x1a0] sm:$0xff]  ;;  %v371_v7 = vld [vmem:[%s5478_s7 + $0x1a8] sm:$0xff]  ;;  %v352_v38 = vld [vmem:[%s5478_s7 + $0x110] sm:$0xff] }
  0x41   :  { %307 = vmatpush.msrb.mxu1 %v221_v42  ;;  %282 = vmatmul.f32.vlgmr.msrb.gmra.mxu0 %v181_v43  ;;  %v334_v8 = vld [vmem:[%s5478_s7 + $0x80] sm:$0xff]  ;;  %v335_v9 = vld [vmem:[%s5478_s7 + $0x88] sm:$0xff]  ;;  %v353_v39 = vld [vmem:[%s5478_s7 + $0x118] sm:$0xff] }
  0x42   :  { %308 = vmatmul.f32.vlgmr.msrb.gmra.mxu1 %v182_v44  ;;  %262 = vmatmul.f32.gmra.mxu3 %v186_v45  ;;  %v354_v10 = vld [vmem:[%s5478_s7 + $0x120] sm:$0xff]  ;;  %v355_v11 = vld [vmem:[%s5478_s7 + $0x128] sm:$0xff]  ;;  %v320_v50 = vld [vmem:[%s5478_s7 + $0x10] sm:$0xff] }
  0x43   :  { %568 = vmatpush.msra.mxu0 %v434_v58  ;;  %594 = vmatpush.msra.mxu1 %v435_v59  ;;  %v338_v12 = vld [vmem:[%s5478_s7 + $0xa0] sm:$0xff]  ;;  %v339_v13 = vld [vmem:[%s5478_s7 + $0xa8] sm:$0xff]  ;;  %v321_v51 = vld [vmem:[%s5478_s7 + $0x18] sm:$0xff] }
  0x44   :  { %494 = vmatpush.msrb.mxu3 %v367_v63  ;;  %469 = vmatpush.msrb.mxu2 %v350_v2  ;;  %v318_v15 = vld [vmem:[%s5478_s7] sm:$0xff]  ;;  %v319_v16 = vld [vmem:[%s5478_s7 + $0x8] sm:$0xff]  ;;  %v437_v2 = vld [vmem:[%s5478_s7 + $0x3b8] sm:$0xff] }
  0x45   :  { %569 = vmatpush.msra.mxu0 %v418_v60  ;;  %595 = vmatpush.msra.mxu1 %v419_v61  ;;  %v322_v17 = vld [vmem:[%s5478_s7 + $0x20] sm:$0xff]  ;;  %v323_v19 = vld [vmem:[%s5478_s7 + $0x28] sm:$0xff] }
  0x46   :  { %495 = vmatpush.msrb.mxu3 %v351_v3  ;;  %470 = vmatpush.msrb.mxu2 %v334_v8  ;;  %v438_v30 = vld [vmem:[%s5478_s7 + $0x3c0] sm:$0xff]  ;;  %v439_v31 = vld [vmem:[%s5478_s7 + $0x3c8] sm:$0xff] }
  0x47   :  { %570 = vmatpush.msra.mxu0 %v402_v0  ;;  %596 = vmatpush.msra.mxu1 %v403_v1  ;;  %v422_v32 = vld [vmem:[%s5478_s7 + $0x340] sm:$0xff]  ;;  %v423_v33 = vld [vmem:[%s5478_s7 + $0x348] sm:$0xff]  ;;  %v436_v1 = vld [vmem:[%s5478_s7 + $0x3b0] sm:$0xff] }
  0x48   :  { %496 = vmatpush.msrb.mxu3 %v335_v9  ;;  %471 = vmatpush.msrb.mxu2 %v318_v15  ;;  %v406_v36 = vld [vmem:[%s5478_s7 + $0x2c0] sm:$0xff]  ;;  %v407_v37 = vld [vmem:[%s5478_s7 + $0x2c8] sm:$0xff] }
  0x49   :  { %285 = vmatmul.f32.gmra.mxu0 %v184_v46  ;;  %597 = vmatpush.msra.mxu1 %v387_v5  ;;  %v390_v40 = vld [vmem:[%s5478_s7 + $0x240] sm:$0xff]  ;;  %v391_v41 = vld [vmem:[%s5478_s7 + $0x248] sm:$0xff]  ;;  %v336_v46 = vld [vmem:[%s5478_s7 + $0x90] sm:$0xff] }
  0x4a   :  { %311 = vmatmul.f32.gmra.mxu1 %v185_v47  ;;  %571 = vmatpush.msra.mxu0 %v386_v4  ;;  %v374_v44 = vld [vmem:[%s5478_s7 + $0x1c0] sm:$0xff]  ;;  %v375_v45 = vld [vmem:[%s5478_s7 + $0x1c8] sm:$0xff]  ;;  %v337_v47 = vld [vmem:[%s5478_s7 + $0x98] sm:$0xff] }
  0x4b   :  { %598 = vmatpush.msra.mxu1 %v371_v7  ;;  %497 = vmatpush.msrb.mxu3 %v319_v16  ;;  %v342_v52 = vld [vmem:[%s5478_s7 + $0xc0] sm:$0xff]  ;;  %v343_v53 = vld [vmem:[%s5478_s7 + $0xc8] sm:$0xff]  ;;  %v420_v4 = vld [vmem:[%s5478_s7 + $0x330] sm:$0xff] }
  0x4c   :  { %572 = vmatpush.msra.mxu0 %v370_v6  ;;  %516 = vmatpush.msra.mxu2 %v432_v20  ;;  %v237_v54 = vld [vmem:[%s5477_s6] sm:$0xff]  ;;  %v327_v57 = vld [vmem:[%s5478_s7 + $0x48] sm:$0xff]  ;;  %v421_v5 = vld [vmem:[%s5478_s7 + $0x338] sm:$0xff] }
  0x4d   :  { %599 = vmatpush.msra.mxu1 %v355_v11  ;;  %542 = vmatpush.msra.mxu3 %v433_v21  ;;  %v326_v56 = vld [vmem:[%s5478_s7 + $0x40] sm:$0xff]  ;;  %v238_v62 = vld [vmem:[%s5477_s6 + $0x8] sm:$0xff] }
  0x4e   :  { %573 = vmatpush.msra.mxu0 %v354_v10  ;;  %517 = vmatpush.msra.mxu2 %v416_v22  ;;  %v442_v6 = vld [vmem:[%s5478_s7 + $0x3e0] sm:$0xff]  ;;  %v443_v7 = vld [vmem:[%s5478_s7 + $0x3e8] sm:$0xff]  ;;  %v388_v22 = vld [vmem:[%s5478_s7 + $0x230] sm:$0xff] }
  0x4f   :  { %600 = vmatpush.msra.mxu1 %v339_v13  ;;  %543 = vmatpush.msra.mxu3 %v417_v23  ;;  %v426_v8 = vld [vmem:[%s5478_s7 + $0x360] sm:$0xff]  ;;  %v427_v9 = vld [vmem:[%s5478_s7 + $0x368] sm:$0xff]  ;;  %v405_v13 = vld [vmem:[%s5478_s7 + $0x2b8] sm:$0xff] }
  0x50   :  { %574 = vmatpush.msra.mxu0 %v338_v12  ;;  %518 = vmatpush.msra.mxu2 %v400_v24  ;;  %v404_v12 = vld [vmem:[%s5478_s7 + $0x2b0] sm:$0xff]  ;;  %v410_v16 = vld [vmem:[%s5478_s7 + $0x2e0] sm:$0xff]  ;;  %v389_v23 = vld [vmem:[%s5478_s7 + $0x238] sm:$0xff] }
  0x51   :  { %288 = vmatmul.f32.gmra.mxu0 %v187_v48  ;;  %601 = vmatpush.msra.mxu1 %v323_v19  ;;  %v358_v48 = vld [vmem:[%s5478_s7 + $0x140] sm:$0xff]  ;;  %v239_v19 = vld [vmem:[%s5477_s6 + $0x10] sm:$0xff] }
  0x52   :  { %314 = vmatmul.f32.gmra.mxu1 %v188_v49  ;;  %575 = vmatpush.msra.mxu0 %v322_v17  ;;  %v359_v49 = vld [vmem:[%s5478_s7 + $0x148] sm:$0xff] }
  0x53   :  { %544 = vmatpush.msra.mxu3 %v401_v25  ;;  %519 = vmatpush.msra.mxu2 %v384_v28  ;;  %v411_v17 = vld [vmem:[%s5478_s7 + $0x2e8] sm:$0xff]  ;;  %v394_v25 = vld [vmem:[%s5478_s7 + $0x260] sm:$0xff] }
  0x54   :  { %672 = vmatpush.msrb.mxu0 %v438_v30  ;;  %698 = vmatpush.msrb.mxu1 %v439_v31  ;;  %v395_v28 = vld [vmem:[%s5478_s7 + $0x268] sm:$0xff]  ;;  %v373_v30 = vld [vmem:[%s5478_s7 + $0x1b8] sm:$0xff]  ;;  %v378_v31 = vld [vmem:[%s5478_s7 + $0x1e0] sm:$0xff] }
  0x55   :  { %545 = vmatpush.msra.mxu3 %v385_v29  ;;  %520 = vmatpush.msra.mxu2 %v368_v34  ;;  %v372_v29 = vld [vmem:[%s5478_s7 + $0x1b0] sm:$0xff] }
  0x56   :  { %673 = vmatpush.msrb.mxu0 %v422_v32  ;;  %699 = vmatpush.msrb.mxu1 %v423_v33  ;;  %v379_v32 = vld [vmem:[%s5478_s7 + $0x1e8] sm:$0xff] }
  0x57   :  { %546 = vmatpush.msra.mxu3 %v369_v35  ;;  %521 = vmatpush.msra.mxu2 %v352_v38  ;;  %v356_v35 = vld [vmem:[%s5478_s7 + $0x130] sm:$0xff]  ;;  %v362_v38 = vld [vmem:[%s5478_s7 + $0x160] sm:$0xff] }
  0x58   :  { %674 = vmatpush.msrb.mxu0 %v406_v36  ;;  %700 = vmatpush.msrb.mxu1 %v407_v37  ;;  %v357_v36 = vld [vmem:[%s5478_s7 + $0x138] sm:$0xff] }
  0x59   :  { %547 = vmatpush.msra.mxu3 %v353_v39  ;;  %522 = vmatpush.msra.mxu2 %v336_v46  ;;  %v363_v39 = vld [vmem:[%s5478_s7 + $0x168] sm:$0xff]  ;;  %v346_v46 = vld [vmem:[%s5478_s7 + $0xe0] sm:$0xff] }
  0x5a   :  { %675 = vmatpush.msrb.mxu0 %v390_v40  ;;  %701 = vmatpush.msrb.mxu1 %v391_v41  ;;  %v872_v41 = vlaneseq }
  0x5b   :  { %548 = vmatpush.msra.mxu3 %v337_v47  ;;  %523 = vmatpush.msra.mxu2 %v320_v50  ;;  %v347_v47 = vld [vmem:[%s5478_s7 + $0xe8] sm:$0xff]  ;;  %v325_v50 = vld [vmem:[%s5478_s7 + $0x38] sm:$0xff] }
  0x5c   :  { %676 = vmatpush.msrb.mxu0 %v374_v44  ;;  %702 = vmatpush.msrb.mxu1 %v375_v45  ;;  %v340_v44 = vld [vmem:[%s5478_s7 + $0xb0] sm:$0xff]  ;;  %v341_v45 = vld [vmem:[%s5478_s7 + $0xb8] sm:$0xff] }
  0x5d   :  { %549 = vmatpush.msra.mxu3 %v321_v51  ;;  %v330_v51 = vld [vmem:[%s5478_s7 + $0x60] sm:$0xff] }
  0x5e   :  { %677 = vmatpush.msrb.mxu0 %v358_v48  ;;  %703 = vmatpush.msrb.mxu1 %v359_v49  ;;  %v3592_v48 = vshrl.u32 %v872_v41, 7  ;;  %v324_v49 = vld [vmem:[%s5478_s7 + $0x30] sm:$0xff] }
  0x60   :  { %678 = vmatpush.msrb.mxu0 %v342_v52  ;;  %704 = vmatpush.msrb.mxu1 %v343_v53  ;;  %v331_v52 = vld [vmem:[%s5478_s7 + $0x68] sm:$0xff]  ;;  %v3611_v53 = vadd.s32 56, %v3592_v48 }
  0x62   :  { %679 = vmatpush.msrb.mxu0 %v326_v56  ;;  %705 = vmatpush.msrb.mxu1 %v327_v57  ;;  %v3617_v56 = vadd.s32 48, %v3592_v48  ;;  %v3620_v57 = vmul.u32 32, %v3611_v53 }
  0x9e   :  { %v3353_v14 = vpop.f32.mrf.mxu0 }
  0xa1   :  { %v3364_v18 = vpop.f32.mrf.mxu1 }
  0xa6   :  { %v3387_v26 = vpop.f32.mrf.mxu0 }
  0xa9   :  { %v3389_v27 = vpop.f32.mrf.mxu1 }
  0xb0   :  { %v3433_v42 = vpop.f32.mrf.mxu0 }
  0xb3   :  { %v3435_v43 = vpop.f32.mrf.mxu1 }
  0xb5   :  { %v257_v55 = vpop.f32.mrf.mxu3 }
  0xb6   :  { %v258_v58 = vadd.f32 %v257_v55, %v237_v54  ;;  %v3613_v54 = vand.u32 127, %v872_v41  ;;  %v1041_v55 = vadd.s32 1, %v3611_v53  ;;  %v100_v41 = vld [vmem:[%s5475_s4 + $0x8] sm:$0xff] }
  0xb8   :  { %vm1018_vm1 = vcmp.ge.s32.totalorder %v3613_v54, %v3620_v57 }
  0xbd   :  { %v260_v63 = vpop.f32.mrf.mxu3 }
  0xbe   :  { %v283_v59 = vpop.f32.mrf.mxu0  ;;  %v261_v3 = vadd.f32 %v260_v63, %v238_v62  ;;  %v441_v62 = vld [vmem:[%s5478_s7 + $0x3d8] sm:$0xff]  ;;  %v3635_v63 = vadd.s32 40, %v3592_v48 }
  0xbf   :  { %v309_v60 = vpop.f32.mrf.mxu1  ;;  %v284_v61 = vadd.f32 %v283_v59, %v258_v58  ;;  %v3622_v58 = vmul.u32 32, %v1041_v55  ;;  %v3625_v59 = vadd.s32 128, %v3613_v54  ;;  %v328_v55 = vld [vmem:[%s5478_s7 + $0x50] sm:$0xff] }
  0xc1   :  { %v3479_v0 = vadd.f32 %v309_v60, %v284_v61  ;;  %v1040_v60 = vadd.s32 1, %v3617_v56  ;;  %v440_v61 = vld [vmem:[%s5478_s7 + $0x3d0] sm:$0xff]  ;;  %vm1162_vm2 = vcmp.lt.s32.totalorder %v3613_v54, %v3622_v58  ;;  %vm1019_vm3 = vcmp.ge.s32.totalorder %v3625_v59, %v3620_v57 }
  0xc2   :  { %vm1290_vm4 = vmand %vm1018_vm1, %vm1162_vm2  ;;  %vm1163_vm5 = vcmp.lt.s32.totalorder %v3625_v59, %v3622_v58 }
  0xc3   :  { %2527 = vmatmul.msk.f32.vlgmr.msrb.gmra.mxu2 %vm5484_vm0, %v3479_v0  ;;  %2530 = vmatmul.msk.f32.vlgmr.msrb.gmra.mxu3 %vm5484_vm0, %v3479_v0  ;;  %vm1291_vm6 = vmand %vm1019_vm3, %vm1163_vm5 }
  0xc4   :  { %2539 = vmatmul.msk.f32.vlgmr.msra.gmra.mxu0 %vm5484_vm0, %v3479_v0  ;;  %2542 = vmatmul.msk.f32.vlgmr.msra.gmra.mxu1 %vm5484_vm0, %v3479_v0 }
  0xc5   :  { %620 = vmatpush.msrb.mxu2 %v436_v1  ;;  %646 = vmatpush.msrb.mxu3 %v437_v2  ;;  %v263_v20 = vpop.f32.mrf.mxu3  ;;  %v3648_v1 = vmul.u32 32, %v3617_v56  ;;  %v424_v2 = vld [vmem:[%s5478_s7 + $0x350] sm:$0xff] }
  0xc6   :  { %v286_v10 = vpop.f32.mrf.mxu0  ;;  %776 = vmatpush.msra.mxu0 %v442_v6  ;;  %802 = vmatpush.msra.mxu1 %v443_v7  ;;  %v264_v24 = vadd.f32 %v263_v20, %v239_v19  ;;  %v1039_v6 = vadd.s32 1, %v3635_v63  ;;  %v3673_v7 = vadd.s32 32, %v3592_v48  ;;  %v392_v20 = vld [vmem:[%s5478_s7 + $0x250] sm:$0xff] }
  0xc7   :  { %v312_v11 = vpop.f32.mrf.mxu1  ;;  %v287_v15 = vadd.f32 %v286_v10, %v261_v3  ;;  %621 = vmatpush.msrb.mxu2 %v420_v4  ;;  %647 = vmatpush.msrb.mxu3 %v421_v5  ;;  %v425_v3 = vld [vmem:[%s5478_s7 + $0x358] sm:$0xff]  ;;  %v3662_v4 = vmul.u32 32, %v1040_v60  ;;  %v3665_v5 = vmul.u32 32, %v3635_v63  ;;  %vm1002_vm7 = vcmp.ge.s32.totalorder %v3613_v54, %v3648_v1 }
  0xc8   :  { %777 = vmatpush.msra.mxu0 %v426_v8  ;;  %803 = vmatpush.msra.mxu1 %v427_v9  ;;  %vm1003_vm8 = vcmp.ge.s32.totalorder %v3625_v59, %v3648_v1  ;;  %v408_v8 = vld [vmem:[%s5478_s7 + $0x2d0] sm:$0xff]  ;;  %v409_v9 = vld [vmem:[%s5478_s7 + $0x2d8] sm:$0xff]  ;;  %v5485_v10 = vmov 1.0  }
  0xc9   :  { %v3528_v21 = vadd.f32 %v312_v11, %v287_v15  ;;  %622 = vmatpush.msrb.mxu2 %v404_v12  ;;  %648 = vmatpush.msrb.mxu3 %v405_v13  ;;  %vm1146_vm9 = vcmp.lt.s32.totalorder %v3613_v54, %v3662_v4  ;;  %vm1147_vm10 = vcmp.lt.s32.totalorder %v3625_v59, %v3662_v4  ;;  %v3688_v11 = vadd.s32 24, %v3592_v48  ;;  %v329_v60 = vld [vmem:[%s5478_s7 + $0x58] sm:$0xff] }
  0xca   :  { %778 = vmatpush.msra.mxu0 %v410_v16  ;;  %804 = vmatpush.msra.mxu1 %v411_v17  ;;  %vm1274_vm11 = vmand %vm1002_vm7, %vm1146_vm9  ;;  %vm986_vm12 = vcmp.ge.s32.totalorder %v3613_v54, %v3665_v5  ;;  %v3692_v12 = vmul.u32 32, %v1039_v6  ;;  %v3695_v13 = vmul.u32 32, %v3673_v7  ;;  %v1038_v15 = vadd.s32 1, %v3673_v7  ;;  %v429_v6 = vld [vmem:[%s5478_s7 + $0x378] sm:$0xff] }
  0xcb   :  { %2528 = vmatmul.msk.f32.gmra.mxu2 %vm5484_vm0, %v3528_v21  ;;  %2531 = vmatmul.msk.f32.gmra.mxu3 %vm5484_vm0, %v3528_v21  ;;  %vm1275_vm13 = vmand %vm1003_vm8, %vm1147_vm10  ;;  %vm987_vm14 = vcmp.ge.s32.totalorder %v3625_v59, %v3665_v5  ;;  %v1037_v16 = vadd.s32 1, %v3688_v11  ;;  %v3706_v17 = vadd.s32 16, %v3592_v48 }
  0xcc   :  { %2540 = vmatmul.msk.f32.gmra.mxu0 %vm5484_vm0, %v3528_v21  ;;  %2543 = vmatmul.msk.f32.gmra.mxu1 %vm5484_vm0, %v3528_v21  ;;  %vm1130_vm15 = vcmp.lt.s32.totalorder %v3613_v54, %v3692_v12  ;;  %vm1131_vm1 = vcmp.lt.s32.totalorder %v3625_v59, %v3692_v12  ;;  %vm970_vm2 = vcmp.ge.s32.totalorder %v3613_v54, %v3695_v13  ;;  %v3714_v19 = vmul.u32 32, %v1038_v15  ;;  %v396_v15 = vld [vmem:[%s5478_s7 + $0x270] sm:$0xff] }
  0xcd   :  { %623 = vmatpush.msrb.mxu2 %v388_v22  ;;  %649 = vmatpush.msrb.mxu3 %v389_v23  ;;  %v393_v22 = vld [vmem:[%s5478_s7 + $0x258] sm:$0xff]  ;;  %vm3726_vm3 = vmand %vm986_vm12, %vm1130_vm15  ;;  %v380_v23 = vld [vmem:[%s5478_s7 + $0x1f0] sm:$0xff] }
  0xce   :  { %v289_v33 = vpop.f32.mrf.mxu0  ;;  %779 = vmatpush.msra.mxu0 %v394_v25  ;;  %805 = vmatpush.msra.mxu1 %v395_v28  ;;  %v3735_v25 = vmul.u32 32, %v1037_v16  ;;  %v1036_v28 = vadd.s32 1, %v3706_v17  ;;  %vm3745_vm5 = vmand %vm987_vm14, %vm1131_vm1  ;;  %vm1115_vm7 = vcmp.lt.s32.totalorder %v3625_v59, %v3714_v19  ;;  %v397_v16 = vld [vmem:[%s5478_s7 + $0x278] sm:$0xff] }
  0xcf   :  { %v315_v34 = vpop.f32.mrf.mxu1  ;;  %v290_v37 = vadd.f32 %v289_v33, %v264_v24  ;;  %624 = vmatpush.msrb.mxu2 %v372_v29  ;;  %650 = vmatpush.msrb.mxu3 %v373_v30  ;;  %v3733_v24 = vmul.u32 32, %v3688_v11  ;;  %v3754_v30 = vmul.u32 32, %v3706_v17  ;;  %v377_v33 = vld [vmem:[%s5478_s7 + $0x1d8] sm:$0xff] }
  0xd0   :  { %780 = vmatpush.msra.mxu0 %v378_v31  ;;  %806 = vmatpush.msra.mxu1 %v379_v32  ;;  %v3757_v31 = vadd.s32 8, %v3592_v48  ;;  %v376_v32 = vld [vmem:[%s5478_s7 + $0x1d0] sm:$0xff]  ;;  %vm1098_vm10 = vcmp.lt.s32.totalorder %v3613_v54, %v3735_v25 }
  0xd1   :  { %v3574_v40 = vadd.f32 %v315_v34, %v290_v37  ;;  %625 = vmatpush.msrb.mxu2 %v356_v35  ;;  %651 = vmatpush.msrb.mxu3 %v357_v36  ;;  %vm954_vm9 = vcmp.ge.s32.totalorder %v3613_v54, %v3733_v24  ;;  %v3782_v35 = vmul.u32 32, %v1036_v28  ;;  %vm938_vm1 = vcmp.ge.s32.totalorder %v3613_v54, %v3754_v30  ;;  %v381_v28 = vld [vmem:[%s5478_s7 + $0x1f8] sm:$0xff] }
  0xd2   :  { %781 = vmatpush.msra.mxu0 %v362_v38  ;;  %807 = vmatpush.msra.mxu1 %v363_v39  ;;  %v3794_v37 = vmul.u32 32, %v3757_v31  ;;  %v360_v38 = vld [vmem:[%s5478_s7 + $0x150] sm:$0xff]  ;;  %v361_v39 = vld [vmem:[%s5478_s7 + $0x158] sm:$0xff]  ;;  %vm3808_vm14 = vmand %vm954_vm9, %vm1098_vm10 }
  0xd3   :  { %2529 = vmatmul.msk.f32.gmra.mxu2 %vm5484_vm0, %v3574_v40  ;;  %2532 = vmatmul.msk.f32.gmra.mxu3 %vm5484_vm0, %v3574_v40  ;;  %v365_v34 = vld [vmem:[%s5478_s7 + $0x178] sm:$0xff] }
  0xd4   :  { %2541 = vmatmul.msk.f32.gmra.mxu0 %vm5484_vm0, %v3574_v40  ;;  %2544 = vmatmul.msk.f32.gmra.mxu1 %vm5484_vm0, %v3574_v40 }
  0xd5   :  { %626 = vmatpush.msrb.mxu2 %v340_v44  ;;  %652 = vmatpush.msrb.mxu3 %v341_v45  ;;  %v1035_v44 = vadd.s32 1, %v3757_v31  ;;  %v3821_v45 = vmul.u32 32, %v3592_v48 }
  0xd6   :  { %782 = vmatpush.msra.mxu0 %v346_v46  ;;  %808 = vmatpush.msra.mxu1 %v347_v47  ;;  %v1034_v46 = vadd.s32 1, %v3592_v48 }
  0xd7   :  { %627 = vmatpush.msrb.mxu2 %v324_v49  ;;  %653 = vmatpush.msrb.mxu3 %v325_v50  ;;  %v3834_v47 = vmul.u32 32, %v1035_v44  ;;  %v344_v50 = vld [vmem:[%s5478_s7 + $0xd0] sm:$0xff]  ;;  %v349_v44 = vld [vmem:[%s5478_s7 + $0xf8] sm:$0xff] }
  0xd8   :  { %783 = vmatpush.msra.mxu0 %v330_v51  ;;  %809 = vmatpush.msra.mxu1 %v331_v52  ;;  %v3838_v49 = vmul.u32 32, %v1034_v46  ;;  %v345_v51 = vld [vmem:[%s5478_s7 + $0xd8] sm:$0xff]  ;;  %v4116_v52 = vadd.s32 256, %v3613_v54 }
  0xd9   :  { %vm1067_vm9 = vcmp.lt.s32.totalorder %v3625_v59, %v3834_v47 }
  0xdb   :  { %2533 = vmatmul.msk.f32.vlgmr.msra.gmra.mxu2 %vm5484_vm0, %v3479_v0  ;;  %2536 = vmatmul.msk.f32.vlgmr.msra.gmra.mxu3 %vm5484_vm0, %v3479_v0 }
  0xdc   :  { %2551 = vmatmul.msk.f32.vlgmr.msrb.gmra.mxu0 %vm5484_vm0, %v3479_v0  ;;  %2554 = vmatmul.msk.f32.vlgmr.msrb.gmra.mxu1 %vm5484_vm0, %v3479_v0 }
  0xdd   :  { %724 = vmatpush.msra.mxu2 %v440_v61  ;;  %750 = vmatpush.msra.mxu3 %v441_v62  ;;  %v3910_v61 = vadd.s32 512, %v3613_v54  ;;  %v444_v62 = vld [vmem:[%s5478_s7 + $0x3f0] sm:$0xff] }
  0xde   :  { %2575 = vmatpush.msk.msrb.mxu0 %vm1290_vm4, %v5485_v10  ;;  %2586 = vmatpush.msk.msrb.mxu1 %vm1291_vm6, %v5485_v10  ;;  %vm971_vm4 = vcmp.ge.s32.totalorder %v3625_v59, %v3695_v13  ;;  %vm1114_vm6 = vcmp.lt.s32.totalorder %v3613_v54, %v3714_v19 }
  0xdf   :  { %725 = vmatpush.msra.mxu2 %v424_v2  ;;  %751 = vmatpush.msra.mxu3 %v425_v3  ;;  %vm3772_vm8 = vmand %vm970_vm2, %vm1114_vm6  ;;  %vm1082_vm2 = vcmp.lt.s32.totalorder %v3613_v54, %v3782_v35  ;;  %v445_v2 = vld [vmem:[%s5478_s7 + $0x3f8] sm:$0xff]  ;;  %v428_v3 = vld [vmem:[%s5478_s7 + $0x370] sm:$0xff] }
  0xe0   :  { %2576 = vmatpush.msk.msrb.mxu0 %vm1274_vm11, %v5485_v10  ;;  %2587 = vmatpush.msk.msrb.mxu1 %vm1275_vm13, %v5485_v10  ;;  %vm955_vm11 = vcmp.ge.s32.totalorder %v3625_v59, %v3733_v24  ;;  %vm3787_vm12 = vmand %vm971_vm4, %vm1115_vm7  ;;  %vm1099_vm13 = vcmp.lt.s32.totalorder %v3625_v59, %v3735_v25  ;;  %vm1083_vm4 = vcmp.lt.s32.totalorder %v3625_v59, %v3782_v35 }
  0xe1   :  { %726 = vmatpush.msra.mxu2 %v408_v8  ;;  %752 = vmatpush.msra.mxu3 %v409_v9  ;;  %vm1227_vm15 = vmand %vm955_vm11, %vm1099_vm13  ;;  %vm1066_vm7 = vcmp.lt.s32.totalorder %v3613_v54, %v3834_v47  ;;  %vm906_vm11 = vcmp.ge.s32.totalorder %v3613_v54, %v3821_v45  ;;  %v412_v8 = vld [vmem:[%s5478_s7 + $0x2f0] sm:$0xff]  ;;  %v413_v9 = vld [vmem:[%s5478_s7 + $0x2f8] sm:$0xff] }
  0xe2   :  { %2577 = vmatpush.msk.msrb.mxu0 %vm3726_vm3, %v5485_v10  ;;  %2588 = vmatpush.msk.msrb.mxu1 %vm3745_vm5, %v5485_v10  ;;  %vm939_vm3 = vcmp.ge.s32.totalorder %v3625_v59, %v3754_v30  ;;  %vm922_vm5 = vcmp.ge.s32.totalorder %v3613_v54, %v3794_v37  ;;  %vm3856_vm6 = vmand %vm938_vm1, %vm1082_vm2 }
  0xe3   :  { %2534 = vmatmul.msk.f32.gmra.mxu2 %vm5484_vm0, %v3528_v21  ;;  %2537 = vmatmul.msk.f32.gmra.mxu3 %vm5484_vm0, %v3528_v21  ;;  %vm1211_vm10 = vmand %vm939_vm3, %vm1083_vm4  ;;  %vm1022_vm4 = vcmp.ge.s32.totalorder %v3910_v61, %v3620_v57 }
  0xe4   :  { %2552 = vmatmul.msk.f32.gmra.mxu0 %vm5484_vm0, %v3528_v21  ;;  %2555 = vmatmul.msk.f32.gmra.mxu1 %vm5484_vm0, %v3528_v21  ;;  %vm1194_vm13 = vmand %vm922_vm5, %vm1066_vm7  ;;  %vm1166_vm5 = vcmp.lt.s32.totalorder %v3910_v61, %v3622_v58 }
  0xe5   :  { %727 = vmatpush.msra.mxu2 %v392_v20  ;;  %753 = vmatpush.msra.mxu3 %v393_v22  ;;  %vm1294_vm7 = vmand %vm1022_vm4, %vm1166_vm5  ;;  %vm974_vm5 = vcmp.ge.s32.totalorder %v3910_v61, %v3695_v13 }
  0xe6   :  { %2578 = vmatpush.msk.msrb.mxu0 %vm3772_vm8, %v5485_v10  ;;  %2589 = vmatpush.msk.msrb.mxu1 %vm3787_vm12, %v5485_v10  ;;  %vm923_vm8 = vcmp.ge.s32.totalorder %v3625_v59, %v3794_v37  ;;  %vm1050_vm12 = vcmp.lt.s32.totalorder %v3613_v54, %v3838_v49 }
  0xe7   :  { %728 = vmatpush.msra.mxu2 %v376_v32  ;;  %754 = vmatpush.msra.mxu3 %v377_v33  ;;  %vm1195_vm1 = vmand %vm923_vm8, %vm1067_vm9  ;;  %vm1006_vm9 = vcmp.ge.s32.totalorder %v3910_v61, %v3648_v1  ;;  %v99_v32 = vld [vmem:[%s5475_s4] sm:$0xff]  ;;  %v364_v33 = vld [vmem:[%s5478_s7 + $0x170] sm:$0xff] }
  0xe8   :  { %2579 = vmatpush.msk.msrb.mxu0 %vm3808_vm14, %v5485_v10  ;;  %2590 = vmatpush.msk.msrb.mxu1 %vm1227_vm15, %v5485_v10  ;;  %vm907_vm14 = vcmp.ge.s32.totalorder %v3625_v59, %v3821_v45  ;;  %vm1051_vm15 = vcmp.lt.s32.totalorder %v3625_v59, %v3838_v49  ;;  %vm1178_vm2 = vmand %vm906_vm11, %vm1050_vm12  ;;  %v3913_v59 = vadd.s32 640, %v3613_v54 }
  0xe9   :  { %729 = vmatpush.msra.mxu2 %v360_v38  ;;  %755 = vmatpush.msra.mxu3 %v361_v39  ;;  %vm1179_vm3 = vmand %vm907_vm14, %vm1051_vm15  ;;  %vm990_vm14 = vcmp.ge.s32.totalorder %v3910_v61, %v3665_v5  ;;  %v120_v39 = vadd.f32 %v3353_v14, %v99_v32  ;;  %v348_v14 = vld [vmem:[%s5478_s7 + $0xf0] sm:$0xff] }
  0xea   :  { %2580 = vmatpush.msk.msrb.mxu0 %vm3856_vm6, %v5485_v10  ;;  %2591 = vmatpush.msk.msrb.mxu1 %vm1211_vm10, %v5485_v10  ;;  %vm1023_vm6 = vcmp.ge.s32.totalorder %v3913_v59, %v3620_v57  ;;  %vm1167_vm8 = vcmp.lt.s32.totalorder %v3913_v59, %v3622_v58  ;;  %vm1150_vm10 = vcmp.lt.s32.totalorder %v3910_v61, %v3662_v4  ;;  %v101_v32 = vld [vmem:[%s5475_s4 + $0x10] sm:$0xff] }
  0xeb   :  { %2535 = vmatmul.msk.f32.gmra.mxu2 %vm5484_vm0, %v3574_v40  ;;  %2538 = vmatmul.msk.f32.gmra.mxu3 %vm5484_vm0, %v3574_v40  ;;  %vm1295_vm11 = vmand %vm1023_vm6, %vm1167_vm8  ;;  %vm1007_vm12 = vcmp.ge.s32.totalorder %v3913_v59, %v3648_v1  ;;  %vm1118_vm6 = vcmp.lt.s32.totalorder %v3910_v61, %v3714_v19  ;;  %vm975_vm8 = vcmp.ge.s32.totalorder %v3913_v59, %v3695_v13 }
  0xec   :  { %2553 = vmatmul.msk.f32.gmra.mxu0 %vm5484_vm0, %v3574_v40  ;;  %2556 = vmatmul.msk.f32.gmra.mxu1 %vm5484_vm0, %v3574_v40  ;;  %vm1278_vm15 = vmand %vm1006_vm9, %vm1150_vm10  ;;  %vm1119_vm9 = vcmp.lt.s32.totalorder %v3913_v59, %v3714_v19 }
  0xed   :  { %730 = vmatpush.msra.mxu2 %v344_v50  ;;  %756 = vmatpush.msra.mxu3 %v345_v51  ;;  %v171_v50 = vpop.f32.mrf.mxu2 }
  0xee   :  { %2581 = vmatpush.msk.msrb.mxu0 %vm1194_vm13, %v5485_v10  ;;  %2592 = vmatpush.msk.msrb.mxu1 %vm1195_vm1, %v5485_v10  ;;  %vm1151_vm13 = vcmp.lt.s32.totalorder %v3913_v59, %v3662_v4  ;;  %vm1134_vm1 = vcmp.lt.s32.totalorder %v3910_v61, %v3692_v12 }
  0xef   :  { %731 = vmatpush.msra.mxu2 %v328_v55  ;;  %757 = vmatpush.msra.mxu3 %v329_v60  ;;  %vm1279_vm4 = vmand %vm1007_vm12, %vm1151_vm13  ;;  %vm958_vm13 = vcmp.ge.s32.totalorder %v3910_v61, %v3733_v24  ;;  %v4119_v55 = vadd.s32 384, %v3613_v54  ;;  %v146_v60 = vadd.f32 %v3364_v18, %v120_v39 }
  0xf0   :  { %2582 = vmatpush.msk.msrb.mxu0 %vm1178_vm2, %v5485_v10  ;;  %2593 = vmatpush.msk.msrb.mxu1 %vm1179_vm3, %v5485_v10  ;;  %vm991_vm2 = vcmp.ge.s32.totalorder %v3913_v59, %v3665_v5  ;;  %vm1135_vm3 = vcmp.lt.s32.totalorder %v3913_v59, %v3692_v12  ;;  %vm3998_vm12 = vmand %vm975_vm8, %vm1119_vm9 }
  0xf1   :  { %vm1263_vm10 = vmand %vm991_vm2, %vm1135_vm3  ;;  %vm1103_vm2 = vcmp.lt.s32.totalorder %v3913_v59, %v3735_v25  ;;  %vm942_vm3 = vcmp.ge.s32.totalorder %v3910_v61, %v3754_v30 }
  0xf3   :  { %2545 = vmatmul.msk.f32.vlgmr.msrb.gmra.mxu2 %vm5484_vm0, %v3479_v0  ;;  %2548 = vmatmul.msk.f32.vlgmr.msrb.gmra.mxu3 %vm5484_vm0, %v3479_v0 }
  0xf4   :  { %2563 = vmatmul.msk.f32.vlgmr.msra.gmra.mxu0 %vm5484_vm0, %v3479_v0  ;;  %2566 = vmatmul.msk.f32.vlgmr.msra.gmra.mxu1 %vm5484_vm0, %v3479_v0 }
  0xf5   :  { %828 = vmatpush.msrb.mxu2 %v444_v62  ;;  %854 = vmatpush.msrb.mxu3 %v445_v2  ;;  %v123_v62 = vadd.f32 %v3387_v26, %v100_v41  ;;  %v332_v2 = vld [vmem:[%s5478_s7 + $0x70] sm:$0xff]  ;;  %v4442_v41 = vadd.s32 768, %v3613_v54  ;;  %v4783_v26 = vadd.s32 1920, %v3613_v54 }
  0xf6   :  { %2619 = vmatpush.msk.msra.mxu0 %vm1294_vm7, %v5485_v10  ;;  %2630 = vmatpush.msk.msra.mxu1 %vm1295_vm11, %v5485_v10  ;;  %vm1262_vm7 = vmand %vm990_vm14, %vm1134_vm1  ;;  %vm1102_vm14 = vcmp.lt.s32.totalorder %v3910_v61, %v3735_v25 }
  0xf7   :  { %829 = vmatpush.msrb.mxu2 %v428_v3  ;;  %855 = vmatpush.msrb.mxu3 %v429_v6  ;;  %vm3990_vm11 = vmand %vm974_vm5, %vm1118_vm6  ;;  %vm943_vm6 = vcmp.ge.s32.totalorder %v3913_v59, %v3754_v30  ;;  %v333_v3 = vld [vmem:[%s5478_s7 + $0x78] sm:$0xff]  ;;  %v149_v20 = vadd.f32 %v3389_v27, %v123_v62  ;;  %v174_v27 = vpop.f32.mrf.mxu2 }
  0xf8   :  { %2620 = vmatpush.msk.msra.mxu0 %vm1278_vm15, %v5485_v10  ;;  %2631 = vmatpush.msk.msra.mxu1 %vm1279_vm4, %v5485_v10  ;;  %vm959_vm15 = vcmp.ge.s32.totalorder %v3913_v59, %v3733_v24  ;;  %vm4018_vm1 = vmand %vm958_vm13, %vm1102_vm14  ;;  %vm1086_vm4 = vcmp.lt.s32.totalorder %v3910_v61, %v3782_v35  ;;  %vm1071_vm13 = vcmp.lt.s32.totalorder %v3913_v59, %v3834_v47 }
  0xf9   :  { %830 = vmatpush.msrb.mxu2 %v412_v8  ;;  %856 = vmatpush.msrb.mxu3 %v413_v9  ;;  %vm1231_vm5 = vmand %vm959_vm15, %vm1103_vm2  ;;  %vm910_vm14 = vcmp.ge.s32.totalorder %v3910_v61, %v3821_v45  ;;  %vm1054_vm15 = vcmp.lt.s32.totalorder %v3910_v61, %v3838_v49  ;;  %vm911_vm2 = vcmp.ge.s32.totalorder %v3913_v59, %v3821_v45  ;;  %v4206_v9 = vadd.s32 1024, %v3613_v54 }
  0xfa   :  { %2621 = vmatpush.msk.msra.mxu0 %vm1262_vm7, %v5485_v10  ;;  %2632 = vmatpush.msk.msra.mxu1 %vm1263_vm10, %v5485_v10  ;;  %vm1087_vm7 = vcmp.lt.s32.totalorder %v3913_v59, %v3782_v35  ;;  %vm4047_vm8 = vmand %vm942_vm3, %vm1086_vm4  ;;  %vm926_vm10 = vcmp.ge.s32.totalorder %v3910_v61, %v3794_v37  ;;  %vm1055_vm3 = vcmp.lt.s32.totalorder %v3913_v59, %v3838_v49 }
  0xfb   :  { %2546 = vmatmul.msk.f32.gmra.mxu2 %vm5484_vm0, %v3528_v21  ;;  %2549 = vmatmul.msk.f32.gmra.mxu3 %vm5484_vm0, %v3528_v21  ;;  %vm4051_vm9 = vmand %vm943_vm6, %vm1087_vm7  ;;  %vm1020_vm7 = vcmp.ge.s32.totalorder %v4116_v52, %v3620_v57 }
  0xfc   :  { %2564 = vmatmul.msk.f32.gmra.mxu0 %vm5484_vm0, %v3528_v21  ;;  %2567 = vmatmul.msk.f32.gmra.mxu1 %vm5484_vm0, %v3528_v21  ;;  %vm4149_vm6 = vmand %vm911_vm2, %vm1055_vm3  ;;  %vm988_vm2 = vcmp.ge.s32.totalorder %v4116_v52, %v3665_v5 }
  0xfd   :  { %831 = vmatpush.msrb.mxu2 %v396_v15  ;;  %857 = vmatpush.msrb.mxu3 %v397_v16  ;;  %v4209_v15 = vadd.s32 1152, %v3613_v54  ;;  %v4211_v16 = vadd.f32 %v171_v50, %v146_v60 }
  0xfe   :  { %2622 = vmatpush.msk.msra.mxu0 %vm3990_vm11, %v5485_v10  ;;  %2633 = vmatpush.msk.msra.mxu1 %vm3998_vm12, %v5485_v10  ;;  %vm1070_vm11 = vcmp.lt.s32.totalorder %v3910_v61, %v3834_v47  ;;  %vm927_vm12 = vcmp.ge.s32.totalorder %v3913_v59, %v3794_v37 }
  0xff   :  { %832 = vmatpush.msrb.mxu2 %v380_v23  ;;  %858 = vmatpush.msrb.mxu3 %v381_v28  ;;  %vm4111_vm4 = vmand %vm927_vm12, %vm1071_vm13  ;;  %vm1004_vm12 = vcmp.ge.s32.totalorder %v4116_v52, %v3648_v1  ;;  %vm1148_vm13 = vcmp.lt.s32.totalorder %v4116_v52, %v3662_v4  ;;  %v177_v39 = vpop.f32.mrf.mxu2 }
 0x100   :  { %2623 = vmatpush.msk.msra.mxu0 %vm4018_vm1, %v5485_v10  ;;  %2634 = vmatpush.msk.msra.mxu1 %vm1231_vm5, %v5485_v10  ;;  %vm4093_vm1 = vmand %vm926_vm10, %vm1070_vm11  ;;  %vm1165_vm11 = vcmp.lt.s32.totalorder %v4119_v55, %v3622_v58 }
 0x101   :  { %833 = vmatpush.msrb.mxu2 %v364_v33  ;;  %859 = vmatpush.msrb.mxu3 %v365_v34  ;;  %vm4139_vm5 = vmand %vm910_vm14, %vm1054_vm15  ;;  %vm1005_vm15 = vcmp.ge.s32.totalorder %v4119_v55, %v3648_v1  ;;  %v4290_v33 = vadd.f32 %v174_v27, %v149_v20  ;;  %v126_v34 = vadd.f32 %v3433_v42, %v101_v32 }
 0x102   :  { %2624 = vmatpush.msk.msra.mxu0 %vm4047_vm8, %v5485_v10  ;;  %2635 = vmatpush.msk.msra.mxu1 %vm4051_vm9, %v5485_v10  ;;  %vm1164_vm8 = vcmp.lt.s32.totalorder %v4116_v52, %v3622_v58  ;;  %vm1021_vm9 = vcmp.ge.s32.totalorder %v4119_v55, %v3620_v57  ;;  %vm4191_vm3 = vmand %vm1004_vm12, %vm1148_vm13  ;;  %vm1170_vm12 = vcmp.lt.s32.totalorder %v4206_v9, %v3622_v58 }
 0x103   :  { %2547 = vmatmul.msk.f32.gmra.mxu2 %vm5484_vm0, %v3574_v40  ;;  %2550 = vmatmul.msk.f32.gmra.mxu3 %vm5484_vm0, %v3574_v40  ;;  %vm4165_vm10 = vmand %vm1020_vm7, %vm1164_vm8  ;;  %vm989_vm7 = vcmp.ge.s32.totalorder %v4119_v55, %v3665_v5  ;;  %vm1133_vm8 = vcmp.lt.s32.totalorder %v4119_v55, %v3692_v12  ;;  %vm1027_vm13 = vcmp.ge.s32.totalorder %v4209_v15, %v3620_v57 }
 0x104   :  { %2565 = vmatmul.msk.f32.gmra.mxu0 %vm5484_vm0, %v3574_v40  ;;  %2568 = vmatmul.msk.f32.gmra.mxu1 %vm5484_vm0, %v3574_v40  ;;  %vm4175_vm14 = vmand %vm1021_vm9, %vm1165_vm11  ;;  %vm1026_vm11 = vcmp.ge.s32.totalorder %v4206_v9, %v3620_v57  ;;  %v152_v38 = vadd.f32 %v3435_v43, %v126_v34 }
 0x105   :  { %834 = vmatpush.msrb.mxu2 %v348_v14  ;;  %860 = vmatpush.msrb.mxu3 %v349_v44  ;;  %v4450_v14 = vadd.s32 896, %v3613_v54  ;;  %v4504_v44 = vadd.s32 1664, %v3613_v54 }
 0x106   :  { %2625 = vmatpush.msk.msra.mxu0 %vm4093_vm1, %v5485_v10  ;;  %2636 = vmatpush.msk.msra.mxu1 %vm4111_vm4, %v5485_v10  ;;  %vm1149_vm1 = vcmp.lt.s32.totalorder %v4119_v55, %v3662_v4  ;;  %vm1132_vm4 = vcmp.lt.s32.totalorder %v4116_v52, %v3692_v12  ;;  %v4394_v43 = vadd.f32 %v177_v39, %v152_v38 }
 0x107   :  { %835 = vmatpush.msrb.mxu2 %v332_v2  ;;  %861 = vmatpush.msrb.mxu3 %v333_v3  ;;  %vm4201_vm9 = vmand %vm1005_vm15, %vm1149_vm1  ;;  %vm972_vm15 = vcmp.ge.s32.totalorder %v4116_v52, %v3695_v13  ;;  %vm1116_vm1 = vcmp.lt.s32.totalorder %v4116_v52, %v3714_v19  ;;  %v4772_v3 = vadd.s32 1792, %v3613_v54 }
 0x108   :  { %2626 = vmatpush.msk.msra.mxu0 %vm4139_vm5, %v5485_v10  ;;  %2637 = vmatpush.msk.msra.mxu1 %vm4149_vm6, %v5485_v10  ;;  %vm4214_vm5 = vmand %vm988_vm2, %vm1132_vm4  ;;  %vm973_vm2 = vcmp.ge.s32.totalorder %v4119_v55, %v3695_v13 }
 0x109   :  { %vm4222_vm6 = vmand %vm989_vm7, %vm1133_vm8  ;;  %vm1117_vm8 = vcmp.lt.s32.totalorder %v4119_v55, %v3714_v19 }
 0x10a   :  { %vm1298_vm4 = vmand %vm1026_vm11, %vm1170_vm12  ;;  %vm1010_vm11 = vcmp.ge.s32.totalorder %v4206_v9, %v3648_v1 }
 0x10b   :  { %2557 = vmatmul.msk.f32.vlgmr.msra.gmra.mxu2 %vm5484_vm0, %v3479_v0  ;;  %2560 = vmatmul.msk.f32.vlgmr.msra.gmra.mxu3 %vm5484_vm0, %v3479_v0  ;;  %vm4248_vm7 = vmand %vm972_vm15, %vm1116_vm1  ;;  %vm1155_vm15 = vcmp.lt.s32.totalorder %v4209_v15, %v3662_v4 }
 0x10c   :  { %2583 = vmatmul.msk.f32.vlgmr.msrb.gmra.mxu0 %vm5484_vm0, %v4211_v16  ;;  %2594 = vmatmul.msk.f32.vlgmr.msrb.gmra.mxu1 %vm5484_vm0, %v4211_v16  ;;  %vm1171_vm0 = vcmp.lt.s32.totalorder %v4209_v15, %v3622_v58  ;;  %vm4258_vm12 = vmand %vm973_vm2, %vm1117_vm8  ;;  %vm956_vm2 = vcmp.ge.s32.totalorder %v4116_v52, %v3733_v24 }
 0x10d   :  { %2597 = vmatpush.msk.msra.mxu2 %vm4165_vm10, %v5485_v10  ;;  %2608 = vmatpush.msk.msra.mxu3 %vm4175_vm14, %v5485_v10  ;;  %vm1154_vm10 = vcmp.lt.s32.totalorder %v4206_v9, %v3662_v4  ;;  %vm1299_vm1 = vmand %vm1027_vm13, %vm1171_vm0  ;;  %vm1101_vm14 = vcmp.lt.s32.totalorder %v4119_v55, %v3735_v25  ;;  %vm5533_vm0 = vcmp.ge.s32.totalorder %v4209_v15, %v3648_v1 }
 0x10e   :  { %2663 = vmatpush.msk.msrb.mxu0 %vm1298_vm4, %v5485_v10  ;;  %vm1100_vm4 = vcmp.lt.s32.totalorder %v4116_v52, %v3735_v25  ;;  %2674 = vmatpush.msk.msrb.mxu1 %vm1299_vm1, %v5485_v10  ;;  %vm1282_vm8 = vmand %vm1010_vm11, %vm1154_vm10  ;;  %vm994_vm13 = vcmp.ge.s32.totalorder %v4206_v9, %v3665_v5  ;;  %vm1138_vm11 = vcmp.lt.s32.totalorder %v4206_v9, %v3692_v12 }
 0x10f   :  { %2598 = vmatpush.msk.msra.mxu2 %vm4191_vm3, %v5485_v10  ;;  %2609 = vmatpush.msk.msra.mxu3 %vm4201_vm9, %v5485_v10  ;;  %vm957_vm3 = vcmp.ge.s32.totalorder %v4119_v55, %v3733_v24  ;;  %vm1283_vm9 = vmand %vm5533_vm0, %vm1155_vm15  ;;  %vm1139_vm10 = vcmp.lt.s32.totalorder %v4209_v15, %v3692_v12  ;;  %vm5536_vm15 = vcmask 523264  }
 0x110   :  { %2664 = vmatpush.msk.msrb.mxu0 %vm1282_vm8, %v5485_v10  ;;  %2675 = vmatpush.msk.msrb.mxu1 %vm1283_vm9, %v5485_v10  ;;  %vm5537_vm1 = vmmov %vm5536_vm15  ;;  %vm1084_vm8 = vcmp.lt.s32.totalorder %v4116_v52, %v3782_v35 }
 0x111   :  { %2599 = vmatpush.msk.msra.mxu2 %vm4214_vm5, %v5485_v10  ;;  %2610 = vmatpush.msk.msra.mxu3 %vm4222_vm6, %v5485_v10  ;;  %vm4311_vm5 = vmand %vm956_vm2, %vm1100_vm4  ;;  %vm995_vm6 = vcmp.ge.s32.totalorder %v4209_v15, %v3665_v5  ;;  %vm940_vm4 = vcmp.ge.s32.totalorder %v4116_v52, %v3754_v30 }
 0x112   :  { %vm4329_vm2 = vmand %vm957_vm3, %vm1101_vm14  ;;  %vm941_vm14 = vcmp.ge.s32.totalorder %v4119_v55, %v3754_v30  ;;  %vm1085_vm3 = vcmp.lt.s32.totalorder %v4119_v55, %v3782_v35 }
 0x113   :  { %2558 = vmatmul.msk.f32.gmra.mxu2 %vm5536_vm15, %v3528_v21  ;;  %2561 = vmatmul.msk.f32.gmra.mxu3 %vm5537_vm1, %v3528_v21  ;;  %vm5540_vm0 = vmmov %vm5537_vm1 }
 0x114   :  { %2584 = vmatmul.msk.f32.gmra.mxu0 %vm5540_vm0, %v4290_v33  ;;  %vm5541_vm9 = vmmov %vm5540_vm0  ;;  %2600 = vmatpush.msk.msra.mxu2 %vm4248_vm7, %v5485_v10  ;;  %vm978_vm0 = vcmp.ge.s32.totalorder %v4206_v9, %v3695_v13 }
 0x115   :  { %2595 = vmatmul.msk.f32.gmra.mxu1 %vm5541_vm9, %v4290_v33  ;;  %vm1266_vm15 = vmand %vm994_vm13, %vm1138_vm11  ;;  %2611 = vmatpush.msk.msra.mxu3 %vm4258_vm12, %v5485_v10  ;;  %vm1122_vm13 = vcmp.lt.s32.totalorder %v4206_v9, %v3714_v19  ;;  %vm979_vm12 = vcmp.ge.s32.totalorder %v4209_v15, %v3695_v13  ;;  %vm1123_vm11 = vcmp.lt.s32.totalorder %v4209_v15, %v3714_v19 }
 0x116   :  { %vm1267_vm1 = vmand %vm995_vm6, %vm1139_vm10  ;;  %2665 = vmatpush.msk.msrb.mxu0 %vm1266_vm15, %v5485_v10  ;;  %2601 = vmatpush.msk.msra.mxu2 %vm4311_vm5, %v5485_v10  ;;  %vm962_vm10 = vcmp.ge.s32.totalorder %v4206_v9, %v3733_v24  ;;  %vm963_vm5 = vcmp.ge.s32.totalorder %v4209_v15, %v3733_v24  ;;  %vm924_vm15 = vcmp.ge.s32.totalorder %v4116_v52, %v3794_v37 }
 0x117   :  { %2676 = vmatpush.msk.msrb.mxu1 %vm1267_vm1, %v5485_v10  ;;  %vm1212_vm7 = vmand %vm940_vm4, %vm1084_vm8  ;;  %2612 = vmatpush.msk.msra.mxu3 %vm4329_vm2, %v5485_v10  ;;  %vm1106_vm4 = vcmp.lt.s32.totalorder %v4206_v9, %v3735_v25  ;;  %vm1107_vm2 = vcmp.lt.s32.totalorder %v4209_v15, %v3735_v25  ;;  %vm925_vm1 = vcmp.ge.s32.totalorder %v4119_v55, %v3794_v37 }
 0x118   :  { %vm1213_vm6 = vmand %vm941_vm14, %vm1085_vm3  ;;  %2602 = vmatpush.msk.msra.mxu2 %vm1212_vm7, %v5485_v10  ;;  %vm1068_vm14 = vcmp.lt.s32.totalorder %v4116_v52, %v3834_v47 }
 0x119   :  { %vm1250_vm8 = vmand %vm978_vm0, %vm1122_vm13  ;;  %2613 = vmatpush.msk.msra.mxu3 %vm1213_vm6, %v5485_v10  ;;  %vm1069_vm0 = vcmp.lt.s32.totalorder %v4119_v55, %v3834_v47  ;;  %vm5542_vm13 = vcmask 523264   ;;  %vm1090_vm6 = vcmp.lt.s32.totalorder %v4206_v9, %v3782_v35 }
 0x11a   :  { %vm1251_vm9 = vmand %vm979_vm12, %vm1123_vm11  ;;  %2666 = vmatpush.msk.msrb.mxu0 %vm1250_vm8, %v5485_v10  ;;  %vm946_vm11 = vcmp.ge.s32.totalorder %v4206_v9, %v3754_v30 }
 0x11b   :  { %2677 = vmatpush.msk.msrb.mxu1 %vm1251_vm9, %v5485_v10  ;;  %vm1234_vm3 = vmand %vm962_vm10, %vm1106_vm4  ;;  %2559 = vmatmul.msk.f32.gmra.mxu2 %vm5542_vm13, %v3574_v40  ;;  %vm947_vm9 = vcmp.ge.s32.totalorder %v4209_v15, %v3754_v30 }
 0x11c   :  { %vm5543_vm7 = vmmov %vm5542_vm13  ;;  %2667 = vmatpush.msk.msrb.mxu0 %vm1234_vm3, %v5485_v10  ;;  %vm908_vm13 = vcmp.ge.s32.totalorder %v4116_v52, %v3821_v45  ;;  %vm1053_vm3 = vcmp.lt.s32.totalorder %v4119_v55, %v3838_v49 }
 0x11d   :  { %2562 = vmatmul.msk.f32.gmra.mxu3 %vm5543_vm7, %v3574_v40  ;;  %vm1235_vm12 = vmand %vm963_vm5, %vm1107_vm2  ;;  %vm1091_vm5 = vcmp.lt.s32.totalorder %v4209_v15, %v3782_v35 }
 0x11e   :  { %vm5544_vm10 = vmmov %vm5543_vm7  ;;  %2678 = vmatpush.msk.msrb.mxu1 %vm1235_vm12, %v5485_v10  ;;  %vm1074_vm12 = vcmp.lt.s32.totalorder %v4206_v9, %v3834_v47 }
 0x11f   :  { %2585 = vmatmul.msk.f32.gmra.mxu0 %vm5544_vm10, %v4394_v43  ;;  %vm5545_vm4 = vmmov %vm5543_vm7  ;;  %vm1052_vm7 = vcmp.lt.s32.totalorder %v4116_v52, %v3838_v49  ;;  %vm1075_vm10 = vcmp.lt.s32.totalorder %v4209_v15, %v3834_v47 }
 0x120   :  { %2596 = vmatmul.msk.f32.gmra.mxu1 %vm5545_vm4, %v4394_v43  ;;  %vm1196_vm8 = vmand %vm924_vm15, %vm1068_vm14  ;;  %vm909_vm14 = vcmp.ge.s32.totalorder %v4119_v55, %v3821_v45 }
 0x121   :  { %vm1197_vm2 = vmand %vm925_vm1, %vm1069_vm0  ;;  %2603 = vmatpush.msk.msra.mxu2 %vm1196_vm8, %v5485_v10  ;;  %vm930_vm0 = vcmp.ge.s32.totalorder %v4206_v9, %v3794_v37  ;;  %vm914_vm8 = vcmp.ge.s32.totalorder %v4206_v9, %v3821_v45 }
 0x122   :  { %2614 = vmatpush.msk.msra.mxu3 %vm1197_vm2, %v5485_v10  ;;  %vm1218_vm15 = vmand %vm946_vm11, %vm1090_vm6  ;;  %vm931_vm6 = vcmp.ge.s32.totalorder %v4209_v15, %v3794_v37  ;;  %vm915_vm2 = vcmp.ge.s32.totalorder %v4209_v15, %v3821_v45 }
 0x123   :  { %2668 = vmatpush.msk.msrb.mxu0 %vm1218_vm15, %v5485_v10  ;;  %vm1219_vm1 = vmand %vm947_vm9, %vm1091_vm5  ;;  %vm1058_vm9 = vcmp.lt.s32.totalorder %v4206_v9, %v3838_v49 }
 0x124   :  { %2679 = vmatpush.msk.msrb.mxu1 %vm1219_vm1, %v5485_v10  ;;  %vm1180_vm11 = vmand %vm908_vm13, %vm1052_vm7  ;;  %vm1059_vm13 = vcmp.lt.s32.totalorder %v4209_v15, %v3838_v49  ;;  %vm5546_vm7 = vcmask 523264   ;;  %vm1168_vm1 = vcmp.lt.s32.totalorder %v4442_v41, %v3622_v58 }
 0x125   :  { %2604 = vmatpush.msk.msra.mxu2 %vm1180_vm11, %v5485_v10  ;;  %vm1181_vm4 = vmand %vm909_vm14, %vm1053_vm3  ;;  %vm1024_vm3 = vcmp.ge.s32.totalorder %v4442_v41, %v3620_v57 }
 0x126   :  { %2615 = vmatpush.msk.msra.mxu3 %vm1181_vm4, %v5485_v10  ;;  %vm1202_vm5 = vmand %vm930_vm0, %vm1074_vm12  ;;  %2569 = vmatmul.msk.f32.vlgmr.msrb.gmra.mxu2 %vm5546_vm7, %v3479_v0  ;;  %vm1025_vm4 = vcmp.ge.s32.totalorder %v4450_v14, %v3620_v57 }
 0x127   :  { %vm5547_vm15 = vmmov %vm5546_vm7  ;;  %2669 = vmatpush.msk.msrb.mxu0 %vm1202_vm5, %v5485_v10 }
 0x128   :  { %2572 = vmatmul.msk.f32.vlgmr.msrb.gmra.mxu3 %vm5547_vm15, %v3479_v0  ;;  %vm1203_vm14 = vmand %vm931_vm6, %vm1075_vm10  ;;  %vm1008_vm10 = vcmp.ge.s32.totalorder %v4442_v41, %v3648_v1  ;;  %vm1152_vm15 = vcmp.lt.s32.totalorder %v4442_v41, %v3662_v4  ;;  %v4495_v0 = vadd.s32 1536, %v3613_v54 }
 0x129   :  { %vm5548_vm0 = vmmov %vm5546_vm7  ;;  %vm1169_vm7 = vcmp.lt.s32.totalorder %v4450_v14, %v3622_v58  ;;  %2680 = vmatpush.msk.msrb.mxu1 %vm1203_vm14, %v5485_v10 }
 0x12a   :  { %2627 = vmatmul.msk.f32.vlgmr.msra.gmra.mxu0 %vm5548_vm0, %v4211_v16  ;;  %vm5549_vm12 = vmmov %vm5548_vm0 }
 0x12b   :  { %2638 = vmatmul.msk.f32.vlgmr.msra.gmra.mxu1 %vm5549_vm12, %v4211_v16  ;;  %vm1186_vm11 = vmand %vm914_vm8, %vm1058_vm9  ;;  %vm1009_vm8 = vcmp.ge.s32.totalorder %v4450_v14, %v3648_v1  ;;  %vm1153_vm9 = vcmp.lt.s32.totalorder %v4450_v14, %v3662_v4 }
 0x12c   :  { %vm1187_vm6 = vmand %vm915_vm2, %vm1059_vm13  ;;  %2670 = vmatpush.msk.msrb.mxu0 %vm1186_vm11, %v5485_v10  ;;  %vm992_vm2 = vcmp.ge.s32.totalorder %v4442_v41, %v3665_v5  ;;  %vm1136_vm13 = vcmp.lt.s32.totalorder %v4442_v41, %v3692_v12  ;;  %vm976_vm11 = vcmp.ge.s32.totalorder %v4442_v41, %v3695_v13 }
 0x12d   :  { %vm1296_vm0 = vmand %vm1024_vm3, %vm1168_vm1  ;;  %2681 = vmatpush.msk.msrb.mxu1 %vm1187_vm6, %v5485_v10  ;;  %vm993_vm3 = vcmp.ge.s32.totalorder %v4450_v14, %v3665_v5  ;;  %vm1137_vm1 = vcmp.lt.s32.totalorder %v4450_v14, %v3692_v12  ;;  %vm977_vm6 = vcmp.ge.s32.totalorder %v4450_v14, %v3695_v13 }
 0x12e   :  { %vm1297_vm5 = vmand %vm1025_vm4, %vm1169_vm7  ;;  %2641 = vmatpush.msk.msrb.mxu2 %vm1296_vm0, %v5485_v10  ;;  %vm1120_vm4 = vcmp.lt.s32.totalorder %v4442_v41, %v3714_v19 }
 0x12f   :  { %2652 = vmatpush.msk.msrb.mxu3 %vm1297_vm5, %v5485_v10  ;;  %vm1280_vm14 = vmand %vm1008_vm10, %vm1152_vm15  ;;  %vm1121_vm10 = vcmp.lt.s32.totalorder %v4450_v14, %v3714_v19  ;;  %vm5550_vm15 = vcmask 523264   ;;  %vm1174_vm5 = vcmp.lt.s32.totalorder %v4495_v0, %v3622_v58 }
 0x130   :  { %vm1281_vm12 = vmand %vm1009_vm8, %vm1153_vm9  ;;  %2642 = vmatpush.msk.msrb.mxu2 %vm1280_vm14, %v5485_v10  ;;  %vm1030_vm9 = vcmp.ge.s32.totalorder %v4495_v0, %v3620_v57 }
 0x131   :  { %2653 = vmatpush.msk.msrb.mxu3 %vm1281_vm12, %v5485_v10  ;;  %vm1264_vm7 = vmand %vm992_vm2, %vm1136_vm13  ;;  %2570 = vmatmul.msk.f32.gmra.mxu2 %vm5550_vm15, %v3528_v21  ;;  %vm1031_vm12 = vcmp.ge.s32.totalorder %v4504_v44, %v3620_v57 }
 0x132   :  { %vm5551_vm0 = vmmov %vm5550_vm15  ;;  %vm1175_vm15 = vcmp.lt.s32.totalorder %v4504_v44, %v3622_v58  ;;  %2643 = vmatpush.msk.msrb.mxu2 %vm1264_vm7, %v5485_v10 }
 0x133   :  { %2573 = vmatmul.msk.f32.gmra.mxu3 %vm5551_vm0, %v3528_v21  ;;  %vm1265_vm8 = vmand %vm993_vm3, %vm1137_vm1  ;;  %vm1014_vm1 = vcmp.ge.s32.totalorder %v4495_v0, %v3648_v1  ;;  %v4646_v21 = vadd.s32 1280, %v3613_v54 }
 0x134   :  { %vm5552_vm2 = vmmov %vm5551_vm0  ;;  %2654 = vmatpush.msk.msrb.mxu3 %vm1265_vm8, %v5485_v10 }
 0x135   :  { %2628 = vmatmul.msk.f32.gmra.mxu0 %vm5552_vm2, %v4290_v33  ;;  %vm5553_vm13 = vmmov %vm5551_vm0  ;;  %vm1158_vm0 = vcmp.lt.s32.totalorder %v4495_v0, %v3662_v4 }
 0x136   :  { %2639 = vmatmul.msk.f32.gmra.mxu1 %vm5553_vm13, %v4290_v33  ;;  %vm1248_vm14 = vmand %vm976_vm11, %vm1120_vm4  ;;  %vm1015_vm11 = vcmp.ge.s32.totalorder %v4504_v44, %v3648_v1  ;;  %vm1159_vm4 = vcmp.lt.s32.totalorder %v4504_v44, %v3662_v4 }
 0x137   :  { %vm1249_vm3 = vmand %vm977_vm6, %vm1121_vm10  ;;  %2644 = vmatpush.msk.msrb.mxu2 %vm1248_vm14, %v5485_v10  ;;  %vm960_vm6 = vcmp.ge.s32.totalorder %v4442_v41, %v3733_v24  ;;  %vm1104_vm10 = vcmp.lt.s32.totalorder %v4442_v41, %v3735_v25  ;;  %vm998_vm14 = vcmp.ge.s32.totalorder %v4495_v0, %v3665_v5 }
 0x138   :  { %vm1302_vm2 = vmand %vm1030_vm9, %vm1174_vm5  ;;  %2655 = vmatpush.msk.msrb.mxu3 %vm1249_vm3, %v5485_v10  ;;  %vm961_vm9 = vcmp.ge.s32.totalorder %v4450_v14, %v3733_v24  ;;  %vm1105_vm5 = vcmp.lt.s32.totalorder %v4450_v14, %v3735_v25  ;;  %vm999_vm3 = vcmp.ge.s32.totalorder %v4504_v44, %v3665_v5 }
 0x139   :  { %vm1303_vm7 = vmand %vm1031_vm12, %vm1175_vm15  ;;  %2707 = vmatpush.msk.msra.mxu0 %vm1302_vm2, %v5485_v10  ;;  %vm1142_vm12 = vcmp.lt.s32.totalorder %v4495_v0, %v3692_v12 }
 0x13a   :  { %2718 = vmatpush.msk.msra.mxu1 %vm1303_vm7, %v5485_v10  ;;  %vm1286_vm8 = vmand %vm1014_vm1, %vm1158_vm0  ;;  %vm1143_vm1 = vcmp.lt.s32.totalorder %v4504_v44, %v3692_v12  ;;  %vm5554_vm0 = vcmask 523264   ;;  %vm1088_vm7 = vcmp.lt.s32.totalorder %v4442_v41, %v3782_v35 }
 0x13b   :  { %vm1287_vm13 = vmand %vm1015_vm11, %vm1159_vm4  ;;  %2708 = vmatpush.msk.msra.mxu0 %vm1286_vm8, %v5485_v10  ;;  %2571 = vmatmul.msk.f32.gmra.mxu2 %vm5554_vm0, %v3574_v40  ;;  %vm944_vm4 = vcmp.ge.s32.totalorder %v4442_v41, %v3754_v30 }
 0x13c   :  { %2719 = vmatpush.msk.msra.mxu1 %vm1287_vm13, %v5485_v10  ;;  %vm1232_vm15 = vmand %vm960_vm6, %vm1104_vm10  ;;  %vm945_vm13 = vcmp.ge.s32.totalorder %v4450_v14, %v3754_v30 }
 0x13d   :  { %vm5555_vm2 = vmmov %vm5554_vm0  ;;  %2645 = vmatpush.msk.msrb.mxu2 %vm1232_vm15, %v5485_v10  ;;  %vm1127_vm15 = vcmp.lt.s32.totalorder %v4504_v44, %v3714_v19 }
 0x13e   :  { %2574 = vmatmul.msk.f32.gmra.mxu3 %vm5555_vm2, %v3574_v40  ;;  %vm1233_vm11 = vmand %vm961_vm9, %vm1105_vm5  ;;  %vm982_vm5 = vcmp.ge.s32.totalorder %v4495_v0, %v3695_v13  ;;  %vm1126_vm2 = vcmp.lt.s32.totalorder %v4495_v0, %v3714_v19  ;;  %v4654_v40 = vadd.s32 1408, %v3613_v54 }
 0x13f   :  { %vm5556_vm6 = vmmov %vm5554_vm0  ;;  %2656 = vmatpush.msk.msrb.mxu3 %vm1233_vm11, %v5485_v10  ;;  %vm1110_vm11 = vcmp.lt.s32.totalorder %v4495_v0, %v3735_v25 }
 0x140   :  { %2629 = vmatmul.msk.f32.gmra.mxu0 %vm5556_vm6, %v4394_v43  ;;  %vm5557_vm10 = vmmov %vm5554_vm0  ;;  %vm1089_vm0 = vcmp.lt.s32.totalorder %v4450_v14, %v3782_v35 }
 0x141   :  { %2640 = vmatmul.msk.f32.gmra.mxu1 %vm5557_vm10, %v4394_v43  ;;  %vm1270_vm8 = vmand %vm998_vm14, %vm1142_vm12  ;;  %vm983_vm12 = vcmp.ge.s32.totalorder %v4504_v44, %v3695_v13  ;;  %v4656_v46 = vpop.f32.mrf.mxu0  ;;  %v4658_v50 = vpop.f32.mrf.mxu1 }
 0x142   :  { %vm1271_vm9 = vmand %vm999_vm3, %vm1143_vm1  ;;  %2709 = vmatpush.msk.msra.mxu0 %vm1270_vm8, %v5485_v10  ;;  %vm966_vm1 = vcmp.ge.s32.totalorder %v4495_v0, %v3733_v24  ;;  %vm928_vm8 = vcmp.ge.s32.totalorder %v4442_v41, %v3794_v37 }
 0x143   :  { %2720 = vmatpush.msk.msra.mxu1 %vm1271_vm9, %v5485_v10  ;;  %vm1216_vm14 = vmand %vm944_vm4, %vm1088_vm7  ;;  %vm967_vm4 = vcmp.ge.s32.totalorder %v4504_v44, %v3733_v24  ;;  %vm1111_vm7 = vcmp.lt.s32.totalorder %v4504_v44, %v3735_v25  ;;  %vm929_vm9 = vcmp.ge.s32.totalorder %v4450_v14, %v3794_v37 }
 0x144   :  { %2646 = vmatpush.msk.msrb.mxu2 %vm1216_vm14, %v5485_v10  ;;  %vm1217_vm3 = vmand %vm945_vm13, %vm1089_vm0  ;;  %vm1072_vm13 = vcmp.lt.s32.totalorder %v4442_v41, %v3834_v47 }
 0x145   :  { %2657 = vmatpush.msk.msrb.mxu3 %vm1217_vm3, %v5485_v10  ;;  %vm1254_vm6 = vmand %vm982_vm5, %vm1126_vm2  ;;  %vm1073_vm5 = vcmp.lt.s32.totalorder %v4450_v14, %v3834_v47  ;;  %vm5558_vm2 = vcmask 523264   ;;  %vm1094_vm3 = vcmp.lt.s32.totalorder %v4495_v0, %v3782_v35 }
 0x146   :  { %2710 = vmatpush.msk.msra.mxu0 %vm1254_vm6, %v5485_v10  ;;  %vm1255_vm10 = vmand %vm983_vm12, %vm1127_vm15  ;;  %2605 = vmatmul.msk.f32.vlgmr.msra.gmra.mxu2 %vm5558_vm2, %v4211_v16  ;;  %vm950_vm15 = vcmp.ge.s32.totalorder %v4495_v0, %v3754_v30  ;;  %v4701_v51 = vpop.f32.mrf.mxu2  ;;  %v4703_v52 = vpop.f32.mrf.mxu3 }
 0x147   :  { %2721 = vmatpush.msk.msra.mxu1 %vm1255_vm10, %v5485_v10  ;;  %vm1238_vm0 = vmand %vm966_vm1, %vm1110_vm11  ;;  %vm951_vm10 = vcmp.ge.s32.totalorder %v4504_v44, %v3754_v30 }
 0x148   :  { %vm5559_vm14 = vmmov %vm5558_vm2  ;;  %2711 = vmatpush.msk.msra.mxu0 %vm1238_vm0, %v5485_v10  ;;  %vm1057_vm0 = vcmp.lt.s32.totalorder %v4450_v14, %v3838_v49 }
 0x149   :  { %2616 = vmatmul.msk.f32.vlgmr.msra.gmra.mxu3 %vm5559_vm14, %v4211_v16  ;;  %vm1239_vm12 = vmand %vm967_vm4, %vm1111_vm7  ;;  %vm912_vm7 = vcmp.ge.s32.totalorder %v4442_v41, %v3821_v45  ;;  %vm1056_vm14 = vcmp.lt.s32.totalorder %v4442_v41, %v3838_v49  ;;  %v4721_v55 = vpop.f32.mrf.mxu0  ;;  %v4723_v60 = vpop.f32.mrf.mxu1 }
 0x14a   :  { %vm5560_vm1 = vmmov %vm5558_vm2  ;;  %vm1095_vm2 = vcmp.lt.s32.totalorder %v4504_v44, %v3782_v35  ;;  %2722 = vmatpush.msk.msra.mxu1 %vm1239_vm12, %v5485_v10  ;;  %vm1078_vm12 = vcmp.lt.s32.totalorder %v4495_v0, %v3834_v47 }
 0x14b   :  { %2671 = vmatmul.msk.f32.vlgmr.msrb.gmra.mxu0 %vm5560_vm1, %v4211_v16  ;;  %vm5561_vm11 = vmmov %vm5560_vm1  ;;  %vm1079_vm1 = vcmp.lt.s32.totalorder %v4504_v44, %v3834_v47 }
 0x14c   :  { %2682 = vmatmul.msk.f32.vlgmr.msrb.gmra.mxu1 %vm5561_vm11, %v4211_v16  ;;  %vm1200_vm6 = vmand %vm928_vm8, %vm1072_vm13  ;;  %vm913_vm13 = vcmp.ge.s32.totalorder %v4450_v14, %v3821_v45 }
 0x14d   :  { %vm1201_vm4 = vmand %vm929_vm9, %vm1073_vm5  ;;  %2647 = vmatpush.msk.msrb.mxu2 %vm1200_vm6, %v5485_v10  ;;  %vm934_vm5 = vcmp.ge.s32.totalorder %v4495_v0, %v3794_v37  ;;  %vm918_vm6 = vcmp.ge.s32.totalorder %v4495_v0, %v3821_v45 }
 0x14e   :  { %2658 = vmatpush.msk.msrb.mxu3 %vm1201_vm4, %v5485_v10  ;;  %vm1222_vm8 = vmand %vm950_vm15, %vm1094_vm3  ;;  %vm935_vm3 = vcmp.ge.s32.totalorder %v4504_v44, %v3794_v37  ;;  %vm919_vm4 = vcmp.ge.s32.totalorder %v4504_v44, %v3821_v45  ;;  %v4757_v62 = vpop.f32.mrf.mxu2  ;;  %v4759_v2 = vpop.f32.mrf.mxu3 }
 0x14f   :  { %2712 = vmatpush.msk.msra.mxu0 %vm1222_vm8, %v5485_v10  ;;  %vm1223_vm9 = vmand %vm951_vm10, %vm1095_vm2  ;;  %vm1062_vm10 = vcmp.lt.s32.totalorder %v4495_v0, %v3838_v49 }
 0x150   :  { %2723 = vmatpush.msk.msra.mxu1 %vm1223_vm9, %v5485_v10  ;;  %vm1184_vm15 = vmand %vm912_vm7, %vm1056_vm14  ;;  %vm1063_vm7 = vcmp.lt.s32.totalorder %v4504_v44, %v3838_v49  ;;  %vm5562_vm14 = vcmask 523264   ;;  %vm1172_vm9 = vcmp.lt.s32.totalorder %v4646_v21, %v3622_v58 }
 0x151   :  { %2648 = vmatpush.msk.msrb.mxu2 %vm1184_vm15, %v5485_v10  ;;  %vm1185_vm11 = vmand %vm913_vm13, %vm1057_vm0  ;;  %vm1028_vm0 = vcmp.ge.s32.totalorder %v4646_v21, %v3620_v57  ;;  %v4785_v61 = vpop.f32.mrf.mxu0  ;;  %v4787_v59 = vpop.f32.mrf.mxu1 }
 0x152   :  { %2659 = vmatpush.msk.msrb.mxu3 %vm1185_vm11, %v5485_v10  ;;  %vm1206_vm2 = vmand %vm934_vm5, %vm1078_vm12  ;;  %2606 = vmatmul.msk.f32.gmra.mxu2 %vm5562_vm14, %v4290_v33  ;;  %vm1029_vm11 = vcmp.ge.s32.totalorder %v4654_v40, %v3620_v57  ;;  %5572 = vst [vmem:[#allocation5_spill] sm:$0xff] %v4785_v61 }
 0x153   :  { %vm5563_vm8 = vmmov %vm5562_vm14  ;;  %vm1173_vm14 = vcmp.lt.s32.totalorder %v4654_v40, %v3622_v58  ;;  %2713 = vmatpush.msk.msra.mxu0 %vm1206_vm2, %v5485_v10  ;;  %vm1157_vm2 = vcmp.lt.s32.totalorder %v4654_v40, %v3662_v4  ;;  %5573 = vst [vmem:[#allocation6_spill] sm:$0xff] %v4787_v59  ;;  %v1952_v59 = vadd.s32 64, %v3592_v48 }
 0x154   :  { %2617 = vmatmul.msk.f32.gmra.mxu3 %vm5563_vm8, %v4290_v33  ;;  %vm1207_vm13 = vmand %vm935_vm3, %vm1079_vm1  ;;  %vm1012_vm1 = vcmp.ge.s32.totalorder %v4646_v21, %v3648_v1 }
 0x155   :  { %vm5564_vm5 = vmmov %vm5563_vm8  ;;  %2724 = vmatpush.msk.msra.mxu1 %vm1207_vm13, %v5485_v10  ;;  %vm1156_vm8 = vcmp.lt.s32.totalorder %v4646_v21, %v3662_v4  ;;  %vm1140_vm13 = vcmp.lt.s32.totalorder %v4646_v21, %v3692_v12 }
 0x156   :  { %2672 = vmatmul.msk.f32.gmra.mxu0 %vm5564_vm5, %v4290_v33  ;;  %vm5565_vm12 = vmmov %vm5564_vm5  ;;  %vm1141_vm5 = vcmp.lt.s32.totalorder %v4654_v40, %v3692_v12  ;;  %v4850_v22 = vpop.f32.mrf.mxu2  ;;  %v4852_v23 = vpop.f32.mrf.mxu3 }
 0x157   :  { %2683 = vmatmul.msk.f32.gmra.mxu1 %vm5565_vm12, %v4290_v33  ;;  %vm1190_vm15 = vmand %vm918_vm6, %vm1062_vm10  ;;  %vm1013_vm10 = vcmp.ge.s32.totalorder %v4654_v40, %v3648_v1 }
 0x158   :  { %vm1191_vm3 = vmand %vm919_vm4, %vm1063_vm7  ;;  %2714 = vmatpush.msk.msra.mxu0 %vm1190_vm15, %v5485_v10  ;;  %vm996_vm7 = vcmp.ge.s32.totalorder %v4646_v21, %v3665_v5  ;;  %vm980_vm15 = vcmp.ge.s32.totalorder %v4646_v21, %v3695_v13 }
 0x159   :  { %vm1300_vm6 = vmand %vm1028_vm0, %vm1172_vm9  ;;  %2725 = vmatpush.msk.msra.mxu1 %vm1191_vm3, %v5485_v10  ;;  %vm997_vm9 = vcmp.ge.s32.totalorder %v4654_v40, %v3665_v5  ;;  %vm981_vm3 = vcmp.ge.s32.totalorder %v4654_v40, %v3695_v13  ;;  %v4878_v27 = vpop.f32.mrf.mxu1 }
 0x15a   :  { %vm1301_vm4 = vmand %vm1029_vm11, %vm1173_vm14  ;;  %2685 = vmatpush.msk.msra.mxu2 %vm1300_vm6, %v5485_v10  ;;  %vm1124_vm11 = vcmp.lt.s32.totalorder %v4646_v21, %v3714_v19 }
 0x15b   :  { %2696 = vmatpush.msk.msra.mxu3 %vm1301_vm4, %v5485_v10  ;;  %vm1284_vm0 = vmand %vm1012_vm1, %vm1156_vm8  ;;  %vm1125_vm1 = vcmp.lt.s32.totalorder %v4654_v40, %v3714_v19  ;;  %vm5566_vm8 = vcmask 523264   ;;  %vm1108_vm4 = vcmp.lt.s32.totalorder %v4646_v21, %v3735_v25 }
 0x15c   :  { %vm1285_vm12 = vmand %vm1013_vm10, %vm1157_vm2  ;;  %2686 = vmatpush.msk.msra.mxu2 %vm1284_vm0, %v5485_v10  ;;  %vm964_vm2 = vcmp.ge.s32.totalorder %v4646_v21, %v3733_v24 }
 0x15d   :  { %2697 = vmatpush.msk.msra.mxu3 %vm1285_vm12, %v5485_v10  ;;  %vm1268_vm14 = vmand %vm996_vm7, %vm1140_vm13  ;;  %2607 = vmatmul.msk.f32.gmra.mxu2 %vm5566_vm8, %v4394_v43  ;;  %vm965_vm12 = vcmp.ge.s32.totalorder %v4654_v40, %v3733_v24 }
 0x15e   :  { %vm5567_vm6 = vmmov %vm5566_vm8  ;;  %vm1109_vm8 = vcmp.lt.s32.totalorder %v4654_v40, %v3735_v25  ;;  %2687 = vmatpush.msk.msra.mxu2 %vm1268_vm14, %v5485_v10  ;;  %vm1093_vm14 = vcmp.lt.s32.totalorder %v4654_v40, %v3782_v35 }
 0x15f   :  { %2618 = vmatmul.msk.f32.gmra.mxu3 %vm5567_vm6, %v4394_v43  ;;  %vm1269_vm10 = vmand %vm997_vm9, %vm1141_vm5  ;;  %vm948_vm5 = vcmp.ge.s32.totalorder %v4646_v21, %v3754_v30 }
 0x160   :  { %vm5568_vm7 = vmmov %vm5567_vm6  ;;  %2698 = vmatpush.msk.msra.mxu3 %vm1269_vm10, %v5485_v10  ;;  %vm1076_vm10 = vcmp.lt.s32.totalorder %v4646_v21, %v3834_v47 }
 0x161   :  { %2673 = vmatmul.msk.f32.gmra.mxu0 %vm5568_vm7, %v4394_v43  ;;  %vm5569_vm13 = vmmov %vm5567_vm6  ;;  %vm1092_vm6 = vcmp.lt.s32.totalorder %v4646_v21, %v3782_v35  ;;  %vm1077_vm7 = vcmp.lt.s32.totalorder %v4654_v40, %v3834_v47 }
 0x162   :  { %2684 = vmatmul.msk.f32.gmra.mxu1 %vm5569_vm13, %v4394_v43  ;;  %vm1252_vm0 = vmand %vm980_vm15, %vm1124_vm11  ;;  %vm949_vm11 = vcmp.ge.s32.totalorder %v4654_v40, %v3754_v30 }
 0x163   :  { %vm1253_vm9 = vmand %vm981_vm3, %vm1125_vm1  ;;  %2688 = vmatpush.msk.msra.mxu2 %vm1252_vm0, %v5485_v10  ;;  %vm932_vm1 = vcmp.ge.s32.totalorder %v4646_v21, %v3794_v37  ;;  %vm916_vm0 = vcmp.ge.s32.totalorder %v4646_v21, %v3821_v45 }
 0x164   :  { %vm1236_vm15 = vmand %vm964_vm2, %vm1108_vm4  ;;  %2699 = vmatpush.msk.msra.mxu3 %vm1253_vm9, %v5485_v10  ;;  %vm933_vm4 = vcmp.ge.s32.totalorder %v4654_v40, %v3794_v37  ;;  %vm917_vm9 = vcmp.ge.s32.totalorder %v4654_v40, %v3821_v45 }
 0x165   :  { %vm1237_vm3 = vmand %vm965_vm12, %vm1109_vm8  ;;  %2689 = vmatpush.msk.msra.mxu2 %vm1236_vm15, %v5485_v10  ;;  %vm1060_vm12 = vcmp.lt.s32.totalorder %v4646_v21, %v3838_v49 }
 0x166   :  { %vm4774_vm2 = vmand %vm948_vm5, %vm1092_vm6  ;;  %2700 = vmatpush.msk.msra.mxu3 %vm1237_vm3, %v5485_v10  ;;  %vm1061_vm5 = vcmp.lt.s32.totalorder %v4654_v40, %v3838_v49  ;;  %vm5578_vm6 = vcmask 523264   ;;  %vm1176_vm3 = vcmp.lt.s32.totalorder %v4772_v3, %v3622_v58 }
 0x167   :  { %vm4797_vm13 = vmand %vm949_vm11, %vm1093_vm14  ;;  %2649 = vmatmul.msk.f32.vlgmr.msrb.gmra.mxu2 %vm5578_vm6, %v4211_v16  ;;  %vm1032_vm14 = vcmp.ge.s32.totalorder %v4772_v3, %v3620_v57 }
 0x168   :  { %vm4805_vm8 = vmand %vm932_vm1, %vm1076_vm10  ;;  %2690 = vmatpush.msk.msra.mxu2 %vm4774_vm2, %v5485_v10  ;;  %2701 = vmatpush.msk.msra.mxu3 %vm4797_vm13, %v5485_v10  ;;  %vm1160_vm2 = vcmp.lt.s32.totalorder %v4772_v3, %v3662_v4 }
 0x169   :  { %vm5579_vm15 = vmmov %vm5578_vm6 }
 0x16a   :  { %2660 = vmatmul.msk.f32.vlgmr.msrb.gmra.mxu3 %vm5579_vm15, %v4211_v16  ;;  %vm4820_vm11 = vmand %vm933_vm4, %vm1077_vm7  ;;  %vm1033_vm4 = vcmp.ge.s32.totalorder %v4783_v26, %v3620_v57  ;;  %vm1177_vm7 = vcmp.lt.s32.totalorder %v4783_v26, %v3622_v58  ;;  %2691 = vmatpush.msk.msra.mxu2 %vm4805_vm8, %v5485_v10  ;;  %v4876_v58 = vpop.f32.mrf.mxu0 }
 0x16b   :  { %vm5582_vm1 = vmmov %vm5578_vm6  ;;  %2702 = vmatpush.msk.msra.mxu3 %vm4820_vm11, %v5485_v10  ;;  %vm1001_vm11 = vcmp.ge.s32.totalorder %v4783_v26, %v3665_v5 }
 0x16c   :  { %2715 = vmatmul.msk.f32.vlgmr.msra.gmra.mxu0 %vm5582_vm1, %v4211_v16  ;;  %vm5583_vm10 = vmmov %vm5582_vm1  ;;  %vm1145_vm1 = vcmp.lt.s32.totalorder %v4783_v26, %v3692_v12 }
 0x16d   :  { %2726 = vmatmul.msk.f32.vlgmr.msra.gmra.mxu1 %vm5583_vm10, %v4211_v16  ;;  %vm4832_vm6 = vmand %vm916_vm0, %vm1060_vm12  ;;  %vm1016_vm12 = vcmp.ge.s32.totalorder %v4772_v3, %v3648_v1 }
 0x16e   :  { %vm4846_vm15 = vmand %vm917_vm9, %vm1061_vm5  ;;  %vm1017_vm9 = vcmp.ge.s32.totalorder %v4783_v26, %v3648_v1  ;;  %vm1161_vm5 = vcmp.lt.s32.totalorder %v4783_v26, %v3662_v4  ;;  %2692 = vmatpush.msk.msra.mxu2 %vm4832_vm6, %v5485_v10  ;;  %vm984_vm6 = vcmp.ge.s32.totalorder %v4772_v3, %v3695_v13  ;;  %v4924_v4 = vpop.f32.mrf.mxu2 }
 0x16f   :  { %vm4854_vm0 = vmand %vm1032_vm14, %vm1176_vm3  ;;  %vm1000_vm14 = vcmp.ge.s32.totalorder %v4772_v3, %v3665_v5  ;;  %vm1144_vm3 = vcmp.lt.s32.totalorder %v4772_v3, %v3692_v12  ;;  %2703 = vmatpush.msk.msra.mxu3 %vm4846_vm15, %v5485_v10  ;;  %v4926_v5 = vpop.f32.mrf.mxu3 }
 0x170   :  { %vm1305_vm13 = vmand %vm1033_vm4, %vm1177_vm7  ;;  %2729 = vmatpush.msk.msrb.mxu2 %vm4854_vm0, %v5485_v10  ;;  %vm1128_vm4 = vcmp.lt.s32.totalorder %v4772_v3, %v3714_v19  ;;  %vm5592_vm7 = vcmask 523264  }
 0x171   :  { %vm4886_vm8 = vmand %vm1016_vm12, %vm1160_vm2  ;;  %2740 = vmatpush.msk.msrb.mxu3 %vm1305_vm13, %v5485_v10  ;;  %2650 = vmatmul.msk.f32.gmra.mxu2 %vm5592_vm7, %v4290_v33  ;;  %vm985_vm12 = vcmp.ge.s32.totalorder %v4783_v26, %v3695_v13  ;;  %vm1129_vm2 = vcmp.lt.s32.totalorder %v4783_v26, %v3714_v19  ;;  %v4944_v13 = vpop.f32.mrf.mxu1 }
 0x172   :  { %vm1289_vm10 = vmand %vm1017_vm9, %vm1161_vm5  ;;  %2730 = vmatpush.msk.msrb.mxu2 %vm4886_vm8, %v5485_v10  ;;  %vm969_vm8 = vcmp.ge.s32.totalorder %v4783_v26, %v3733_v24  ;;  %v4942_v12 = vpop.f32.mrf.mxu0 }
 0x173   :  { %vm5593_vm15 = vmmov %vm5592_vm7  ;;  %2741 = vmatpush.msk.msrb.mxu3 %vm1289_vm10, %v5485_v10  ;;  %vm1096_vm10 = vcmp.lt.s32.totalorder %v4772_v3, %v3782_v35 }
 0x174   :  { %2661 = vmatmul.msk.f32.gmra.mxu3 %vm5593_vm15, %v4290_v33  ;;  %vm1272_vm0 = vmand %vm1000_vm14, %vm1144_vm3  ;;  %vm1112_vm15 = vcmp.lt.s32.totalorder %v4772_v3, %v3735_v25 }
 0x175   :  { %vm5594_vm13 = vmmov %vm5592_vm7  ;;  %2731 = vmatpush.msk.msrb.mxu2 %vm1272_vm0, %v5485_v10  ;;  %vm1097_vm0 = vcmp.lt.s32.totalorder %v4783_v26, %v3782_v35 }
 0x176   :  { %2716 = vmatmul.msk.f32.gmra.mxu0 %vm5594_vm13, %v4290_v33  ;;  %vm5595_vm9 = vmmov %vm5592_vm7  ;;  %vm968_vm7 = vcmp.ge.s32.totalorder %v4772_v3, %v3733_v24  ;;  %vm1080_vm13 = vcmp.lt.s32.totalorder %v4772_v3, %v3834_v47  ;;  %v4978_v24 = vpop.f32.mrf.mxu2 }
 0x177   :  { %2727 = vmatmul.msk.f32.gmra.mxu1 %vm5595_vm9, %v4290_v33  ;;  %vm1273_vm5 = vmand %vm1001_vm11, %vm1145_vm1  ;;  %vm1113_vm11 = vcmp.lt.s32.totalorder %v4783_v26, %v3735_v25  ;;  %vm952_vm1 = vcmp.ge.s32.totalorder %v4772_v3, %v3754_v30  ;;  %v4980_v25 = vpop.f32.mrf.mxu3 }
 0x178   :  { %vm1256_vm14 = vmand %vm984_vm6, %vm1128_vm4  ;;  %2742 = vmatpush.msk.msrb.mxu3 %vm1273_vm5, %v5485_v10  ;;  %vm953_vm4 = vcmp.ge.s32.totalorder %v4783_v26, %v3754_v30 }
 0x179   :  { %vm1257_vm3 = vmand %vm985_vm12, %vm1129_vm2  ;;  %2732 = vmatpush.msk.msrb.mxu2 %vm1256_vm14, %v5485_v10  ;;  %vm936_vm2 = vcmp.ge.s32.totalorder %v4772_v3, %v3794_v37  ;;  %v4992_v35 = vpop.f32.mrf.mxu1 }
 0x17a   :  { %2743 = vmatpush.msk.msrb.mxu3 %vm1257_vm3, %v5485_v10  ;;  %vm1240_vm6 = vmand %vm968_vm7, %vm1112_vm15  ;;  %2651 = vmatmul.msk.f32.gmra.mxu2 %vm5595_vm9, %v4394_v43  ;;  %vm937_vm3 = vcmp.ge.s32.totalorder %v4783_v26, %v3794_v37  ;;  %vm1081_vm7 = vcmp.lt.s32.totalorder %v4783_v26, %v3834_v47  ;;  %v4990_v30 = vpop.f32.mrf.mxu0  ;;  %5602 = vst [vmem:[#allocation8_spill] sm:$0xff] %v4992_v35 }
 0x17b   :  { %vm1241_vm12 = vmand %vm969_vm8, %vm1113_vm11  ;;  %2733 = vmatpush.msk.msrb.mxu2 %vm1240_vm6, %v5485_v10  ;;  %vm1065_vm6 = vcmp.lt.s32.totalorder %v4783_v26, %v3838_v49  ;;  %5601 = vst [vmem:[#allocation7_spill] sm:$0xff] %v4990_v30 }
 0x17c   :  { %vm5596_vm5 = vmmov %vm5595_vm9  ;;  %2744 = vmatpush.msk.msrb.mxu3 %vm1241_vm12, %v5485_v10  ;;  %vm1064_vm9 = vcmp.lt.s32.totalorder %v4772_v3, %v3838_v49 }
 0x17d   :  { %2662 = vmatmul.msk.f32.gmra.mxu3 %vm5596_vm5, %v4394_v43  ;;  %vm4960_vm14 = vmand %vm952_vm1, %vm1096_vm10  ;;  %vm920_vm10 = vcmp.ge.s32.totalorder %v4772_v3, %v3821_v45 }
 0x17e   :  { %vm5599_vm15 = vmmov %vm5596_vm5  ;;  %2734 = vmatpush.msk.msrb.mxu2 %vm4960_vm14, %v5485_v10  ;;  %v5002_v37 = vpop.f32.mrf.mxu2 }
 0x17f   :  { %2717 = vmatmul.msk.f32.gmra.mxu0 %vm5599_vm15, %v4394_v43  ;;  %vm5600_vm8 = vmmov %vm5596_vm5  ;;  %vm921_vm15 = vcmp.ge.s32.totalorder %v4783_v26, %v3821_v45  ;;  %5605 = vst [vmem:[#allocation9_spill] sm:$0xff] %v5002_v37  ;;  %v5004_v45 = vpop.f32.mrf.mxu3  ;;  %v5631_v37 = vmov 1.0  }
 0x180   :  { %2728 = vmatmul.msk.f32.gmra.mxu1 %vm5600_vm8, %v4394_v43  ;;  %vm1225_vm11 = vmand %vm953_vm4, %vm1097_vm0  ;;  %5606 = vst [vmem:[#allocation10_spill] sm:$0xff] %v5004_v45  ;;  %v2042_v45 = vadd.s32 96, %v3613_v54 }
 0x181   :  { %vm1208_vm1 = vmand %vm936_vm2, %vm1080_vm13  ;;  %2745 = vmatpush.msk.msrb.mxu3 %vm1225_vm11, %v5485_v10  ;;  %v5008_v49 = vpop.f32.mrf.mxu1 }
 0x182   :  { %vm1209_vm5 = vmand %vm937_vm3, %vm1081_vm7  ;;  %2735 = vmatpush.msk.msrb.mxu2 %vm1208_vm1, %v5485_v10  ;;  %v5006_v47 = vpop.f32.mrf.mxu0 }
 0x183   :  { %vm1192_vm4 = vmand %vm920_vm10, %vm1064_vm9  ;;  %2746 = vmatpush.msk.msrb.mxu3 %vm1209_vm5, %v5485_v10 }
 0x184   :  { %vm1193_vm0 = vmand %vm921_vm15, %vm1065_vm6  ;;  %2736 = vmatpush.msk.msrb.mxu2 %vm1192_vm4, %v5485_v10 }
 0x185   :  { %vm5603_vm12 = vmmov %vm5600_vm8  ;;  %2747 = vmatpush.msk.msrb.mxu3 %vm1193_vm0, %v5485_v10 }
 0x186   :  { %2693 = vmatmul.msk.f32.vlgmr.msra.gmra.mxu2 %vm5603_vm12, %v4211_v16  ;;  %vm5604_vm2 = vmmov %vm5600_vm8  ;;  %v5014_v28 = vpop.f32.mrf.mxu2 }
 0x187   :  { %2704 = vmatmul.msk.f32.vlgmr.msra.gmra.mxu3 %vm5604_vm2, %v4211_v16  ;;  %vm5607_vm13 = vmmov %vm5604_vm2  ;;  %v5016_v29 = vpop.f32.mrf.mxu3 }
 0x188   :  { %vm5608_vm14 = vmmov %vm5604_vm2 }
 0x189   :  { %v5020_v34 = vpop.f32.mrf.mxu1  ;;  %vm5609_vm3 = vmmov %vm5604_vm2 }
 0x18a   :  { %v5018_v32 = vpop.f32.mrf.mxu0  ;;  %vm5610_vm7 = vmmov %vm5604_vm2 }
 0x18b   :  { %vm5613_vm8 = vmmov %vm5604_vm2 }
 0x18c   :  { %vm5614_vm11 = vmmov %vm5604_vm2 }
 0x18d   :  { %vm5617_vm1 = vmmov %vm5604_vm2 }
 0x18e   :  { %2694 = vmatmul.msk.f32.gmra.mxu2 %vm5607_vm13, %v4290_v33  ;;  %v5026_v36 = vpop.f32.mrf.mxu2  ;;  %vm5618_vm10 = vmmov %vm5617_vm1 }
 0x18f   :  { %2705 = vmatmul.msk.f32.gmra.mxu3 %vm5608_vm14, %v4290_v33  ;;  %v5028_v42 = vpop.f32.mrf.mxu3  ;;  %vm5619_vm9 = vmmov %vm5617_vm1 }
 0x190   :  { %vm5620_vm5 = vmmov %vm5617_vm1 }
 0x191   :  { %v5032_v39 = vpop.f32.mrf.mxu1 }
 0x192   :  { %v5030_v38 = vpop.f32.mrf.mxu0  ;;  %5612 = vst [vmem:[#allocation12_spill] sm:$0xff] %v5032_v39 }
 0x193   :  { %5611 = vst [vmem:[#allocation11_spill] sm:$0xff] %v5030_v38 }
 0x196   :  { %2695 = vmatmul.msk.f32.gmra.mxu2 %vm5609_vm3, %v4394_v43  ;;  %v5038_v41 = vpop.f32.mrf.mxu2 }
 0x197   :  { %2706 = vmatmul.msk.f32.gmra.mxu3 %vm5610_vm7, %v4394_v43  ;;  %5615 = vst [vmem:[#allocation13_spill] sm:$0xff] %v5038_v41  ;;  %v5040_v14 = vpop.f32.mrf.mxu3  ;;  %v5117_v41 = vadd.s32 64, %v3613_v54 }
 0x198   :  { %5616 = vst [vmem:[#allocation14_spill] sm:$0xff] %v5040_v14 }
 0x199   :  { %v1486_v44 = vpop.f32.mrf.mxu1 }
 0x19a   :  { %v1460_v0 = vpop.f32.mrf.mxu0  ;;  %v5046_v40 = vmul.f32 %v1486_v44, %v4703_v52 }
 0x19b   :  { %v5043_v21 = vmul.f32 %v1460_v0, %v4701_v51 }
 0x19e   :  { %2737 = vmatmul.msk.f32.vlgmr.msrb.gmra.mxu2 %vm5613_vm8, %v4211_v16  ;;  %v5052_v3 = vpop.f32.mrf.mxu2 }
 0x19f   :  { %2748 = vmatmul.msk.f32.vlgmr.msrb.gmra.mxu3 %vm5614_vm11, %v4211_v16  ;;  %v5054_v16 = vpop.f32.mrf.mxu3 }
 0x1a1   :  { %v1489_v26 = vpop.f32.mrf.mxu1 }
 0x1a2   :  { %v1463_v18 = vpop.f32.mrf.mxu0  ;;  %v5060_v51 = vmul.f32 %v1489_v26, %v4759_v2 }
 0x1a3   :  { %v5057_v6 = vmul.f32 %v1463_v18, %v4757_v62 }
 0x1a6   :  { %2738 = vmatmul.msk.f32.gmra.mxu2 %vm5617_vm1, %v4290_v33  ;;  %v5066_v52 = vpop.f32.mrf.mxu2 }
 0x1a7   :  { %2749 = vmatmul.msk.f32.gmra.mxu3 %vm5618_vm10, %v4290_v33  ;;  %v5068_v33 = vpop.f32.mrf.mxu3 }
 0x1a9   :  { %v1492_v9 = vpop.f32.mrf.mxu1 }
 0x1aa   :  { %v1466_v8 = vpop.f32.mrf.mxu0  ;;  %v5074_v62 = vmul.f32 %v1492_v9, %v4852_v23 }
 0x1ab   :  { %v5071_v15 = vmul.f32 %v1466_v8, %v4850_v22 }
 0x1ac   :  { %5622 = vst [vmem:[#allocation16_spill] sm:$0xff] %v5074_v62 }
 0x1ad   :  { %5621 = vst [vmem:[#allocation15_spill] sm:$0xff] %v5071_v15  ;;  %v1959_v15 = vadd.s32 120, %v3592_v48 }
 0x1ae   :  { %2739 = vmatmul.msk.f32.gmra.mxu2 %vm5619_vm9, %v4394_v43  ;;  %v5076_v2 = vpop.f32.mrf.mxu2 }
 0x1af   :  { %2750 = vmatmul.msk.f32.gmra.mxu3 %vm5620_vm5, %v4394_v43  ;;  %5623 = vst [vmem:[#allocation17_spill] sm:$0xff] %v5076_v2  ;;  %v5078_v20 = vpop.f32.mrf.mxu3  ;;  %vm1975_vm15 = vcmp.eq.s32.totalorder %v1959_v15, %v3613_v54  ;;  %vm2025_vm0 = vcmp.eq.s32.totalorder %v1959_v15, %v5117_v41  ;;  %v1957_v2 = vadd.s32 104, %v3592_v48  ;;  %vm2058_vm2 = vcmp.eq.s32.totalorder %v1959_v15, %v2042_v45 }
 0x1b0   :  { %5624 = vst [vmem:[#allocation18_spill] sm:$0xff] %v5078_v20  ;;  %v1958_v20 = vadd.s32 112, %v3592_v48 }
 0x1b1   :  { %v5098_v26 = vpop.f32.mrf.mxu1  ;;  %vm1973_vm1 = vcmp.eq.s32.totalorder %v1957_v2, %v3613_v54  ;;  %vm2023_vm5 = vcmp.eq.s32.totalorder %v1957_v2, %v5117_v41 }
 0x1b2   :  { %v5096_v18 = vpop.f32.mrf.mxu0  ;;  %vm1974_vm13 = vcmp.eq.s32.totalorder %v1958_v20, %v3613_v54  ;;  %vm2024_vm7 = vcmp.eq.s32.totalorder %v1958_v20, %v5117_v41  ;;  %vm2057_vm8 = vcmp.eq.s32.totalorder %v1958_v20, %v2042_v45 }
 0x1b6   :  { %v5080_v57 = vpop.f32.mrf.mxu2 }
 0x1b7   :  { %v5082_v1 = vpop.f32.mrf.mxu3 }
 0x1b9   :  { %v5106_v62 = vpop.f32.mrf.mxu1 }
 0x1ba   :  { %v5104_v10 = vpop.f32.mrf.mxu0 }
 0x1be   :  { %v5084_v43 = vpop.f32.mrf.mxu2 }
 0x1bf   :  { %v5086_v19 = vpop.f32.mrf.mxu3 }
 0x1c6   :  { %v5088_v0 = vpop.f32.mrf.mxu2 }
 0x1c7   :  { %5625 = vst [vmem:[#allocation19_spill] sm:$0xff] %v5088_v0  ;;  %v5090_v44 = vpop.f32.mrf.mxu3 }
 0x1c8   :  { %5626 = vst [vmem:[#allocation20_spill] sm:$0xff] %v5090_v44  ;;  %v5110_v44 = vadd.s32 32, %v3613_v54 }
 0x1ca   :  { %vm1992_vm6 = vcmp.eq.s32.totalorder %v1959_v15, %v5110_v44  ;;  %vm1991_vm3 = vcmp.eq.s32.totalorder %v1958_v20, %v5110_v44  ;;  %vm1990_vm10 = vcmp.eq.s32.totalorder %v1957_v2, %v5110_v44  ;;  %v1956_v15 = vadd.s32 96, %v3592_v48 }
 0x1cb   :  { %vm2008_vm4 = vmor %vm1975_vm15, %vm1992_vm6  ;;  %vm2056_vm6 = vcmp.eq.s32.totalorder %v1957_v2, %v2042_v45  ;;  %v1955_v20 = vadd.s32 88, %v3592_v48  ;;  %v1953_v2 = vadd.s32 72, %v3592_v48 }
 0x1cc   :  { %vm2041_vm12 = vmor %vm2008_vm4, %vm2025_vm0  ;;  %vm1972_vm0 = vcmp.eq.s32.totalorder %v1956_v15, %v3613_v54 }
 0x1cd   :  { %vm2074_vm14 = vmor %vm2041_vm12, %vm2058_vm2  ;;  %vm1989_vm12 = vcmp.eq.s32.totalorder %v1956_v15, %v5110_v44 }
 0x1ce   :  { %v5092_v22 = vpop.f32.mrf.mxu2  ;;  %2751 = vmatpush.msk.msrb.mxu0 %vm2074_vm14, %v5631_v37  ;;  %vm2007_vm11 = vmor %vm1974_vm13, %vm1991_vm3  ;;  %vm2022_vm13 = vcmp.eq.s32.totalorder %v1956_v15, %v5117_v41  ;;  %vm2055_vm3 = vcmp.eq.s32.totalorder %v1956_v15, %v2042_v45 }
 0x1cf   :  { %v5094_v23 = vpop.f32.mrf.mxu3  ;;  %vm2040_vm9 = vmor %vm2007_vm11, %vm2024_vm7  ;;  %vm1988_vm11 = vcmp.eq.s32.totalorder %v1955_v20, %v5110_v44 }
 0x1d0   :  { %vm2073_vm15 = vmor %vm2040_vm9, %vm2057_vm8  ;;  %vm1971_vm8 = vcmp.eq.s32.totalorder %v1955_v20, %v3613_v54 }
 0x1d1   :  { %2752 = vmatpush.msk.msrb.mxu0 %vm2073_vm15, %v5631_v37  ;;  %vm2006_vm4 = vmor %vm1973_vm1, %vm1990_vm10  ;;  %vm2021_vm10 = vcmp.eq.s32.totalorder %v1955_v20, %v5117_v41 }
 0x1d2   :  { %vm2039_vm2 = vmor %vm2006_vm4, %vm2023_vm5 }
 0x1d3   :  { %vm2072_vm14 = vmor %vm2039_vm2, %vm2056_vm6  ;;  %vm1986_vm2 = vcmp.eq.s32.totalorder %v1953_v2, %v5110_v44 }
 0x1d4   :  { %2753 = vmatpush.msk.msrb.mxu0 %vm2072_vm14, %v5631_v37  ;;  %vm2005_vm7 = vmor %vm1972_vm0, %vm1989_vm12  ;;  %vm1969_vm12 = vcmp.eq.s32.totalorder %v1953_v2, %v3613_v54  ;;  %vm2019_vm14 = vcmp.eq.s32.totalorder %v1953_v2, %v5117_v41 }
 0x1d5   :  { %vm2038_vm1 = vmor %vm2005_vm7, %vm2022_vm13  ;;  %vm1968_vm7 = vcmp.eq.s32.totalorder %v1952_v59, %v3613_v54 }
 0x1d6   :  { %v5100_v8 = vpop.f32.mrf.mxu2  ;;  %vm2071_vm9 = vmor %vm2038_vm1, %vm2055_vm3  ;;  %vm2018_vm1 = vcmp.eq.s32.totalorder %v1952_v59, %v5117_v41 }
 0x1d7   :  { %v5102_v9 = vpop.f32.mrf.mxu3  ;;  %2754 = vmatpush.msk.msrb.mxu0 %vm2071_vm9, %v5631_v37  ;;  %vm2004_vm6 = vmor %vm1971_vm8, %vm1988_vm11  ;;  %vm1985_vm8 = vcmp.eq.s32.totalorder %v1952_v59, %v5110_v44  ;;  %vm1967_vm9 = vcmp.eq.s32.totalorder %v3611_v53, %v3613_v54 }
 0x1d8   :  { %vm2037_vm0 = vmor %vm2004_vm6, %vm2021_vm10  ;;  %vm1984_vm6 = vcmp.eq.s32.totalorder %v3611_v53, %v5110_v44 }
 0x1d9   :  { %2755 = vmatpush.msk.msrb.mxu0 %vm2037_vm0, %v5631_v37  ;;  %vm2002_vm11 = vmor %vm1969_vm12, %vm1986_vm2  ;;  %vm1965_vm2 = vcmp.eq.s32.totalorder %v3635_v63, %v3613_v54 }
 0x1da   :  { %vm2035_vm10 = vmor %vm2002_vm11, %vm2019_vm14 }
 0x1db   :  { %vm2000_vm12 = vmor %vm1967_vm9, %vm1984_vm6  ;;  %vm1961_vm9 = vcmp.eq.s32.totalorder %v3757_v31, %v3613_v54  ;;  %vm1960_vm6 = vcmp.eq.s32.totalorder %v3592_v48, %v3613_v54 }
 0x1e0   :  { %v5112_v0 = vpop.f32.mrf.mxu2 }
 0x1e1   :  { %5627 = vst [vmem:[#allocation21_spill] sm:$0xff] %v5112_v0  ;;  %v5128_v0 = vpop.f32.mrf.mxu1 }
 0x1e2   :  { %v5114_v14 = vpop.f32.mrf.mxu3  ;;  %5630 = vst [vmem:[#allocation24_spill] sm:$0xff] %v5128_v0  ;;  %v1954_v0 = vadd.s32 80, %v3592_v48  ;;  %v2769_v48 = vld [vmem:[%s5479_s8 + $0x30] sm:$0xff] }
 0x1e3   :  { %5628 = vst [vmem:[#allocation22_spill] sm:$0xff] %v5114_v14  ;;  %v5126_v14 = vpop.f32.mrf.mxu0 }
 0x1e4   :  { %5629 = vst [vmem:[#allocation23_spill] sm:$0xff] %v5126_v14  ;;  %vm1970_vm5 = vcmp.eq.s32.totalorder %v1954_v0, %v3613_v54  ;;  %vm1987_vm15 = vcmp.eq.s32.totalorder %v1954_v0, %v5110_v44  ;;  %vm2020_vm4 = vcmp.eq.s32.totalorder %v1954_v0, %v5117_v41 }
 0x1e5   :  { %vm2003_vm13 = vmor %vm1970_vm5, %vm1987_vm15  ;;  %vm1966_vm15 = vcmp.eq.s32.totalorder %v3617_v56, %v3613_v54 }
 0x1e6   :  { %vm2036_vm3 = vmor %vm2003_vm13, %vm2020_vm4  ;;  %vm1983_vm4 = vcmp.eq.s32.totalorder %v3617_v56, %v5110_v44  ;;  %vm1982_vm13 = vcmp.eq.s32.totalorder %v3635_v63, %v5110_v44 }
 0x1e7   :  { %2756 = vmatpush.msk.msrb.mxu0 %vm2036_vm3, %v5631_v37  ;;  %vm2001_vm5 = vmor %vm1968_vm7, %vm1985_vm8  ;;  %vm1964_vm3 = vcmp.eq.s32.totalorder %v3673_v7, %v3613_v54  ;;  %vm1981_vm7 = vcmp.eq.s32.totalorder %v3673_v7, %v5110_v44 }
 0x1e8   :  { %vm2034_vm0 = vmor %vm2001_vm5, %vm2018_vm1  ;;  %vm1963_vm1 = vcmp.eq.s32.totalorder %v3688_v11, %v3613_v54  ;;  %vm2128_vm5 = vcmask 261120  }
 0x1e9   :  { %v5156_v15 = vpop.f32.mrf.mxu1  ;;  %2757 = vmatpush.msk.msrb.mxu0 %vm2035_vm10, %v5631_v37  ;;  %vm1999_vm14 = vmor %vm1966_vm15, %vm1983_vm4  ;;  %vm1962_vm10 = vcmp.eq.s32.totalorder %v3706_v17, %v3613_v54  ;;  %vm2470_vm15 = vcmask 254976  }
 0x1ea   :  { %v5137_v35 = vpop.f32.mrf.mxu2  ;;  %vm1998_vm8 = vmor %vm1965_vm2, %vm1982_vm13 }
 0x1eb   :  { %v5154_v45 = vpop.f32.mrf.mxu0  ;;  %2758 = vmatpush.msk.msrb.mxu0 %vm2034_vm0, %v5631_v37  ;;  %vm1997_vm11 = vmor %vm1964_vm3, %vm1981_vm7 }
 0x1ed   :  { %v5139_v30 = vpop.f32.mrf.mxu3  ;;  %2759 = vmatpush.msk.msrb.mxu0 %vm2000_vm12, %v5631_v37 }
 0x1ef   :  { %2760 = vmatpush.msk.msrb.mxu0 %vm1999_vm14, %v5631_v37 }
 0x1f1   :  { %v5193_v0 = vpop.f32.mrf.mxu1  ;;  %2761 = vmatpush.msk.msrb.mxu0 %vm1998_vm8, %v5631_v37 }
 0x1f3   :  { %v5191_v41 = vpop.f32.mrf.mxu0  ;;  %2762 = vmatpush.msk.msrb.mxu0 %vm1997_vm11, %v5631_v37 }
 0x1f4   :  { %v5161_v39 = vpop.f32.mrf.mxu2 }
 0x1f5   :  { %2763 = vmatpush.msk.msrb.mxu0 %vm1963_vm1, %v5631_v37 }
 0x1f7   :  { %v5163_v38 = vpop.f32.mrf.mxu3  ;;  %2764 = vmatpush.msk.msrb.mxu0 %vm1962_vm10, %v5631_v37 }
 0x1f9   :  { %v5212_v44 = vpop.f32.mrf.mxu1  ;;  %2765 = vmatpush.msk.msrb.mxu0 %vm1961_vm9, %v5631_v37 }
 0x1fa   :  { %5635 = vst [vmem:[#allocation28_spill] sm:$0xff] %v5212_v44  ;;  %v2781_v44 = vld [vmem:[%s5479_s8 + $0x78] sm:$0xff] }
 0x1fb   :  { %v5210_v7 = vpop.f32.mrf.mxu0  ;;  %2766 = vmatpush.msk.msrb.mxu0 %vm1960_vm6, %v5631_v37  ;;  %2222 = vmatpush.msra.mxu2 %v2781_v44  ;;  %v1868_v44 = vmul.f32 %v5156_v15, %v4878_v27 }
 0x1fc   :  { %5634 = vst [vmem:[#allocation27_spill] sm:$0xff] %v5210_v7 }
 0x1fd   :  { %v5187_v53 = vpop.f32.mrf.mxu2 }
 0x1fe   :  { %5632 = vst [vmem:[#allocation25_spill] sm:$0xff] %v5187_v53  ;;  %v2770_v53 = vld [vmem:[%s5479_s8 + $0x38] sm:$0xff] }
 0x1ff   :  { %2143 = vmatpush.msrb.mxu1 %v2770_v53  ;;  %v1863_v53 = vmul.f32 %v5096_v18, %v4656_v46  ;;  %v2767_v46 = vld [vmem:[%s5479_s8 + $0x20] sm:$0xff] }
 0x200   :  { %v5189_v59 = vpop.f32.mrf.mxu3 }
 0x201   :  { %5633 = vst [vmem:[#allocation26_spill] sm:$0xff] %v5189_v59  ;;  %v1798_v2 = vpop.f32.mrf.mxu1  ;;  %2144 = vmatpush.msrb.mxu1 %v2769_v48 }
 0x202   :  { %v1872_v37 = vmul.f32 %v1798_v2, %v5008_v49  ;;  %v2785_v49 = vld [vmem:[%s5479_s8 + $0x90] sm:$0xff]  ;;  %v1867_v2 = vmul.f32 %v5154_v45, %v4876_v58  ;;  %v1862_v58 = vmul.f32 %v5094_v23, %v4926_v5 }
 0x203   :  { %v1772_v20 = vpop.f32.mrf.mxu0 }
 0x204   :  { %v1871_v54 = vmul.f32 %v1772_v20, %v5006_v47  ;;  %v2780_v47 = vld [vmem:[%s5479_s8 + $0x70] sm:$0xff]  ;;  %v1864_v20 = vmul.f32 %v5098_v26, %v4658_v50  ;;  %v1861_v50 = vmul.f32 %v5092_v22, %v4924_v4  ;;  %v1907_v4 = vadd.f32 %v1867_v2, %v5043_v21 }
 0x205   :  { %2223 = vmatpush.msra.mxu2 %v2780_v47  ;;  %v1908_v22 = vadd.f32 %v1868_v44, %v5046_v40  ;;  %v1880_v21 = vmul.f32 %v5106_v62, %v4723_v60  ;;  %v5639_v47 = vld [vmem:[#allocation23_spill] sm:$0xff] }
 0x206   :  { %v1911_v27 = vadd.f32 %v1871_v54, %v1863_v53  ;;  %v1912_v18 = vadd.f32 %v1872_v37, %v1864_v20  ;;  %v5641_v53 = vld [vmem:[#allocation12_spill] sm:$0xff] }
 0x209   :  { %v1720_v56 = vpop.f32.mrf.mxu2  ;;  %v1801_v7 = vpop.f32.mrf.mxu1 }
 0x20a   :  { %v1746_v63 = vpop.f32.mrf.mxu3  ;;  %v1869_v14 = vmul.f32 %v1720_v56, %v5052_v3  ;;  %v1865_v3 = vmul.f32 %v5137_v35, %v5014_v28  ;;  %v1931_v28 = vadd.f32 %v1911_v27, %v1907_v4  ;;  %v5646_v27 = vld [vmem:[#allocation8_spill] sm:$0xff] }
 0x20b   :  { %v1870_v61 = vmul.f32 %v1746_v63, %v5054_v16  ;;  %v1866_v16 = vmul.f32 %v5139_v30, %v5016_v29  ;;  %v1888_v30 = vmul.f32 %v1801_v7, %v5020_v34  ;;  %v1932_v29 = vadd.f32 %v1912_v18, %v1908_v22  ;;  %v5647_v18 = vld [vmem:[#allocation28_spill] sm:$0xff]  ;;  %v5652_v22 = vld [vmem:[#allocation18_spill] sm:$0xff] }
 0x20c   :  { %v1909_v5 = vadd.f32 %v1869_v14, %v1861_v50  ;;  %v1883_v14 = vmul.f32 %v5191_v41, %v4942_v12  ;;  %v1878_v7 = vmul.f32 %v5102_v9, %v4980_v25  ;;  %v1881_v12 = vmul.f32 %v5161_v39, %v5026_v36  ;;  %v5638_v39 = vld [vmem:[#allocation5_spill] sm:$0xff]  ;;  %v5645_v50 = vld [vmem:[#allocation27_spill] sm:$0xff] }
 0x20d   :  { %v1910_v23 = vadd.f32 %v1870_v61, %v1862_v58  ;;  %v1884_v61 = vmul.f32 %v5193_v0, %v4944_v13  ;;  %v1920_v60 = vadd.f32 %v1888_v30, %v1880_v21  ;;  %v1882_v13 = vmul.f32 %v5163_v38, %v5028_v42  ;;  %v5640_v42 = vld [vmem:[#allocation11_spill] sm:$0xff] }
 0x20f   :  { %v1916_v25 = vadd.f32 %v1884_v61, %v5060_v51  ;;  %v5644_v51 = vld [vmem:[#allocation7_spill] sm:$0xff] }
 0x210   :  { %v1899_v58 = vmul.f32 %v5645_v50, %v5644_v51  ;;  %v2800_v51 = vld [vmem:[%s5479_s8 + $0xf0] sm:$0xff] }
 0x211   :  { %v1723_v11 = vpop.f32.mrf.mxu2  ;;  %v2805_v50 = vld [vmem:[%s5479_s8 + $0x110] sm:$0xff] }
 0x212   :  { %v1749_v17 = vpop.f32.mrf.mxu3 }
 0x219   :  { %v5219_v59 = vpop.f32.mrf.mxu2 }
 0x21a   :  { %5636 = vst [vmem:[#allocation29_spill] sm:$0xff] %v5219_v59  ;;  %v5221_v31 = vpop.f32.mrf.mxu3  ;;  %v2768_v59 = vld [vmem:[%s5479_s8 + $0x28] sm:$0xff] }
 0x21b   :  { %5637 = vst [vmem:[#allocation30_spill] sm:$0xff] %v5221_v31  ;;  %v2786_v31 = vld [vmem:[%s5479_s8 + $0x98] sm:$0xff]  ;;  %2145 = vmatpush.msrb.mxu1 %v2768_v59  ;;  %v1879_v59 = vmul.f32 %v5104_v10, %v4721_v55  ;;  %v1877_v10 = vmul.f32 %v5100_v8, %v4978_v24  ;;  %v1885_v55 = vmul.f32 %v1723_v11, %v5066_v52  ;;  %v1804_v8 = vpop.f32.mrf.mxu1 }
 0x21c   :  { %2251 = vmatpush.msra.mxu3 %v2786_v31  ;;  %v1775_v31 = vpop.f32.mrf.mxu0  ;;  %v1915_v11 = vadd.f32 %v1883_v14, %v5057_v6  ;;  %v1904_v20 = vmul.f32 %v1804_v8, %v5641_v53  ;;  %v5643_v6 = vld [vmem:[#allocation24_spill] sm:$0xff]  ;;  %v2784_v53 = vld [vmem:[%s5479_s8 + $0x88] sm:$0xff] }
 0x21d   :  { %2146 = vmatpush.msrb.mxu1 %v2767_v46  ;;  %v1887_v35 = vmul.f32 %v1775_v31, %v5018_v32  ;;  %v1886_v32 = vmul.f32 %v1749_v17, %v5068_v33  ;;  %v1917_v9 = vadd.f32 %v1885_v55, %v1877_v10  ;;  %v5642_v31 = vld [vmem:[#allocation6_spill] sm:$0xff] }
 0x21e   :  { %2252 = vmatpush.msra.mxu3 %v2785_v49  ;;  %v1895_v49 = vmul.f32 %v5639_v47, %v5638_v39  ;;  %v1896_v46 = vmul.f32 %v5643_v6, %v5642_v31  ;;  %v5658_v10 = vld [vmem:[#allocation14_spill] sm:$0xff]  ;;  %v2778_v47 = vld [vmem:[%s5479_s8 + $0x60] sm:$0xff]  ;;  %v2806_v31 = vld [vmem:[%s5479_s8 + $0x118] sm:$0xff] }
 0x21f   :  { %v1919_v54 = vadd.f32 %v1887_v35, %v1879_v59  ;;  %v1918_v17 = vadd.f32 %v1886_v32, %v1878_v7  ;;  %v5654_v59 = vld [vmem:[#allocation10_spill] sm:$0xff]  ;;  %v5661_v7 = vld [vmem:[#allocation20_spill] sm:$0xff]  ;;  %2367 = vmatpush.msra.mxu0 %v2806_v31 }
 0x220   :  { %v5655_v35 = vld [vmem:[#allocation22_spill] sm:$0xff]  ;;  %2253 = vmatpush.msra.mxu3 %v2784_v53  ;;  %v2793_v6 = vld [vmem:[%s5479_s8 + $0xc0] sm:$0xff] }
 0x221   :  { %v1824_v26 = vpop.f32.mrf.mxu2  ;;  %v1935_v2 = vadd.f32 %v1919_v54, %v1915_v11  ;;  %v1894_v30 = vmul.f32 %v5655_v35, %v5654_v59  ;;  %v5659_v55 = vld [vmem:[#allocation26_spill] sm:$0xff]  ;;  %2368 = vmatpush.msra.mxu0 %v2805_v50 }
 0x222   :  { %v1850_v45 = vpop.f32.mrf.mxu3  ;;  %v1873_v15 = vmul.f32 %v1824_v26, %v5080_v57  ;;  %v1900_v26 = vmul.f32 %v5647_v18, %v5646_v27  ;;  %v1898_v32 = vmul.f32 %v5659_v55, %v5658_v10  ;;  %v2779_v39 = vld [vmem:[%s5479_s8 + $0x68] sm:$0xff]  ;;  %v2798_v18 = vld [vmem:[%s5479_s8 + $0xe0] sm:$0xff] }
 0x223   :  { %v1874_v56 = vmul.f32 %v1850_v45, %v5082_v1  ;;  %v5648_v45 = vld [vmem:[#allocation9_spill] sm:$0xff]  ;;  %2224 = vmatpush.msra.mxu2 %v2779_v39 }
 0x224   :  { %v1913_v63 = vadd.f32 %v1873_v15, %v1865_v3  ;;  %v1778_v24 = vpop.f32.mrf.mxu0  ;;  %v5649_v3 = vld [vmem:[#allocation21_spill] sm:$0xff] }
 0x225   :  { %v1914_v48 = vadd.f32 %v1874_v56, %v1866_v16  ;;  %v1903_v38 = vmul.f32 %v1778_v24, %v5640_v42  ;;  %v1893_v16 = vmul.f32 %v5649_v3, %v5648_v45  ;;  %v5650_v15 = vld [vmem:[#allocation17_spill] sm:$0xff]  ;;  %2225 = vmatpush.msra.mxu2 %v2778_v47  ;;  %v2796_v42 = vld [vmem:[%s5479_s8 + $0xd8] sm:$0xff] }
 0x226   :  { %v1933_v57 = vadd.f32 %v1913_v63, %v1909_v5  ;;  %v5651_v56 = vld [vmem:[#allocation29_spill] sm:$0xff]  ;;  %v5653_v5 = vld [vmem:[#allocation30_spill] sm:$0xff] }
 0x227   :  { %v1934_v1 = vadd.f32 %v1914_v48, %v1910_v23  ;;  %v1901_v4 = vmul.f32 %v5651_v56, %v5650_v15  ;;  %v1902_v23 = vmul.f32 %v5653_v5, %v5652_v22  ;;  %2309 = vmatpush.msrb.mxu2 %v2796_v42  ;;  %v2804_v27 = vld [vmem:[%s5479_s8 + $0x108] sm:$0xff]  ;;  %v2776_v15 = vld [vmem:[%s5479_s8 + $0x58] sm:$0xff]  ;;  %v2815_v22 = vld [vmem:[%s5479_s8 + $0x150] sm:$0xff] }
 0x228   :  { %v1943_v34 = vadd.f32 %v1933_v57, %v1931_v28  ;;  %v1927_v28 = vadd.f32 %v1903_v38, %v1895_v49  ;;  %v5656_v57 = vld [vmem:[#allocation13_spill] sm:$0xff]  ;;  %v2120_v49 = vld [vmem:[%s5479_s8 + $0x18] sm:$0xff]  ;;  %v2119_v38 = vld [vmem:[%s5479_s8 + $0x10] sm:$0xff]  ;;  %2369 = vmatpush.msra.mxu0 %v2804_v27 }
 0x229   :  { %v1944_v40 = vadd.f32 %v1934_v1, %v1932_v29  ;;  %v1827_v62 = vpop.f32.mrf.mxu2  ;;  %v1928_v29 = vadd.f32 %v1904_v20, %v1896_v46  ;;  %v5657_v1 = vld [vmem:[#allocation25_spill] sm:$0xff]  ;;  %v1925_v24 = vadd.f32 %v1901_v4, %v1893_v16  ;;  %v1926_v8 = vadd.f32 %v1902_v23, %v1894_v30  ;;  %2165 = vmatpush.msra.mxu1 %v2120_v49  ;;  %v2795_v20 = vld [vmem:[%s5479_s8 + $0xd0] sm:$0xff]  ;;  %v2801_v46 = vld [vmem:[%s5479_s8 + $0xf8] sm:$0xff] }
 0x22a   :  { %v1853_v41 = vpop.f32.mrf.mxu3  ;;  %v1889_v33 = vmul.f32 %v1827_v62, %v5084_v43  ;;  %v1936_v43 = vadd.f32 %v1920_v60, %v1916_v25  ;;  %v1897_v21 = vmul.f32 %v5657_v1, %v5656_v57  ;;  %2310 = vmatpush.msrb.mxu2 %v2795_v20  ;;  %v2816_v56 = vld [vmem:[%s5479_s8 + $0x158] sm:$0xff]  ;;  %v2775_v4 = vld [vmem:[%s5479_s8 + $0x50] sm:$0xff]  ;;  %v2774_v5 = vld [vmem:[%s5479_s8 + $0x48] sm:$0xff] }
 0x22b   :  { %v1949_v52 = vadd.f32 %v1944_v40, %v1943_v34  ;;  %v1890_v0 = vmul.f32 %v1853_v41, %v5086_v19  ;;  %v5660_v34 = vld [vmem:[#allocation19_spill] sm:$0xff]  ;;  %v5663_v41 = vld [vmem:[#allocation16_spill] sm:$0xff]  ;;  %2166 = vmatpush.msra.mxu1 %v2119_v38  ;;  %v2814_v23 = vld [vmem:[%s5479_s8 + $0x148] sm:$0xff] }
 0x22c   :  { %v1921_v37 = vadd.f32 %v1889_v33, %v1881_v12  ;;  %v5662_v12 = vld [vmem:[#allocation15_spill] sm:$0xff]  ;;  %v2819_v1 = vld [vmem:[%s5479_s8 + $0x168] sm:$0xff]  ;;  %v2788_v10 = vld [vmem:[%s5479_s8 + $0xa0] sm:$0xff] }
 0x22d   :  { %v1922_v36 = vadd.f32 %v1890_v0, %v1882_v13  ;;  %2107 = vmatmul.f32.vlgmr.msrb.gmra.mxu0 %v1949_v52  ;;  %v1923_v62 = vadd.f32 %v1899_v58, %v5662_v12  ;;  %v1924_v13 = vadd.f32 %v1900_v26, %v5663_v41  ;;  %v2799_v58 = vld [vmem:[%s5479_s8 + $0xe8] sm:$0xff]  ;;  %v2803_v26 = vld [vmem:[%s5479_s8 + $0x100] sm:$0xff]  ;;  %v2821_v30 = vld [vmem:[%s5479_s8 + $0x178] sm:$0xff] }
 0x22e   :  { %v1937_v44 = vadd.f32 %v1921_v37, %v1917_v9  ;;  %2370 = vmatpush.msra.mxu0 %v2803_v26  ;;  %v2790_v57 = vld [vmem:[%s5479_s8 + $0xb0] sm:$0xff]  ;;  %v2808_v12 = vld [vmem:[%s5479_s8 + $0x120] sm:$0xff] }
 0x22f   :  { %v1938_v19 = vadd.f32 %v1922_v36, %v1918_v17  ;;  %v1939_v0 = vadd.f32 %v1927_v28, %v1923_v62  ;;  %v1940_v11 = vadd.f32 %v1928_v29, %v1924_v13  ;;  %v2791_v28 = vld [vmem:[%s5479_s8 + $0xb8] sm:$0xff]  ;;  %v2820_v29 = vld [vmem:[%s5479_s8 + $0x170] sm:$0xff] }
 0x230   :  { %v1945_v63 = vadd.f32 %v1937_v44, %v1935_v2  ;;  %v2118_v2 = vld [vmem:[%s5479_s8 + $0x8] sm:$0xff] }
 0x231   :  { %v1946_v48 = vadd.f32 %v1938_v19, %v1936_v43  ;;  %v1830_v14 = vpop.f32.mrf.mxu2  ;;  %2167 = vmatpush.msra.mxu1 %v2118_v2  ;;  %v2783_v43 = vld [vmem:[%s5479_s8 + $0x80] sm:$0xff]  ;;  %v2794_v44 = vld [vmem:[%s5479_s8 + $0xc8] sm:$0xff] }
 0x232   :  { %v1856_v61 = vpop.f32.mrf.mxu3  ;;  %v1905_v40 = vmul.f32 %v1830_v14, %v5660_v34  ;;  %2254 = vmatpush.msra.mxu3 %v2783_v43  ;;  %2311 = vmatpush.msrb.mxu2 %v2794_v44  ;;  %v2117_v19 = vld [vmem:[%s5479_s8] sm:$0xff] }
 0x233   :  { %v1906_v54 = vmul.f32 %v1856_v61, %v5661_v7  ;;  %v1950_v60 = vadd.f32 %v1946_v48, %v1945_v63  ;;  %2168 = vmatpush.msra.mxu1 %v2117_v19  ;;  %v2773_v63 = vld [vmem:[%s5479_s8 + $0x40] sm:$0xff]  ;;  %v2810_v7 = vld [vmem:[%s5479_s8 + $0x130] sm:$0xff] }
 0x234   :  { %v1929_v52 = vadd.f32 %v1905_v40, %v1897_v21  ;;  %2312 = vmatpush.msrb.mxu2 %v2793_v6  ;;  %2338 = vmatpush.msrb.mxu3 %v2801_v46  ;;  %v2813_v48 = vld [vmem:[%s5479_s8 + $0x140] sm:$0xff]  ;;  %v2789_v21 = vld [vmem:[%s5479_s8 + $0xa8] sm:$0xff]  ;;  %v2811_v40 = vld [vmem:[%s5479_s8 + $0x138] sm:$0xff] }
 0x235   :  { %v1930_v33 = vadd.f32 %v1906_v54, %v1898_v32  ;;  %2110 = vmatmul.f32.gmra.mxu0 %v1950_v60  ;;  %v2818_v61 = vld [vmem:[%s5479_s8 + $0x160] sm:$0xff]  ;;  %v2809_v54 = vld [vmem:[%s5479_s8 + $0x128] sm:$0xff] }
 0x236   :  { %v1941_v25 = vadd.f32 %v1929_v52, %v1925_v24  ;;  %2339 = vmatpush.msrb.mxu3 %v2800_v51  ;;  %v2826_v44 = vld [vmem:[%s5480_s9] ss:$0 sm:$0xff] }
 0x237   :  { %v1942_v9 = vadd.f32 %v1930_v33, %v1926_v8  ;;  %v2468_v6 = vld [vmem:[%s5473_s2] sm:$0x3] }
 0x238   :  { %v1947_v17 = vadd.f32 %v1941_v25, %v1939_v0  ;;  %2340 = vmatpush.msrb.mxu3 %v2799_v58  ;;  %v2860_v58 = vmov 32.0  }
 0x239   :  { %v1948_v37 = vadd.f32 %v1942_v9, %v1940_v11  ;;  %2829 = vrcp.f32 %v2860_v58 }
 0x23a   :  { %2341 = vmatpush.msrb.mxu3 %v2798_v18 }
 0x23b   :  { %v1951_v36 = vadd.f32 %v1948_v37, %v1947_v17 }
 0x23d   :  { %2113 = vmatmul.f32.gmra.mxu0 %v1951_v36 }
 0x23f   :  { %v2830_v27 = vpop.eup %2829 }
 0x240   :  { %v2475_v18 = vmul.f32 32.0, %v2830_v27  ;;  %vm2479_vm4 = vweird.f32 %v2830_v27 }
 0x242   :  { %v2476_v26 = vsub.f32 1.0, %v2475_v18 }
 0x2aa   :  { %v2108_v45 = vpop.f32.mrf.mxu0 }
 0x2ab   :  { %v2127_v3 = vrot.slane %v2108_v45, 2  ;;  %v2207_v16 = vrot.slane %v2108_v45, 6  ;;  %v2178_v32 = vrot.slane %v2108_v45, 4 }
 0x2ad   :  { %2771 = vmatmul.msk.f32.vlgmr.msrb.gmra.mxu1 %vm2128_vm5, %v2127_v3  ;;  %2782 = vmatmul.msk.f32.vlgmr.msra.gmra.mxu2 %vm2128_vm5, %v2207_v16 }
 0x2ae   :  { %2193 = vmatpush.msrb.mxu1 %v2776_v15  ;;  %2425 = vmatpush.msra.mxu2 %v2816_v56 }
 0x2b0   :  { %2194 = vmatpush.msrb.mxu1 %v2775_v4  ;;  %2426 = vmatpush.msra.mxu2 %v2815_v22 }
 0x2b2   :  { %v2111_v59 = vpop.f32.mrf.mxu0  ;;  %2195 = vmatpush.msrb.mxu1 %v2774_v5  ;;  %2427 = vmatpush.msra.mxu2 %v2814_v23 }
 0x2b3   :  { %v2294_v35 = vrot.slane %v2111_v59, 4  ;;  %2787 = vmatmul.msk.f32.vlgmr.msra.gmra.mxu3 %vm2128_vm5, %v2111_v59  ;;  %v2323_v14 = vrot.slane %v2111_v59, 6  ;;  %v2265_v62 = vrot.slane %v2111_v59, 2 }
 0x2b4   :  { %2196 = vmatpush.msrb.mxu1 %v2773_v63  ;;  %2428 = vmatpush.msra.mxu2 %v2813_v48 }
 0x2b5   :  { %2772 = vmatmul.msk.f32.vlgmr.msra.gmra.mxu1 %vm2128_vm5, %v2108_v45  ;;  %2797 = vmatmul.msk.f32.vlgmr.msrb.gmra.mxu2 %vm2128_vm5, %v2294_v35  ;;  %v2477_v45 = vmul.f32 %v2830_v27, %v2476_v26 }
 0x2b6   :  { %2454 = vmatpush.msra.mxu3 %v2821_v30  ;;  %2280 = vmatpush.msra.mxu1 %v2791_v28 }
 0x2b7   :  { %v2478_v3 = vadd.f32 %v2830_v27, %v2477_v45 }
 0x2b8   :  { %2455 = vmatpush.msra.mxu3 %v2820_v29  ;;  %2281 = vmatpush.msra.mxu1 %v2790_v57 }
 0x2b9   :  { %v2480_v16 = vsel %vm2479_vm4, %v2830_v27, %v2478_v3 }
 0x2ba   :  { %v2114_v55 = vpop.f32.mrf.mxu0  ;;  %2456 = vmatpush.msra.mxu3 %v2819_v1  ;;  %2282 = vmatpush.msra.mxu1 %v2789_v21  ;;  %v2827_v1 = vld [vmem:[%s5481_s10] ss:$0 sm:$0xff] }
 0x2bb   :  { %v2410_v34 = vrot.slane %v2114_v55, 4  ;;  %2802 = vmatmul.msk.f32.vlgmr.msrb.gmra.mxu3 %vm2128_vm5, %v2323_v14  ;;  %2807 = vmatmul.msk.f32.vlgmr.msra.gmra.mxu0 %vm2128_vm5, %v2114_v55  ;;  %v2439_v60 = vrot.slane %v2114_v55, 6  ;;  %v2381_v41 = vrot.slane %v2114_v55, 2 }
 0x2bc   :  { %2457 = vmatpush.msra.mxu3 %v2818_v61  ;;  %2283 = vmatpush.msra.mxu1 %v2788_v10  ;;  %v2828_v61 = vld [vmem:[%s5482_s11] ss:$0 sm:$0xff] }
 0x2bd   :  { %2777 = vmatmul.msk.f32.vlgmr.msrb.gmra.mxu1 %vm2128_vm5, %v2178_v32  ;;  %2817 = vmatmul.msk.f32.vlgmr.msra.gmra.mxu2 %vm2128_vm5, %v2410_v34 }
 0x2be   :  { %2396 = vmatpush.msrb.mxu1 %v2811_v40 }
 0x2c0   :  { %2397 = vmatpush.msrb.mxu1 %v2810_v7 }
 0x2c2   :  { %2398 = vmatpush.msrb.mxu1 %v2809_v54 }
 0x2c3   :  { %2822 = vmatmul.msk.f32.vlgmr.msra.gmra.mxu3 %vm2128_vm5, %v2439_v60 }
 0x2c4   :  { %2399 = vmatpush.msrb.mxu1 %v2808_v12 }
 0x2c5   :  { %2792 = vmatmul.msk.f32.vlgmr.msra.gmra.mxu1 %vm2128_vm5, %v2265_v62 }
 0x2cd   :  { %2812 = vmatmul.msk.f32.vlgmr.msrb.gmra.mxu1 %vm2128_vm5, %v2381_v41 }
 0x32a   :  { %v2148_v13 = vpop.f32.mrf.mxu1 }
 0x330   :  { %v2227_v8 = vpop.f32.mrf.mxu2 }
 0x332   :  { %v2170_v24 = vpop.f32.mrf.mxu1 }
 0x333   :  { %v2171_v52 = vadd.f32 %v2170_v24, %v2148_v13 }
 0x336   :  { %v2256_v33 = vpop.f32.mrf.mxu3 }
 0x338   :  { %v2314_v17 = vpop.f32.mrf.mxu2  ;;  %v2372_v42 = vpop.f32.mrf.mxu0 }
 0x33a   :  { %v2198_v0 = vpop.f32.mrf.mxu1 }
 0x33b   :  { %v2201_v11 = vadd.f32 %v2198_v0, %v2171_v52 }
 0x33d   :  { %v2230_v25 = vadd.f32 %v2227_v8, %v2201_v11 }
 0x33e   :  { %v2343_v39 = vpop.f32.mrf.mxu3 }
 0x33f   :  { %v2259_v9 = vadd.f32 %v2256_v33, %v2230_v25 }
 0x340   :  { %v2430_v2 = vpop.f32.mrf.mxu2 }
 0x342   :  { %v2285_v37 = vpop.f32.mrf.mxu1 }
 0x343   :  { %v2288_v36 = vadd.f32 %v2285_v37, %v2259_v9 }
 0x345   :  { %v2317_v47 = vadd.f32 %v2314_v17, %v2288_v36 }
 0x346   :  { %v2459_v19 = vpop.f32.mrf.mxu3 }
 0x347   :  { %v2346_v49 = vadd.f32 %v2343_v39, %v2317_v47 }
 0x349   :  { %v2375_v38 = vadd.f32 %v2372_v42, %v2346_v49 }
 0x34a   :  { %v2401_v53 = vpop.f32.mrf.mxu1 }
 0x34b   :  { %v2404_v20 = vadd.f32 %v2401_v53, %v2375_v38 }
 0x34d   :  { %v2433_v43 = vadd.f32 %v2430_v2, %v2404_v20 }
 0x34f   :  { %v2462_v31 = vadd.f32 %v2459_v19, %v2433_v43 }
 0x351   :  { %v2467_v46 = vadd.f32 %v2826_v44, %v2462_v31 }
 0x353   :  { %v2469_v51 = vadd.f32 %v2468_v6, %v2467_v46 }
 0x355   :  { %v2471_v50 = vsel %vm2470_vm15, %v2469_v51, 0.0 }
 0x356   :  { %2472 = vadd.xlane.f32.xlu0 %v2471_v50 }
 0x3c9   :  { %v2473_v15 = vpop.xlane.xlu0 %2472 }
 0x3ca   :  { %v2481_v56 = vmul.f32 %v2480_v16, %v2473_v15 }
 0x3cc   :  { %v2482_v4 = vsub.f32 %v2469_v51, %v2481_v56 }
 0x3ce   :  { %v2483_v22 = vmul.f32 %v2482_v4, %v2482_v4 }
 0x3d0   :  { %v2484_v5 = vsel %vm2470_vm15, %v2483_v22, 0.0 }
 0x3d1   :  { %2485 = vadd.xlane.f32.xlu0 %v2484_v5 }
 0x444   :  { %v2486_v23 = vpop.xlane.xlu0 %2485 }
 0x445   :  { %v2487_v63 = vmul.f32 %v2486_v23, %v2480_v16 }
 0x447   :  { %v2488_v48 = vadd.f32 1e-05, %v2487_v63 }
 0x449   :  { %2831 = vrsqrt.f32 %v2488_v48  ;;  %vm2495_vm12 = vweird.f32 %v2488_v48 }
 0x44f   :  { %v2832_v59 = vpop.eup %2831 }
 0x450   :  { %v2490_v35 = vmul.f32 %v2832_v59, %v2488_v48  ;;  %vm2496_vm0 = vweird.f32 %v2832_v59 }
 0x451   :  { %vm2497_vm2 = vmor %vm2495_vm12, %vm2496_vm0 }
 0x452   :  { %v2491_v30 = vmul.f32 %v2832_v59, %v2490_v35 }
 0x454   :  { %v2492_v28 = vmul.f32 0.5, %v2491_v30 }
 0x456   :  { %v2493_v29 = vsub.f32 1.5, %v2492_v28 }
 0x458   :  { %v2494_v57 = vmul.f32 %v2832_v59, %v2493_v29 }
 0x45a   :  { %v2498_v21 = vsel %vm2497_vm2, %v2832_v59, %v2494_v57 }
 0x45b   :  { %v2499_v14 = vmul.f32 %v2498_v21, %v2482_v4 }
 0x45d   :  { %v2504_v10 = vmul.f32 %v2827_v1, %v2499_v14 }
 0x45f   :  { %v2509_v55 = vadd.f32 %v2828_v61, %v2504_v10 }
 0x461   :  { %2510 = vst.msk [vmem:[#allocation2] sm:$0x3] %vm2470_vm15, %v2509_v55 }
 0x462   :  { %2521 = dma.vmem_to_hbm [thread:$0]  %s2517_s23, 32, %s2519_s26, [#allocation3]  }
 0x463   :  { %2857 = dma.done.wait [#allocation3], 32  }
 0x464   :  { %2858 = vsyncadd [#allocation3], 4294967264 }
 0x465   :  { %2526 = vsyncpa [#allocation3], 1 }

</bundles_post_ra>
